<compile_context>
chip_gen: v7x
topology: tpu7x:2x2x1
jax: 0.10.0
libtpu: 0.0.40
codegen_flags: <defaults>
</compile_context>

<pallas_src>
import functools

import numpy as np
import jax
import jax.numpy as jnp
from jax.experimental import pallas as pl
from jax.experimental.pallas import tpu as pltpu


# ---------------------------------------------------------------------------
# Fused Pallas kernel
# ---------------------------------------------------------------------------

def _repafa_fused_kernel(xp_ref, wab_ref, bval_ref, wdw_ref, bdw_ref,
                         wff_ref, bff_ref, o_ref, *, H, W, hidden):
    """Whole RepAFA_Block forward for one batch image.

    xp_ref  : (1, H+6, W+6, Cin) bf16   input, zero-padded by 3 on H and W
    wab_ref : (14*Cin, hidden)   bf16   folded horizontal+vertical taps composed with v 1x1
    bval_ref: (1, hidden)        f32    folded bias of the fused k/q/v stage
    wdw_ref : (9, hidden)        f32    ff depthwise 3x3 weights (BN folded), row = kh*3+kw
    bdw_ref : (1, hidden)        f32    ff depthwise bias
    wff_ref : (out_ch, hidden)   bf16   ff 1x1 weights (BN folded)
    bff_ref : (out_ch, 1)        f32    ff 1x1 bias
    o_ref   : (1, out_ch, H*W)   f32    output (channel-major, lane-dense H*W last)
    """
    f32 = jnp.float32
    HW = H * W
    xp = xp_ref[0]                                          # (H+6, W+6, Cin) bf16

    # ---- stage 1: reparam 7-tap k (along W) + q (along H) + concat + v 1x1 + BN + SiLU,
    #      folded into ONE im2col matmul (bf16 operands, f32 accumulation on the MXU). ----
    taps = [xp[3:3 + H, t:t + W, :] for t in range(7)]      # horizontal taps (k branch)
    taps += [xp[t:t + H, 3:3 + W, :] for t in range(7)]     # vertical taps   (q branch)
    patches = jnp.concatenate(taps, axis=2).reshape(HW, -1)  # (HW, 14*Cin) bf16
    val = jnp.dot(patches, wab_ref[...],
                  preferred_element_type=f32) + bval_ref[...]        # (HW, hidden) f32
    val = val * jax.nn.sigmoid(val)                         # SiLU after the v 1x1 (f32)

    # ---- stage 2a: ff depthwise 3x3 + BN, from shifted flat slices + column edge masks.
    #      No padded VMEM scratch, no per-step re-zero, no misaligned ref stores:
    #      the zero extension is a sublane-aligned (multiple-of-8) value concat, H-edge
    #      taps land in the zero pad and W-edge wraps are killed by the column masks. ----
    pad_rows = ((W + 1 + 7) // 8) * 8                       # >= W+1, multiple of 8
    zpad = jnp.zeros((pad_rows, hidden), f32)
    vpad = jnp.concatenate([zpad, val, zpad], axis=0)       # (HW + 2*pad_rows, hidden)
    col = jax.lax.broadcasted_iota(jnp.int32, (HW, 1), 0) % W
    m_w = (jnp.where(col >= 1, 1.0, 0.0),                   # reading col-1 valid
           None,                                            # reading col   always valid
           jnp.where(col <= W - 2, 1.0, 0.0))               # reading col+1 valid
    wdw = wdw_ref[...]                                      # (9, hidden) f32
    dw = jnp.zeros((HW, hidden), f32) + bdw_ref[...]
    for kh in range(3):
        for kw in range(3):
            off = (kh - 1) * W + (kw - 1)
            src = vpad[pad_rows + off: pad_rows + off + HW, :]
            if m_w[kw] is not None:
                src = src * m_w[kw]                         # zero taps that wrap across rows
            k = kh * 3 + kw
            dw = dw + src * wdw[k:k + 1, :]

    # ---- stage 2b: ff 1x1 + BN + final SiLU, one MXU matmul produced directly in
    #      channel-major (out_ch, HW) form so the output store is lane-dense. ----
    y = jax.lax.dot_general(wff_ref[...], dw.astype(jnp.bfloat16),
                            dimension_numbers=(((1,), (1,)), ((), ())),
                            preferred_element_type=f32)     # (out_ch, HW) f32
    y = y + bff_ref[...]
    y = y * jax.nn.sigmoid(y)                               # final SiLU
    o_ref[0] = y.astype(o_ref.dtype)


# ---------------------------------------------------------------------------
# Wrapper
# ---------------------------------------------------------------------------

def _vmem_limit_bytes(h, w, cin, hidden, out_ch):
    """Scoped-VMEM limit from the actual per-step footprint (review item), capped at
    48 MiB so it is also valid on v7x (64 MiB physical per TensorCore)."""
    hw = h * w
    pad_rows = ((w + 1 + 7) // 8) * 8
    io_blocks = 2 * ((h + 6) * (w + 6) * cin * 2 + out_ch * hw * 4)   # double-buffered
    weights = (14 * cin * hidden * 2 + 9 * hidden * 4 + out_ch * hidden * 2
               + (2 * hidden + out_ch) * 4)
    live = (hw * 14 * cin * 2 + 2 * hw * hidden * 4
            + (hw + 2 * pad_rows) * hidden * 4 + out_ch * hw * 4)
    est = io_blocks + weights + live
    return int(min(max(4 * est + (4 << 20), 8 << 20), 48 << 20))


def repafa_block_forward(x_nchw, folded, *, in_ch, out_ch, expans=3):
    """RepAFA_Block forward. Input/output are NCHW (PyTorch layout)."""
    hidden = in_ch * expans
    n, cin, h, w = x_nchw.shape
    assert cin == in_ch
    hw = h * w

    # NCHW -> NHWC (channel-last so the folded contraction dim is minor), pad H/W by 3,
    # cast once to bf16 (MXU operand dtype; also halves the input DMA). Accumulation
    # inside the kernel stays f32.
    x = jnp.transpose(x_nchw, (0, 2, 3, 1)).astype(jnp.bfloat16)
    xp = jnp.pad(x, ((0, 0), (3, 3), (3, 3), (0, 0)))

    kernel = functools.partial(_repafa_fused_kernel, H=h, W=w, hidden=hidden)

    out = pl.pallas_call(
        kernel,
        out_shape=jax.ShapeDtypeStruct((n, out_ch, hw), jnp.float32),
        grid=(n,),
        in_specs=[
            pl.BlockSpec((1, h + 6, w + 6, cin), lambda i: (i, 0, 0, 0)),
            pl.BlockSpec((14 * cin, hidden), lambda i: (0, 0)),
            pl.BlockSpec((1, hidden), lambda i: (0, 0)),
            pl.BlockSpec((9, hidden), lambda i: (0, 0)),
            pl.BlockSpec((1, hidden), lambda i: (0, 0)),
            pl.BlockSpec((out_ch, hidden), lambda i: (0, 0)),
            pl.BlockSpec((out_ch, 1), lambda i: (0, 0)),
        ],
        out_specs=pl.BlockSpec((1, out_ch, hw), lambda i: (i, 0, 0)),
        compiler_params=pltpu.CompilerParams(
            dimension_semantics=("parallel",),           # batch images independent
            vmem_limit_bytes=_vmem_limit_bytes(h, w, cin, hidden, out_ch),
        ),
    )(xp, folded['w_ab'], folded['bias_val'], folded['wdw'], folded['bias_dw'],
      folded['wff_t'], folded['bias_ff'])

    # Output is already channel-major: only a free reshape to NCHW, no transpose.
    return out.reshape(n, out_ch, h, w)


# ---------------------------------------------------------------------------
# Parameter folding (all BNs / reparam branches / grouped expansion / v 1x1)
# ---------------------------------------------------------------------------

def _bn_scale_bias(bn, eps):
    g, b, m, v = bn
    s = g / jnp.sqrt(v + eps)
    return s, b - m * s


def fold_params(raw):
    eps = raw['eps']
    expans = raw['expans']
    cin = raw['in_ch']
    hidden = cin * expans
    out_ch = raw['out_ch']

    def branch_eff(br):
        # 7/5/3-tap depthwise-grouped 1D convs (each + BN), summed, + outer BN
        w_eff = jnp.zeros((7, hidden), jnp.float32)
        b_eff = jnp.zeros((hidden,), jnp.float32)
        for w_, bn, off in zip(br['ws'], br['bns'], (0, 1, 2)):
            s, b = _bn_scale_bias(bn, eps)
            w_eff = w_eff.at[off:off + w_.shape[0]].add(w_ * s)
            b_eff = b_eff + b
        so, bo = _bn_scale_bias(br['bn_out'], eps)
        return w_eff * so, so * b_eff + bo                    # (7, hidden), (hidden,)

    wk, bk = branch_eff(raw['k'])                             # horizontal (along W)
    wq, bq = branch_eff(raw['q'])                             # vertical   (along H)

    sv, bv = _bn_scale_bias(raw['v_bn'], eps)
    vw = raw['v_w']                                           # (hidden_out, 2*hidden_in)
    v_key = (vw[:, :hidden] * sv[:, None]).T                  # (hidden_key, hidden_out)
    v_qry = (vw[:, hidden:] * sv[:, None]).T                  # (hidden_qry, hidden_out)

    # grouped conv: hidden channel i reads input channel i // expans
    a_mat = jnp.einsum('tce,ceo->tco', wk.reshape(7, cin, expans),
                       v_key.reshape(cin, expans, hidden))    # (7, Cin, hidden)
    b_mat = jnp.einsum('tce,ceo->tco', wq.reshape(7, cin, expans),
                       v_qry.reshape(cin, expans, hidden))
    bias_val = bk @ v_key + bq @ v_qry + bv

    # Pre-concatenate the 14 folded tap matrices in the SAME tap-major / channel-minor
    # column order the kernel builds its im2col patches; pre-cast to bf16 for the MXU.
    w_ab = jnp.concatenate([a_mat.reshape(7 * cin, hidden),
                            b_mat.reshape(7 * cin, hidden)], axis=0).astype(jnp.bfloat16)

    sd, bd = _bn_scale_bias(raw['ffdw_bn'], eps)
    wdw9 = (raw['ffdw_w'] * sd).reshape(9, hidden)            # row k = kh*3 + kw
    sf, bf = _bn_scale_bias(raw['ffpw_bn'], eps)
    wff_t = (raw['ffpw_w'] * sf[:, None]).astype(jnp.bfloat16)   # (out_ch, hidden)

    return dict(w_ab=w_ab, bias_val=bias_val.reshape(1, hidden),
                wdw=wdw9, bias_dw=bd.reshape(1, hidden),
                wff_t=wff_t, bias_ff=bf.reshape(out_ch, 1))


def init_raw_params(key, in_ch, out_ch, expans=3):
    hidden = in_ch * expans
    keys = iter(jax.random.split(key, 128))

    def nrm(shape, scale=0.3):
        return scale * jax.random.normal(next(keys), shape, dtype=jnp.float32)

    def bn(c):
        g = 1.0 + 0.1 * jax.random.normal(next(keys), (c,), dtype=jnp.float32)
        b = 0.1 * jax.random.normal(next(keys), (c,), dtype=jnp.float32)
        m = 0.1 * jax.random.normal(next(keys), (c,), dtype=jnp.float32)
        v = 1.0 + 0.1 * jax.random.uniform(next(keys), (c,), dtype=jnp.float32)
        return (g, b, m, v)

    def branch():
        return dict(ws=[nrm((7, hidden)), nrm((5, hidden)), nrm((3, hidden))],
                    bns=[bn(hidden), bn(hidden), bn(hidden)],
                    bn_out=bn(hidden))

    return dict(in_ch=in_ch, out_ch=out_ch, expans=expans, eps=1e-5,
                k=branch(), q=branch(),
                v_w=nrm((hidden, 2 * hidden)), v_bn=bn(hidden),
                ffdw_w=nrm((3, 3, hidden)), ffdw_bn=bn(hidden),
                ffpw_w=nrm((out_ch, hidden)), ffpw_bn=bn(out_ch))


# ---------------------------------------------------------------------------
# Pure-JAX reference (unfolded, mirrors the PyTorch module op by op, all f32)
# ---------------------------------------------------------------------------

def _ref_forward(x_nchw, raw):
    eps = raw['eps']
    expans = raw['expans']
    x = jnp.transpose(x_nchw, (0, 2, 3, 1)).astype(jnp.float32)    # NHWC
    n, h, w, cin = x.shape
    hidden = cin * expans

    def bn(v, p):
        g, b, m, var = p
        s = g / jnp.sqrt(var + eps)
        return v * s + (b - m * s)

    def silu(v):
        return v * jax.nn.sigmoid(v)

    # grouped conv with groups=in_ch: hidden channel o reads input channel o // expans
    xe = jnp.repeat(x, expans, axis=-1)

    def dwconv1d(v, w_, pad, axis):
        ks = w_.shape[0]
        cfg = [(0, 0)] * 4
        cfg[axis] = (pad, pad)
        vp = jnp.pad(v, cfg)
        out = jnp.zeros_like(v)
        for t in range(ks):
            sl = [slice(None)] * 4
            sl[axis] = slice(t, t + v.shape[axis])
            out = out + vp[tuple(sl)] * w_[t]
        return out

    def repsp(br, axis):
        acc = jnp.zeros((n, h, w, hidden), jnp.float32)
        for w_, bnp, pad in zip(br['ws'], br['bns'], (3, 2, 1)):
            acc = acc + bn(dwconv1d(xe, w_, pad, axis), bnp)
        return bn(acc, br['bn_out'])

    key_ = repsp(raw['k'], axis=2)        # ver=False: along W
    query = repsp(raw['q'], axis=1)       # ver=True : along H
    cat = jnp.concatenate([key_, query], axis=-1)
    val = silu(bn(jnp.einsum('nhwc,oc->nhwo', cat, raw['v_w']), raw['v_bn']))

    vp = jnp.pad(val, ((0, 0), (1, 1), (1, 1), (0, 0)))
    dw = jnp.zeros_like(val)
    for kh in range(3):
        for kw in range(3):
            dw = dw + vp[:, kh:kh + h, kw:kw + w, :] * raw['ffdw_w'][kh, kw]
    dw = bn(dw, raw['ffdw_bn'])
    y = silu(bn(jnp.einsum('nhwc,oc->nhwo', dw, raw['ffpw_w']), raw['ffpw_bn']))
    return jnp.transpose(y, (0, 3, 1, 2))


# ---------------------------------------------------------------------------
# main
# ---------------------------------------------------------------------------

if __name__ == "__main__":
    key = jax.random.PRNGKey(0)
    kx, kp = jax.random.split(key)
    N, IN_CH, OUT_CH, H, W = 2, 4, 4, 16, 16          # hidden = in_ch * expans = 12
    x = jax.random.normal(kx, (N, IN_CH, H, W), dtype=jnp.float32)   # NCHW like PyTorch

    raw = init_raw_params(kp, IN_CH, OUT_CH, expans=3)
    folded = fold_params(raw)

    out = repafa_block_forward(x, folded, in_ch=IN_CH, out_ch=OUT_CH, expans=3)
    out = jax.block_until_ready(out)

    ref = _ref_forward(x, raw)
    # bf16 MXU operands (f32 accumulation) vs the all-f32 reference -> slightly looser
    # tolerance than the previous pure-f32 VPU version.
    np.testing.assert_allclose(np.asarray(out), np.asarray(ref), rtol=2e-2, atol=2e-2)
    assert out.shape == (N, OUT_CH, H, W)
    print("KERNEL_OK")
</pallas_src>

<mosaic_0001>
module attributes {stable_mosaic.version = 11 : i64} {
  func.func @_repafa_fused_kernel(%arg0: i32, %arg1: memref<1x22x22x4xbf16, #tpu.memory_space<vmem>>, %arg2: memref<56x12xbf16, #tpu.memory_space<vmem>>, %arg3: memref<1x12xf32, #tpu.memory_space<vmem>>, %arg4: memref<9x12xf32, #tpu.memory_space<vmem>>, %arg5: memref<1x12xf32, #tpu.memory_space<vmem>>, %arg6: memref<4x12xbf16, #tpu.memory_space<vmem>>, %arg7: memref<4x1xf32, #tpu.memory_space<vmem>>, %arg8: memref<1x4x256xf32, #tpu.memory_space<vmem>>) attributes {dimension_semantics = [#tpu.dimension_semantics<parallel>], iteration_bounds = array<i64: 2>, scalar_prefetch = 0 : i64, scratch_operands = 0 : i64, tpu.core_type = #tpu.core_type<tc>, window_params = [{transform_indices = @transform_0, window_bounds = array<i64: 1, 22, 22, 4>}, {pipeline_mode = #tpu.pipeline_mode<synchronous>, transform_indices = @transform_1, window_bounds = array<i64: 56, 12>}, {pipeline_mode = #tpu.pipeline_mode<synchronous>, transform_indices = @transform_2, window_bounds = array<i64: 1, 12>}, {pipeline_mode = #tpu.pipeline_mode<synchronous>, transform_indices = @transform_3, window_bounds = array<i64: 9, 12>}, {pipeline_mode = #tpu.pipeline_mode<synchronous>, transform_indices = @transform_4, window_bounds = array<i64: 1, 12>}, {pipeline_mode = #tpu.pipeline_mode<synchronous>, transform_indices = @transform_5, window_bounds = array<i64: 4, 12>}, {pipeline_mode = #tpu.pipeline_mode<synchronous>, transform_indices = @transform_6, window_bounds = array<i64: 4, 1>}, {transform_indices = @transform_7, window_bounds = array<i64: 1, 4, 256>}]} {
    %c0 = arith.constant 0 : index
    %c0_0 = arith.constant 0 : index
    %c0_1 = arith.constant 0 : index
    %c0_2 = arith.constant 0 : index
    %0 = vector.load %arg1[%c0, %c0_0, %c0_1, %c0_2] : memref<1x22x22x4xbf16, #tpu.memory_space<vmem>>, vector<1x22x22x4xbf16>
    %1 = vector.shape_cast %0 : vector<1x22x22x4xbf16> to vector<22x22x4xbf16>
    %2 = vector.extract_strided_slice %1 {offsets = [3, 0, 0], sizes = [16, 16, 4], strides = [1, 1, 1]} : vector<22x22x4xbf16> to vector<16x16x4xbf16>
    %3 = vector.extract_strided_slice %1 {offsets = [3, 1, 0], sizes = [16, 16, 4], strides = [1, 1, 1]} : vector<22x22x4xbf16> to vector<16x16x4xbf16>
    %4 = vector.extract_strided_slice %1 {offsets = [3, 2, 0], sizes = [16, 16, 4], strides = [1, 1, 1]} : vector<22x22x4xbf16> to vector<16x16x4xbf16>
    %5 = vector.extract_strided_slice %1 {offsets = [3, 3, 0], sizes = [16, 16, 4], strides = [1, 1, 1]} : vector<22x22x4xbf16> to vector<16x16x4xbf16>
    %6 = vector.extract_strided_slice %1 {offsets = [3, 4, 0], sizes = [16, 16, 4], strides = [1, 1, 1]} : vector<22x22x4xbf16> to vector<16x16x4xbf16>
    %7 = vector.extract_strided_slice %1 {offsets = [3, 5, 0], sizes = [16, 16, 4], strides = [1, 1, 1]} : vector<22x22x4xbf16> to vector<16x16x4xbf16>
    %8 = vector.extract_strided_slice %1 {offsets = [3, 6, 0], sizes = [16, 16, 4], strides = [1, 1, 1]} : vector<22x22x4xbf16> to vector<16x16x4xbf16>
    %9 = vector.extract_strided_slice %1 {offsets = [0, 3, 0], sizes = [16, 16, 4], strides = [1, 1, 1]} : vector<22x22x4xbf16> to vector<16x16x4xbf16>
    %10 = vector.extract_strided_slice %1 {offsets = [1, 3, 0], sizes = [16, 16, 4], strides = [1, 1, 1]} : vector<22x22x4xbf16> to vector<16x16x4xbf16>
    %11 = vector.extract_strided_slice %1 {offsets = [2, 3, 0], sizes = [16, 16, 4], strides = [1, 1, 1]} : vector<22x22x4xbf16> to vector<16x16x4xbf16>
    %12 = vector.extract_strided_slice %1 {offsets = [3, 3, 0], sizes = [16, 16, 4], strides = [1, 1, 1]} : vector<22x22x4xbf16> to vector<16x16x4xbf16>
    %13 = vector.extract_strided_slice %1 {offsets = [4, 3, 0], sizes = [16, 16, 4], strides = [1, 1, 1]} : vector<22x22x4xbf16> to vector<16x16x4xbf16>
    %14 = vector.extract_strided_slice %1 {offsets = [5, 3, 0], sizes = [16, 16, 4], strides = [1, 1, 1]} : vector<22x22x4xbf16> to vector<16x16x4xbf16>
    %15 = vector.extract_strided_slice %1 {offsets = [6, 3, 0], sizes = [16, 16, 4], strides = [1, 1, 1]} : vector<22x22x4xbf16> to vector<16x16x4xbf16>
    %16 = tpu.concatenate %2, %3, %4, %5, %6, %7, %8, %9, %10, %11, %12, %13, %14, %15 in 2 : vector<16x16x4xbf16>, vector<16x16x4xbf16>, vector<16x16x4xbf16>, vector<16x16x4xbf16>, vector<16x16x4xbf16>, vector<16x16x4xbf16>, vector<16x16x4xbf16>, vector<16x16x4xbf16>, vector<16x16x4xbf16>, vector<16x16x4xbf16>, vector<16x16x4xbf16>, vector<16x16x4xbf16>, vector<16x16x4xbf16>, vector<16x16x4xbf16> -> vector<16x16x56xbf16>
    %17 = vector.shape_cast %16 : vector<16x16x56xbf16> to vector<256x56xbf16>
    %c0_3 = arith.constant 0 : index
    %c0_4 = arith.constant 0 : index
    %18 = vector.load %arg2[%c0_3, %c0_4] : memref<56x12xbf16, #tpu.memory_space<vmem>>, vector<56x12xbf16>
    %cst = arith.constant dense<0.000000e+00> : vector<256x12xf32>
    %19 = tpu.matmul %17, %18, %cst {dimension_numbers = #tpu.dot_dimension_numbers<[1], [0], [0], [1], [0, 0, 1, 1], [], []>} : vector<256x56xbf16>, vector<56x12xbf16>, vector<256x12xf32> -> vector<256x12xf32>
    %c0_5 = arith.constant 0 : index
    %c0_6 = arith.constant 0 : index
    %20 = vector.load %arg3[%c0_5, %c0_6] : memref<1x12xf32, #tpu.memory_space<vmem>>, vector<1x12xf32>
    %21 = vector.broadcast %20 : vector<1x12xf32> to vector<256x12xf32>
    %22 = arith.addf %19, %21 : vector<256x12xf32>
    %23 = arith.negf %22 : vector<256x12xf32>
    %24 = math.exp %23 : vector<256x12xf32>
    %cst_7 = arith.constant 1.000000e+00 : f32
    %25 = vector.broadcast %cst_7 : f32 to vector<256x12xf32>
    %26 = arith.addf %25, %24 : vector<256x12xf32>
    %27 = arith.divf %25, %26 : vector<256x12xf32>
    %28 = arith.mulf %22, %27 : vector<256x12xf32>
    %cst_8 = arith.constant 0.000000e+00 : f32
    %29 = vector.broadcast %cst_8 : f32 to vector<24x12xf32>
    %30 = tpu.concatenate %29, %28, %29 in 0 : vector<24x12xf32>, vector<256x12xf32>, vector<24x12xf32> -> vector<304x12xf32>
    %31 = tpu.iota {dimensions = array<i32: 0>} : vector<256x1xi32>
    %c16_i32 = arith.constant 16 : i32
    %c0_i32 = arith.constant 0 : i32
    %32 = arith.cmpi eq, %c16_i32, %c0_i32 : i32
    %c1_i32 = arith.constant 1 : i32
    %33 = arith.select %32, %c1_i32, %c16_i32 : i32
    %34 = vector.broadcast %33 : i32 to vector<256x1xi32>
    %35 = arith.remsi %31, %34 : vector<256x1xi32>
    %c0_i32_9 = arith.constant 0 : i32
    %36 = vector.broadcast %c0_i32_9 : i32 to vector<256x1xi32>
    %37 = arith.cmpi ne, %35, %36 : vector<256x1xi32>
    %c0_i32_10 = arith.constant 0 : i32
    %38 = vector.broadcast %c0_i32_10 : i32 to vector<256x1xi32>
    %39 = arith.cmpi slt, %35, %38 : vector<256x1xi32>
    %c0_i32_11 = arith.constant 0 : i32
    %40 = arith.cmpi slt, %33, %c0_i32_11 : i32
    %41 = vector.broadcast %40 : i1 to vector<256x1xi1>
    %42 = vector.broadcast %41 : vector<256x1xi1> to vector<256x1xi1>
    %43 = arith.xori %39, %42 : vector<256x1xi1>
    %44 = arith.andi %43, %37 : vector<256x1xi1>
    %45 = vector.broadcast %33 : i32 to vector<256x1xi32>
    %46 = arith.addi %35, %45 : vector<256x1xi32>
    %47 = arith.select %44, %46, %35 : vector<256x1xi1>, vector<256x1xi32>
    %c1_i32_12 = arith.constant 1 : i32
    %48 = vector.broadcast %c1_i32_12 : i32 to vector<256x1xi32>
    %49 = arith.cmpi sge, %47, %48 : vector<256x1xi32>
    %cst_13 = arith.constant 1.000000e+00 : f32
    %cst_14 = arith.constant 0.000000e+00 : f32
    %50 = vector.broadcast %cst_13 : f32 to vector<256x1xf32>
    %51 = vector.broadcast %cst_14 : f32 to vector<256x1xf32>
    %52 = arith.select %49, %50, %51 : vector<256x1xi1>, vector<256x1xf32>
    %c14_i32 = arith.constant 14 : i32
    %53 = vector.broadcast %c14_i32 : i32 to vector<256x1xi32>
    %54 = arith.cmpi sle, %47, %53 : vector<256x1xi32>
    %cst_15 = arith.constant 1.000000e+00 : f32
    %cst_16 = arith.constant 0.000000e+00 : f32
    %55 = vector.broadcast %cst_15 : f32 to vector<256x1xf32>
    %56 = vector.broadcast %cst_16 : f32 to vector<256x1xf32>
    %57 = arith.select %54, %55, %56 : vector<256x1xi1>, vector<256x1xf32>
    %c0_17 = arith.constant 0 : index
    %c0_18 = arith.constant 0 : index
    %58 = vector.load %arg4[%c0_17, %c0_18] : memref<9x12xf32, #tpu.memory_space<vmem>>, vector<9x12xf32>
    %cst_19 = arith.constant 0.000000e+00 : f32
    %59 = vector.broadcast %cst_19 : f32 to vector<256x12xf32>
    %c0_20 = arith.constant 0 : index
    %c0_21 = arith.constant 0 : index
    %60 = vector.load %arg5[%c0_20, %c0_21] : memref<1x12xf32, #tpu.memory_space<vmem>>, vector<1x12xf32>
    %61 = vector.broadcast %60 : vector<1x12xf32> to vector<256x12xf32>
    %62 = arith.addf %59, %61 : vector<256x12xf32>
    %63 = vector.extract_strided_slice %30 {offsets = [7, 0], sizes = [256, 12], strides = [1, 1]} : vector<304x12xf32> to vector<256x12xf32>
    %64 = vector.broadcast %52 : vector<256x1xf32> to vector<256x12xf32>
    %65 = arith.mulf %63, %64 : vector<256x12xf32>
    %66 = vector.extract_strided_slice %58 {offsets = [0, 0], sizes = [1, 12], strides = [1, 1]} : vector<9x12xf32> to vector<1x12xf32>
    %67 = vector.broadcast %66 : vector<1x12xf32> to vector<256x12xf32>
    %68 = arith.mulf %65, %67 : vector<256x12xf32>
    %69 = arith.addf %62, %68 : vector<256x12xf32>
    %70 = vector.extract_strided_slice %30 {offsets = [8, 0], sizes = [256, 12], strides = [1, 1]} : vector<304x12xf32> to vector<256x12xf32>
    %71 = vector.extract_strided_slice %58 {offsets = [1, 0], sizes = [1, 12], strides = [1, 1]} : vector<9x12xf32> to vector<1x12xf32>
    %72 = vector.broadcast %71 : vector<1x12xf32> to vector<256x12xf32>
    %73 = arith.mulf %70, %72 : vector<256x12xf32>
    %74 = arith.addf %69, %73 : vector<256x12xf32>
    %75 = vector.extract_strided_slice %30 {offsets = [9, 0], sizes = [256, 12], strides = [1, 1]} : vector<304x12xf32> to vector<256x12xf32>
    %76 = vector.broadcast %57 : vector<256x1xf32> to vector<256x12xf32>
    %77 = arith.mulf %75, %76 : vector<256x12xf32>
    %78 = vector.extract_strided_slice %58 {offsets = [2, 0], sizes = [1, 12], strides = [1, 1]} : vector<9x12xf32> to vector<1x12xf32>
    %79 = vector.broadcast %78 : vector<1x12xf32> to vector<256x12xf32>
    %80 = arith.mulf %77, %79 : vector<256x12xf32>
    %81 = arith.addf %74, %80 : vector<256x12xf32>
    %82 = vector.extract_strided_slice %30 {offsets = [23, 0], sizes = [256, 12], strides = [1, 1]} : vector<304x12xf32> to vector<256x12xf32>
    %83 = vector.broadcast %52 : vector<256x1xf32> to vector<256x12xf32>
    %84 = arith.mulf %82, %83 : vector<256x12xf32>
    %85 = vector.extract_strided_slice %58 {offsets = [3, 0], sizes = [1, 12], strides = [1, 1]} : vector<9x12xf32> to vector<1x12xf32>
    %86 = vector.broadcast %85 : vector<1x12xf32> to vector<256x12xf32>
    %87 = arith.mulf %84, %86 : vector<256x12xf32>
    %88 = arith.addf %81, %87 : vector<256x12xf32>
    %89 = vector.extract_strided_slice %30 {offsets = [24, 0], sizes = [256, 12], strides = [1, 1]} : vector<304x12xf32> to vector<256x12xf32>
    %90 = vector.extract_strided_slice %58 {offsets = [4, 0], sizes = [1, 12], strides = [1, 1]} : vector<9x12xf32> to vector<1x12xf32>
    %91 = vector.broadcast %90 : vector<1x12xf32> to vector<256x12xf32>
    %92 = arith.mulf %89, %91 : vector<256x12xf32>
    %93 = arith.addf %88, %92 : vector<256x12xf32>
    %94 = vector.extract_strided_slice %30 {offsets = [25, 0], sizes = [256, 12], strides = [1, 1]} : vector<304x12xf32> to vector<256x12xf32>
    %95 = vector.broadcast %57 : vector<256x1xf32> to vector<256x12xf32>
    %96 = arith.mulf %94, %95 : vector<256x12xf32>
    %97 = vector.extract_strided_slice %58 {offsets = [5, 0], sizes = [1, 12], strides = [1, 1]} : vector<9x12xf32> to vector<1x12xf32>
    %98 = vector.broadcast %97 : vector<1x12xf32> to vector<256x12xf32>
    %99 = arith.mulf %96, %98 : vector<256x12xf32>
    %100 = arith.addf %93, %99 : vector<256x12xf32>
    %101 = vector.extract_strided_slice %30 {offsets = [39, 0], sizes = [256, 12], strides = [1, 1]} : vector<304x12xf32> to vector<256x12xf32>
    %102 = vector.broadcast %52 : vector<256x1xf32> to vector<256x12xf32>
    %103 = arith.mulf %101, %102 : vector<256x12xf32>
    %104 = vector.extract_strided_slice %58 {offsets = [6, 0], sizes = [1, 12], strides = [1, 1]} : vector<9x12xf32> to vector<1x12xf32>
    %105 = vector.broadcast %104 : vector<1x12xf32> to vector<256x12xf32>
    %106 = arith.mulf %103, %105 : vector<256x12xf32>
    %107 = arith.addf %100, %106 : vector<256x12xf32>
    %108 = vector.extract_strided_slice %30 {offsets = [40, 0], sizes = [256, 12], strides = [1, 1]} : vector<304x12xf32> to vector<256x12xf32>
    %109 = vector.extract_strided_slice %58 {offsets = [7, 0], sizes = [1, 12], strides = [1, 1]} : vector<9x12xf32> to vector<1x12xf32>
    %110 = vector.broadcast %109 : vector<1x12xf32> to vector<256x12xf32>
    %111 = arith.mulf %108, %110 : vector<256x12xf32>
    %112 = arith.addf %107, %111 : vector<256x12xf32>
    %113 = vector.extract_strided_slice %30 {offsets = [41, 0], sizes = [256, 12], strides = [1, 1]} : vector<304x12xf32> to vector<256x12xf32>
    %114 = vector.broadcast %57 : vector<256x1xf32> to vector<256x12xf32>
    %115 = arith.mulf %113, %114 : vector<256x12xf32>
    %116 = vector.extract_strided_slice %58 {offsets = [8, 0], sizes = [1, 12], strides = [1, 1]} : vector<9x12xf32> to vector<1x12xf32>
    %117 = vector.broadcast %116 : vector<1x12xf32> to vector<256x12xf32>
    %118 = arith.mulf %115, %117 : vector<256x12xf32>
    %119 = arith.addf %112, %118 : vector<256x12xf32>
    %c0_22 = arith.constant 0 : index
    %c0_23 = arith.constant 0 : index
    %120 = vector.load %arg6[%c0_22, %c0_23] : memref<4x12xbf16, #tpu.memory_space<vmem>>, vector<4x12xbf16>
    %121 = arith.truncf %119 : vector<256x12xf32> to vector<256x12xbf16>
    %cst_24 = arith.constant dense<0.000000e+00> : vector<4x256xf32>
    %122 = tpu.matmul %120, %121, %cst_24 {dimension_numbers = #tpu.dot_dimension_numbers<[1], [1], [0], [0], [0, 0, 1, 0], [], []>} : vector<4x12xbf16>, vector<256x12xbf16>, vector<4x256xf32> -> vector<4x256xf32>
    %c0_25 = arith.constant 0 : index
    %c0_26 = arith.constant 0 : index
    %123 = vector.load %arg7[%c0_25, %c0_26] : memref<4x1xf32, #tpu.memory_space<vmem>>, vector<4x1xf32>
    %124 = vector.broadcast %123 : vector<4x1xf32> to vector<4x256xf32>
    %125 = arith.addf %122, %124 : vector<4x256xf32>
    %126 = arith.negf %125 : vector<4x256xf32>
    %127 = math.exp %126 : vector<4x256xf32>
    %cst_27 = arith.constant 1.000000e+00 : f32
    %128 = vector.broadcast %cst_27 : f32 to vector<4x256xf32>
    %129 = arith.addf %128, %127 : vector<4x256xf32>
    %130 = arith.divf %128, %129 : vector<4x256xf32>
    %131 = arith.mulf %125, %130 : vector<4x256xf32>
    %c0_28 = arith.constant 0 : index
    %c0_29 = arith.constant 0 : index
    %c0_30 = arith.constant 0 : index
    %132 = vector.load %arg8[%c0_28, %c0_29, %c0_30] : memref<1x4x256xf32, #tpu.memory_space<vmem>>, vector<1x4x256xf32>
    %133 = vector.shape_cast %132 : vector<1x4x256xf32> to vector<4x256xf32>
    %134 = vector.shape_cast %131 : vector<4x256xf32> to vector<1x4x256xf32>
    tpu.vector_store %arg8[%c0_28, %c0_29, %c0_30], %134 {strides = array<i32>} : memref<1x4x256xf32, #tpu.memory_space<vmem>>, vector<1x4x256xf32>,
    return
  }
  func.func @transform_0(%arg0: i32) -> (i32, i32, i32, i32) {
    %c0_i32 = arith.constant 0 : i32
    %c0_i32_0 = arith.constant 0 : i32
    %c0_i32_1 = arith.constant 0 : i32
    %c0_i32_2 = arith.constant 0 : i32
    return %arg0, %c0_i32, %c0_i32_0, %c0_i32_1 : i32, i32, i32, i32
  }
  func.func @transform_1(%arg0: i32) -> (i32, i32) {
    %c0_i32 = arith.constant 0 : i32
    %c0_i32_0 = arith.constant 0 : i32
    %c0_i32_1 = arith.constant 0 : i32
    return %c0_i32, %c0_i32_0 : i32, i32
  }
  func.func @transform_2(%arg0: i32) -> (i32, i32) {
    %c0_i32 = arith.constant 0 : i32
    %c0_i32_0 = arith.constant 0 : i32
    %c0_i32_1 = arith.constant 0 : i32
    return %c0_i32, %c0_i32_0 : i32, i32
  }
  func.func @transform_3(%arg0: i32) -> (i32, i32) {
    %c0_i32 = arith.constant 0 : i32
    %c0_i32_0 = arith.constant 0 : i32
    %c0_i32_1 = arith.constant 0 : i32
    return %c0_i32, %c0_i32_0 : i32, i32
  }
  func.func @transform_4(%arg0: i32) -> (i32, i32) {
    %c0_i32 = arith.constant 0 : i32
    %c0_i32_0 = arith.constant 0 : i32
    %c0_i32_1 = arith.constant 0 : i32
    return %c0_i32, %c0_i32_0 : i32, i32
  }
  func.func @transform_5(%arg0: i32) -> (i32, i32) {
    %c0_i32 = arith.constant 0 : i32
    %c0_i32_0 = arith.constant 0 : i32
    %c0_i32_1 = arith.constant 0 : i32
    return %c0_i32, %c0_i32_0 : i32, i32
  }
  func.func @transform_6(%arg0: i32) -> (i32, i32) {
    %c0_i32 = arith.constant 0 : i32
    %c0_i32_0 = arith.constant 0 : i32
    %c0_i32_1 = arith.constant 0 : i32
    return %c0_i32, %c0_i32_0 : i32, i32
  }
  func.func @transform_7(%arg0: i32) -> (i32, i32, i32) {
    %c0_i32 = arith.constant 0 : i32
    %c0_i32_0 = arith.constant 0 : i32
    %c0_i32_1 = arith.constant 0 : i32
    return %arg0, %c0_i32, %c0_i32_0 : i32, i32, i32
  }
}

</mosaic_0001>

<bundles_post_ra>
// kernel: tpu_custom_call.1
= control target key start
LH: loop header
LB: loop body
LE: loop exit
PB: predicated region body
PF: predicated region fallthrough
CT: control target
= control target key end

     0   :  { %12 = vsyncpa [#allocation3], 0  ;;  %s10309_s0 = inlined_call_operand.vmem [shape: bf16[2,22,22,4], index: 0, kind: input, shape index: {}]   ;;  %s10310_s1 = inlined_call_operand.vmem [shape: bf16[56,12], index: 1, kind: input, shape index: {}]   ;;  %s10311_s2 = inlined_call_operand.vmem [shape: f32[1,12], index: 2, kind: input, shape index: {}]   ;;  %s10312_s3 = inlined_call_operand.vmem [shape: f32[9,12], index: 3, kind: input, shape index: {}]   ;;  %s10313_s4 = inlined_call_operand.vmem [shape: f32[1,12], index: 4, kind: input, shape index: {}]   ;;  %s10314_s5 = inlined_call_operand.vmem [shape: bf16[4,12], index: 5, kind: input, shape index: {}]   ;;  %s10315_s6 = inlined_call_operand.vmem [shape: f32[4,1], index: 6, kind: input, shape index: {}]   ;;  %s10316_s7 = inlined_call_operand.hbm [shape: f32[2,4,256], index: 7, kind: output, shape index: {}]  }
   0x1   :  { %14 = vsyncpa [#allocation3 + $0x1], 0  ;;  %s5877_s24 = smov 0   ;;  %s5879_s25 = smov 0  }
   0x2   :  { %s5881_s26 = smov 0   ;;  %s5883_s27 = smov 0  }
   0x3 LB: > { %s5898_s28 = sadd.s32 4294967295, %s5818_s27   ;;  %s5292_s29 = sadd.s32 4294967294, %s5818_s27   ;;  %s5818_s27 = sphi %s5883_s27, %s11101_s27   ;;  %s5814_s26 = sphi %s5881_s26, %s11100_s26   ;;  %s5810_s25 = sphi %s5879_s25, %s11099_s25   ;;  %s5806_s24 = sphi %s5877_s24, %s11098_s24  }
   0x4   : > { %s5902_s30 = sadd.s32 1, %s5818_s27   ;;  %s179_s8 = sadd.s32 1, %s5814_s26 }
   0x5   : > { %s176_s9 = ssub.s32 %s5818_s27, %s5902_s30  ;;  %p189_p0 = scmp.ne.s32.totalorder %s5814_s26, %s5810_s25 }
   0x6   : > { %p177_p1 = scmp.eq.s32.totalorder %s176_s9, 0  ;;  %p190_p2 = scmp.eq.s32.totalorder %s5898_s28, 1 }
   0x7   : > { %p195_p3 = scmp.ne.s32.totalorder %s5810_s25, %s5806_s24  ;;  %p196_p4 = scmp.eq.s32.totalorder %s5292_s29, 1 }
   0x8   : > { %s5913_s10 = scalar_select %p177_p1, %s5814_s26, %s179_s8  }
   0x9   : > { %p5915_p5 = por %p190_p2, %p189_p0  ;;  %p5919_p6 = por %p196_p4, %p195_p3 }
   0xa   : > { %p5295_p7 = scmp.ge.s32.totalorder %s5818_s27, 1  ;;  %p240_p8 = scmp.lt.s32.totalorder %s5818_s27, 3 }
   0xc   : > { %p241_p9 = pnand %p5295_p7, %p240_p8 }
   0xe   : > { %244 = sbr.rel (%p241_p9) target bundleno = 1184 (0x4a0), region = 48 }
  0x15   : > { %p272_p10 = scmp.lt.s32.totalorder %s5898_s28, 1  ;;  %vm10326_vm0 = vcmask 1045504   ;;  %vm10325_vm1 = vcmask 1046528   ;;  %vm10327_vm2 = vsmask.f32 7424  ;;  %s5820_s18 = smov 16  }
  0x16   : > { %vm10323_vm3 = vsmask.f32 6400  ;;  %s5821_s19 = smov 8   ;;  %vm1036_vm4 = vsmask.f32 5376  ;;  %s5822_s20 = smov 4  }
  0x17   : > { %s273_s13 = scalar_select %p272_p10, %s5898_s28, 1  ;;  %vm10322_vm5 = vcmask 1044480   ;;  %vm2133_vm6 = vcmask 1043456   ;;  %vm10321_vm7 = vcmask 31744   ;;  %vm10324_vm8 = vcmask 64512  }
  0x18   : > { %s5823_s21 = smov 12   ;;  %s5824_s22 = smov 20   ;;  %vm1702_vm9 = vcmask 97280   ;;  %vm1735_vm10 = vcmask 130048   ;;  %vm1768_vm11 = vcmask 162816   ;;  %vm1801_vm12 = vcmask 195584  }
  0x19   : > { %s5493_s14 = smul.u32 264, %s273_s13  ;;  %s5825_s23 = smov 24   ;;  %vm1834_vm13 = vcmask 228352   ;;  %vm1867_vm14 = vcmask 261120   ;;  %vm1900_vm15 = vcmask 293888  }
  0x1a   : > { %s5826_s29 = smov 28   ;;  %s10319_s8 = smov 32  }
  0x1b   : > { %s5930_s17 = scalar_lea.vmem %s10309_s0, %s5493_s14  ;;  %s10317_s9 = smov 36  }
  0x1c   : > { %v5933_v0 = vld [vmem:[%s5930_s17 + $0x24] sm:$0xff]   ;;  %v5936_v1 = vld [vmem:[%s5930_s17 + $0x2c] ss:$0 sps:$4 sm:$0x77]   ;;  %v5939_v2 = vld [vmem:[%s5930_s17 + $0x30] sm:$0xff]   ;;  %s5829_s13 = smov 40  }
  0x1d   : > { %v956_v3 = vrot.slane %v5933_v0, 2  ;;  %v957_v4 = vrot.slane %v5936_v1, 2  ;;  %v698_v5 = vrot.slane %v5933_v0, 1  ;;  %v699_v6 = vrot.slane %v5936_v1, 1  ;;  %v5554_v43 = vld [vmem:[%s5930_s17 + $0xc] sm:$0xff]   ;;  %v5556_v49 = vld [vmem:[%s5930_s17] sm:$0xff]  }
  0x1e   : > { %v5946_v7 = vld [vmem:[%s5930_s17 + $0x38] ss:$0 sps:$4 sm:$0x77]   ;;  %v701_v8 = vrot.slane %v5939_v2, 1  ;;  %v474_v9 = vshrl.u32 %v5933_v0, 16  ;;  %v476_v10 = vshll.u32 %v5933_v0, 16 }
  0x1f   : > { %v958_v11 = vsel %vm10326_vm0, %v956_v3, %v957_v4  ;;  %v700_v12 = vsel %vm10325_vm1, %v698_v5, %v699_v6  ;;  %v5954_v13 = vshll.u32 %v5936_v1, 16  ;;  %v959_v14 = vrot.slane %v5939_v2, 2  ;;  %v5555_v48 = vld [vmem:[%s5930_s17 + $0x14] ss:$0 sps:$4 sm:$0x77]   ;;  %s5831_s15 = smov 48  }
  0x20   : > { %1004 = vrot.lane.b32.xlu0 %v958_v11, %s5820_s18  ;;  %746 = vrot.lane.b32.xlu1 %v700_v12, %s5821_s19  ;;  %v702_v15 = vrot.slane %v5946_v7, 1  ;;  %v478_v16 = vrot.slane %v476_v10, 1  ;;  %v960_v17 = vrot.slane %v5946_v7, 2  ;;  %v486_v18 = vshrl.u32 %v5939_v2, 16  ;;  %s5832_s16 = smov 52   ;;  %s10498_s14 = smov 36  }
  0x21   : > { %v483_v19 = vrot.slane %v5954_v13, 1  ;;  %v488_v20 = vshll.u32 %v5939_v2, 16  ;;  %v493_v21 = vshll.u32 %v5946_v7, 16  ;;  %v791_v22 = vshrl.u32 %v5946_v7, 16 }
  0x22   : > { %v703_v23 = vsel %vm10325_vm1, %v701_v8, %v702_v15  ;;  %v479_v24 = vor.u32 %v478_v16, %v474_v9  ;;  %v961_v25 = vsel %vm10326_vm0, %v959_v14, %v960_v17  ;;  %v788_v26 = vrot.slane %v486_v18, 1  ;;  %v5557_v61 = vld [vmem:[%s5930_s17 + $0x8] ss:$0 sps:$4 sm:$0x77]  }
  0x23   : > { %v490_v27 = vrot.slane %v488_v20, 1  ;;  %v495_v28 = vrot.slane %v493_v21, 1  ;;  %v789_v29 = vrot.slane %v488_v20, 2  ;;  %v793_v30 = vrot.slane %v791_v22, 1 }
  0x24   : > { %748 = vrot.lane.b32.xlu1 %v703_v23, %s5821_s19  ;;  %v484_v31 = vsel %vm10327_vm2, %v479_v24, %v483_v19  ;;  %v794_v32 = vrot.slane %v493_v21, 2  ;;  %v779_v33 = vrot.slane %v474_v9, 1  ;;  %v780_v34 = vrot.slane %v476_v10, 2  ;;  %v5992_v5 = vld [vmem:[%s5930_s17 + $0x44] ss:$0 sps:$4 sm:$0x77]  }
  0x25   : > { %665 = vrot.lane.b32.xlu0 %v484_v31, %s5822_s20  ;;  %v491_v35 = vor.u32 %v490_v27, %v486_v18  ;;  %v790_v36 = vor.u32 %v789_v29, %v788_v26  ;;  %v782_v37 = vshrl.u32 %v5936_v1, 16  ;;  %v785_v38 = vrot.slane %v5954_v13, 2  ;;  %v5560_v26 = vld [vmem:[%s5930_s17 + $0x18] sm:$0xff]  }
  0x26   : > { %v795_v39 = vor.u32 %v794_v32, %v793_v30  ;;  %v781_v40 = vor.u32 %v780_v34, %v779_v33  ;;  %v1044_v41 = vrot.slane %v486_v18, 2  ;;  %v1045_v42 = vrot.slane %v488_v20, 3 }
  0x27   : > { %v496_v44 = vsel %vm10327_vm2, %v491_v35, %v495_v28  ;;  %v784_v45 = vrot.slane %v782_v37, 1  ;;  %v1047_v46 = vrot.slane %v791_v22, 2  ;;  %v1048_v47 = vrot.slane %v493_v21, 3  ;;  %v6020_v35 = vld [vmem:[%s5930_s17 + $0x48] sm:$0xff]  }
  0x28   : > { %1006 = vrot.lane.b32.xlu1 %v961_v25, %s5820_s18  ;;  %v5979_v50 = vsel %vm10323_vm3, %v790_v36, %v795_v39  ;;  %v1046_v51 = vor.u32 %v1045_v42, %v1044_v41  ;;  %v1037_v52 = vrot.slane %v474_v9, 2  ;;  %v1038_v53 = vrot.slane %v476_v10, 3  ;;  %v5998_v9 = vld [vmem:[%s5930_s17 + $0x3c] sm:$0xff]   ;;  %v6024_v39 = vld [vmem:[%s5930_s17 + $0x50] ss:$0 sps:$4 sm:$0x77]  }
  0x29   : > { %667 = vrot.lane.b32.xlu0 %v496_v44, %s5822_s20  ;;  %v786_v54 = vor.u32 %v785_v38, %v784_v45  ;;  %v1049_v55 = vor.u32 %v1048_v47, %v1047_v46  ;;  %v1040_v56 = vrot.slane %v782_v37, 2  ;;  %v1041_v57 = vrot.slane %v5954_v13, 3 }
  0x2a   : > { %v1039_v58 = vor.u32 %v1038_v53, %v1037_v52  ;;  %v1185_v59 = vrot.slane %v5939_v2, 3  ;;  %v1186_v60 = vrot.slane %v5946_v7, 3  ;;  %v1182_v4 = vrot.slane %v5933_v0, 3 }
  0x2b   : > { %v5987_v62 = vsel %vm10323_vm3, %v781_v40, %v786_v54  ;;  %v1050_v63 = vsel %vm1036_vm4, %v1046_v51, %v1049_v55  ;;  %v1042_v3 = vor.u32 %v1041_v57, %v1040_v56  ;;  %v1183_v2 = vrot.slane %v5936_v1, 3  ;;  %v5561_v1 = vld [vmem:[%s5930_s17 + $0x20] ss:$0 sps:$4 sm:$0x77]  }
  0x2c   : > { %925 = vrot.lane.b32.xlu1 %v5979_v50, %s5823_s21  ;;  %v1304_v6 = vshrl.u32 %v5554_v43, 16  ;;  %v1307_v7 = vshll.u32 %v5554_v43, 16  ;;  %v1312_v8 = vshrl.u32 %v5555_v48, 16  ;;  %v1187_v11 = vsel %vm10322_vm5, %v1185_v59, %v1186_v60 }
  0x2d   : > { %923 = vrot.lane.b32.xlu0 %v5987_v62, %s5823_s21  ;;  %v1043_v10 = vsel %vm1036_vm4, %v1039_v58, %v1042_v3  ;;  %v1315_v12 = vshll.u32 %v5555_v48, 16  ;;  %v1287_v13 = vshrl.u32 %v5556_v49, 16  ;;  %v1290_v17 = vshll.u32 %v5556_v49, 16 }
  0x2e   : > { %v1306_v14 = vrot.slane %v1304_v6, 1  ;;  %v1309_v15 = vrot.slane %v1307_v7, 2  ;;  %v1314_v16 = vrot.slane %v1312_v8, 1  ;;  %v1295_v20 = vshrl.u32 %v5557_v61, 16 }
  0x2f   : > { %v1317_v18 = vrot.slane %v1315_v12, 2  ;;  %v1289_v19 = vrot.slane %v1287_v13, 1  ;;  %v1298_v21 = vshll.u32 %v5557_v61, 16  ;;  %v1292_v23 = vrot.slane %v1290_v17, 2 }
  0x30   : > { %1151 = vrot.lane.b32.xlu1 %v1050_v63, %s5824_s22  ;;  %v1310_v22 = vor.u32 %v1309_v15, %v1306_v14  ;;  %v6007_v24 = vshrl.u32 %v5998_v9, 16  ;;  %v6010_v25 = vshll.u32 %v5998_v9, 16  ;;  %v1297_v28 = vrot.slane %v1295_v20, 1  ;;  %v5572_v20 = vld [vmem:[%s10310_s1] sm:$0xff]  }
  0x31   : > { %1149 = vrot.lane.b32.xlu0 %v1043_v10, %s5824_s22  ;;  %v1318_v27 = vor.u32 %v1317_v18, %v1314_v16  ;;  %v1300_v29 = vrot.slane %v1298_v21, 2  ;;  %v6015_v30 = vshll.u32 %v5992_v5, 16  ;;  %v1184_v31 = vsel %vm10322_vm5, %v1182_v4, %v1183_v2  ;;  %5444 = vmatprep.subr.bf16.mxu0 %v5572_v20 }
  0x32   : > { %v1293_v32 = vor.u32 %v1292_v23, %v1289_v19  ;;  %v502_v33 = vrot.slane %v6010_v25, 1  ;;  %v1321_v36 = vshrl.u32 %v5560_v26, 16  ;;  %v1324_v37 = vshll.u32 %v5560_v26, 16  ;;  %5445 = vmatpush3.bf16.msra.mxu0 %v5572_v20 }
  0x33   : > { %v1301_v34 = vor.u32 %v1300_v29, %v1297_v28  ;;  %v1329_v38 = vshrl.u32 %v5561_v1, 16  ;;  %v1319_v40 = vsel %vm10323_vm3, %v1310_v22, %v1318_v27  ;;  %v507_v42 = vrot.slane %v6015_v30, 1  ;;  %v5573_v27 = vld [vmem:[%s10310_s1 + $0x8] sm:$0xff]  }
  0x34   : > { %1232 = vrot.lane.b32.xlu1 %v1187_v11, %s5825_s23  ;;  %v503_v41 = vor.u32 %v502_v33, %v6007_v24  ;;  %v1332_v43 = vshll.u32 %v5561_v1, 16  ;;  %v1323_v45 = vrot.slane %v1321_v36, 1  ;;  %v1326_v46 = vrot.slane %v1324_v37, 2  ;;  %5446 = vmatprep.subr.bf16.mxu0 %v5573_v27 }
  0x35   : > { %1230 = vrot.lane.b32.xlu0 %v1184_v31, %s5825_s23  ;;  %v1302_v44 = vsel %vm10323_vm3, %v1293_v32, %v1301_v34  ;;  %v1331_v47 = vrot.slane %v1329_v38, 1  ;;  %v6032_v49 = vshll.u32 %v6020_v35, 16  ;;  %v6038_v54 = vshrl.u32 %v6020_v35, 16  ;;  %v6110_v38 = vld [vmem:[%s5930_s17 + $0x54] sm:$0xff]  }
  0x36   : > { %v1334_v48 = vrot.slane %v1332_v43, 2  ;;  %v508_v51 = vsel %vm10327_vm2, %v503_v41, %v507_v42  ;;  %v1327_v52 = vor.u32 %v1326_v46, %v1323_v45  ;;  %v6042_v56 = vshll.u32 %v6024_v39, 16  ;;  %5447 = vmatpush3.bf16.msra.mxu0 %v5573_v27 }
  0x37   : > { %v514_v55 = vrot.slane %v6032_v49, 1  ;;  %v704_v58 = vrot.slane %v5998_v9, 1  ;;  %v705_v59 = vrot.slane %v5992_v5, 1  ;;  %v800_v60 = vshrl.u32 %v5992_v5, 16 }
  0x38   : > { %1339 = vrot.lane.b32.xlu1 %v1319_v40, %s5826_s29  ;;  %v1335_v53 = vor.u32 %v1334_v48, %v1331_v47  ;;  %v519_v63 = vrot.slane %v6042_v56, 1  ;;  %v797_v3 = vrot.slane %v6007_v24, 1  ;;  %v798_v4 = vrot.slane %v6010_v25, 2 }
  0x39   : > { %1337 = vrot.lane.b32.xlu0 %v1302_v44, %s5826_s29  ;;  %v515_v61 = vor.u32 %v514_v55, %v6038_v54  ;;  %v803_v2 = vrot.slane %v6015_v30, 2  ;;  %v706_v6 = vsel %vm10325_vm1, %v704_v58, %v705_v59  ;;  %v802_v7 = vrot.slane %v800_v60, 1 }
  0x3a   : > { %v6047_v57 = vsel %vm10323_vm3, %v1327_v52, %v1335_v53  ;;  %v799_v10 = vor.u32 %v798_v4, %v797_v3  ;;  %v809_v12 = vshrl.u32 %v6024_v39, 16  ;;  %v707_v13 = vrot.slane %v6020_v35, 1 }
  0x3b   : > { %v520_v8 = vsel %vm10327_vm2, %v515_v61, %v519_v63  ;;  %v804_v11 = vor.u32 %v803_v2, %v802_v7  ;;  %v708_v14 = vrot.slane %v6024_v39, 1  ;;  %v806_v15 = vrot.slane %v6038_v54, 1  ;;  %v5577_v7 = vld [vmem:[%s10310_s1 + $0x18] ss:$0 sps:$4 sm:$0xff]  }
  0x3c   : > { %669 = vrot.lane.b32.xlu1 %v508_v51, %s5822_s20  ;;  %v807_v17 = vrot.slane %v6032_v49, 2  ;;  %v811_v1 = vrot.slane %v809_v12, 1  ;;  %v812_v18 = vrot.slane %v6042_v56, 2  ;;  %v962_v21 = vrot.slane %v5998_v9, 2 }
  0x3d   : > { %1369 = vrot.lane.b32.xlu0 %v1319_v40, %s10319_s8  ;;  %v6074_v16 = vsel %vm10323_vm3, %v799_v10, %v804_v11  ;;  %v709_v19 = vsel %vm10325_vm1, %v707_v13, %v708_v14  ;;  %v963_v22 = vrot.slane %v5992_v5, 2  ;;  %v1051_v28 = vrot.slane %v6007_v24, 2  ;;  %v5576_v24 = vld [vmem:[%s10310_s1 + $0x10] sm:$0xff]   ;;  %v6113_v40 = vld [vmem:[%s5930_s17 + $0x5c] ss:$0 sps:$4 sm:$0x77]  }
  0x3e   : > { %v808_v23 = vor.u32 %v807_v17, %v806_v15  ;;  %v813_v26 = vor.u32 %v812_v18, %v811_v1  ;;  %v1052_v31 = vrot.slane %v6010_v25, 3  ;;  %v1054_v32 = vrot.slane %v800_v60, 2  ;;  %5448 = vmatprep.subr.bf16.mxu0 %v5576_v24 }
  0x3f   : > { %v964_v29 = vsel %vm10326_vm0, %v962_v21, %v963_v22  ;;  %v1055_v33 = vrot.slane %v6015_v30, 3  ;;  %v965_v25 = vrot.slane %v6020_v35, 2  ;;  %v966_v30 = vrot.slane %v6024_v39, 2  ;;  %5449 = vmatpush3.bf16.msra.mxu0 %v5576_v24 }
  0x40   : > { %1401 = vrot.lane.b32.xlu1 %v6047_v57, %s10317_s9  ;;  %v6099_v34 = vsel %vm10323_vm3, %v808_v23, %v813_v26  ;;  %v1053_v36 = vor.u32 %v1052_v31, %v1051_v28  ;;  %v1058_v41 = vrot.slane %v6038_v54, 2  ;;  %v1059_v42 = vrot.slane %v6032_v49, 3  ;;  %5484 = vmatprep.subr.msk.bf16.mxu0 %vm2133_vm6, %v5577_v7 }
  0x41   : > { %1371 = vrot.lane.b32.xlu0 %v6047_v57, %s10319_s8  ;;  %s5830_s8 = smov 44   ;;  %v1056_v37 = vor.u32 %v1055_v33, %v1054_v32  ;;  %v967_v44 = vsel %vm10326_vm0, %v965_v25, %v966_v30  ;;  %v1061_v45 = vrot.slane %v809_v12, 2  ;;  %v1062_v46 = vrot.slane %v6042_v56, 3  ;;  %v6170_v12 = vld [vmem:[%s5930_s17 + $0x68] ss:$0 sps:$4 sm:$0x77]  }
  0x42   : > { %v6125_v47 = vshrl.u32 %v6110_v38, 16  ;;  %v6128_v48 = vshll.u32 %v6110_v38, 16  ;;  %v6131_v51 = vshll.u32 %v6113_v40, 16  ;;  %v818_v49 = vshrl.u32 %v6113_v40, 16 }
  0x43   : > { %v1057_v43 = vsel %vm1036_vm4, %v1053_v36, %v1056_v37  ;;  %v1188_v52 = vrot.slane %v5998_v9, 3  ;;  %v1189_v53 = vrot.slane %v5992_v5, 3  ;;  %v1060_v54 = vor.u32 %v1059_v42, %v1058_v41 }
  0x44   : > { %750 = vrot.lane.b32.xlu1 %v706_v6, %s5821_s19  ;;  %v1063_v55 = vor.u32 %v1062_v46, %v1061_v45  ;;  %v815_v56 = vrot.slane %v6125_v47, 1  ;;  %v816_v58 = vrot.slane %v6128_v48, 2  ;;  %v820_v59 = vrot.slane %v818_v49, 1 }
  0x45   : > { %671 = vrot.lane.b32.xlu0 %v520_v8, %s5822_s20  ;;  %v821_v60 = vrot.slane %v6131_v51, 2  ;;  %v1190_v5 = vsel %vm10322_vm5, %v1188_v52, %v1189_v53  ;;  %v1191_v9 = vrot.slane %v6020_v35, 3  ;;  %v1192_v61 = vrot.slane %v6024_v39, 3  ;;  %v6162_v39 = vld [vmem:[%s5930_s17 + $0x60] sm:$0xff]  }
  0x46   : > { %v1064_v63 = vsel %vm1036_vm4, %v1060_v54, %v1063_v55  ;;  %v817_v3 = vor.u32 %v816_v58, %v815_v56  ;;  %v526_v6 = vrot.slane %v6128_v48, 1  ;;  %v531_v10 = vrot.slane %v6131_v51, 1  ;;  %v6240_v53 = vld [vmem:[%s5930_s17 + $0x74] ss:$0 sps:$4 sm:$0x77]  }
  0x47   : > { %v822_v4 = vor.u32 %v821_v60, %v820_v59  ;;  %v1193_v2 = vsel %vm10322_vm5, %v1191_v9, %v1192_v61  ;;  %v2135_v11 = vsel %vm2133_vm6, %v5577_v7, 0  ;;  %v6173_v13 = vshll.u32 %v6162_v39, 16 }
  0x48   : > { %1433 = vrot.lane.b32.xlu1 %v5987_v62, %s5829_s13  ;;  %v527_v8 = vor.u32 %v526_v6, %v6125_v47  ;;  %5451 = vmatpush3.bf16.msra.mxu0 %v2135_v11  ;;  %v6181_v15 = vshrl.u32 %v6162_v39, 16  ;;  %v6185_v1 = vshll.u32 %v6170_v12, 16  ;;  %v710_v18 = vrot.slane %v6110_v38, 1 }
  0x49   : > { %1403 = vrot.lane.b32.xlu0 %v5987_v62, %s10317_s9  ;;  %v6159_v35 = vsel %vm10323_vm3, %v817_v3, %v822_v4  ;;  %v538_v17 = vrot.slane %v6173_v13, 1  ;;  %s10497_s9 = smov 32   ;;  %v713_v23 = vrot.slane %v6162_v39, 1  ;;  %v714_v26 = vrot.slane %v6170_v12, 1 }
  0x4a   : > { %v532_v14 = vsel %vm10327_vm2, %v527_v8, %v531_v10  ;;  %v543_v20 = vrot.slane %v6185_v1, 1  ;;  %v824_v27 = vrot.slane %v6181_v15, 1  ;;  %v825_v28 = vrot.slane %v6173_v13, 2 }
  0x4b   : > { %v830_v31 = vrot.slane %v6185_v1, 2  ;;  %v715_v32 = vsel %vm10325_vm1, %v713_v23, %v714_v26  ;;  %v968_v33 = vrot.slane %v6110_v38, 2  ;;  %v969_v24 = vrot.slane %v6113_v40, 2  ;;  %v6308_v26 = vld [vmem:[%s5930_s17 + $0x80] ss:$0 sps:$4 sm:$0x77]  }
  0x4c   : > { %927 = vrot.lane.b32.xlu1 %v6074_v16, %s5823_s21  ;;  %v826_v36 = vor.u32 %v825_v28, %v824_v27  ;;  %v1065_v25 = vrot.slane %v6125_v47, 2  ;;  %v1066_v41 = vrot.slane %v6128_v48, 3  ;;  %v1068_v42 = vrot.slane %v818_v49, 2  ;;  %v6237_v48 = vld [vmem:[%s5930_s17 + $0x6c] sm:$0xff]  }
  0x4d   : > { %752 = vrot.lane.b32.xlu0 %v709_v19, %s5821_s19  ;;  %v711_v19 = vrot.slane %v6113_v40, 1  ;;  %v970_v30 = vsel %vm10326_vm0, %v968_v33, %v969_v24  ;;  %v971_v45 = vrot.slane %v6162_v39, 2  ;;  %v972_v46 = vrot.slane %v6170_v12, 2 }
  0x4e   : > { %v1067_v47 = vor.u32 %v1066_v41, %v1065_v25  ;;  %v1072_v49 = vrot.slane %v6181_v15, 2  ;;  %v1073_v55 = vrot.slane %v6173_v13, 3  ;;  %v1076_v58 = vrot.slane %v6185_v1, 3 }
  0x4f   : > { %v712_v21 = vsel %vm10325_vm1, %v710_v18, %v711_v19  ;;  %v6252_v59 = vshrl.u32 %v6237_v48, 16  ;;  %v6255_v60 = vshll.u32 %v6237_v48, 16  ;;  %v836_v9 = vshrl.u32 %v6240_v53, 16 }
  0x50   : > { %1490 = vrot.lane.b32.xlu1 %v5979_v50, %s5830_s8  ;;  %v1194_v61 = vrot.slane %v6110_v38, 3  ;;  %v1074_v3 = vor.u32 %v1073_v55, %v1072_v49  ;;  %v1198_v13 = vrot.slane %v6170_v12, 3  ;;  %v6327_v24 = vshll.u32 %v6308_v26, 16 }
  0x51   : > { %1435 = vrot.lane.b32.xlu0 %v5979_v50, %s5829_s13  ;;  %v833_v7 = vrot.slane %v6252_v59, 1  ;;  %v834_v8 = vrot.slane %v6255_v60, 2  ;;  %v838_v10 = vrot.slane %v836_v9, 1  ;;  %v720_v49 = vrot.slane %v6308_v26, 1 }
  0x52   : > { %v567_v41 = vrot.slane %v6327_v24, 1  ;;  %vm1933_vm6 = vcmask 326656  }
  0x54   : > { %1008 = vrot.lane.b32.xlu1 %v964_v29, %s5820_s18 }
  0x55   : > { %929 = vrot.lane.b32.xlu0 %v6099_v34, %s5823_s21 }
  0x58   : > { %1547 = vrot.lane.b32.xlu1 %v6074_v16, %s5831_s15 }
  0x59   : > { %1492 = vrot.lane.b32.xlu0 %v6074_v16, %s5830_s8 }
  0x5c   : > { %1153 = vrot.lane.b32.xlu1 %v1057_v43, %s5824_s22  ;;  %v1069_v43 = vrot.slane %v6131_v51, 3  ;;  %v973_v51 = vsel %vm10326_vm0, %v971_v45, %v972_v46 }
  0x5d   : > { %1010 = vrot.lane.b32.xlu0 %v967_v44, %s5820_s18 }
  0x5e   : > { %v1070_v52 = vor.u32 %v1069_v43, %v1068_v42 }
  0x60   : > { %1604 = vrot.lane.b32.xlu1 %v6099_v34, %s5832_s16  ;;  %v1071_v54 = vsel %vm1036_vm4, %v1067_v47, %v1070_v52  ;;  %v845_v47 = vshrl.u32 %v6308_v26, 16 }
  0x61   : > { %1549 = vrot.lane.b32.xlu0 %v6099_v34, %s5831_s15 }
  0x64   : > { %1234 = vrot.lane.b32.xlu1 %v1190_v5, %s5825_s23  ;;  %v6258_v5 = vshll.u32 %v6240_v53, 16 }
  0x65   : > { %1155 = vrot.lane.b32.xlu0 %v1064_v63, %s5824_s22  ;;  %v1195_v63 = vrot.slane %v6113_v40, 3  ;;  %v1197_v40 = vrot.slane %v6162_v39, 3 }
  0x66   : > { %v839_v11 = vrot.slane %v6258_v5, 2 }
  0x67   : > { %v1196_v38 = vsel %vm10322_vm5, %v1194_v61, %v1195_v63  ;;  %v1199_v19 = vsel %vm10322_vm5, %v1197_v40, %v1198_v13  ;;  %v848_v61 = vrot.slane %v6327_v24, 2  ;;  %v1079_v13 = vrot.slane %v6252_v59, 2 }
  0x68   : > { %1236 = vrot.lane.b32.xlu1 %v1193_v2, %s5825_s23  ;;  %v840_v1 = vor.u32 %v839_v11, %v838_v10 }
  0x69   : > { %1606 = vrot.lane.b32.xlu0 %v6159_v35, %s5832_s16 }
  0x6c   : > { %1343 = vrot.lane.b32.xlu1 %v5987_v62, %s5826_s29 }
  0x6d   : > { %1341 = vrot.lane.b32.xlu0 %v6047_v57, %s5826_s29  ;;  %v539_v57 = vor.u32 %v538_v17, %v6181_v15  ;;  %v835_v17 = vor.u32 %v834_v8, %v833_v7  ;;  %v974_v7 = vrot.slane %v6237_v48, 2  ;;  %v975_v8 = vrot.slane %v6240_v53, 2 }
  0x6f   : > { %v544_v22 = vsel %vm10327_vm2, %v539_v57, %v543_v20  ;;  %v550_v57 = vrot.slane %v6255_v60, 1  ;;  %v6296_v20 = vld [vmem:[%s5930_s17 + $0x78] sm:$0xff]  }
  0x70   : > { %673 = vrot.lane.b32.xlu1 %v532_v14, %s5822_s20  ;;  %v6311_v27 = vshll.u32 %v6296_v20, 16 }
  0x71   : > { %1373 = vrot.lane.b32.xlu0 %v5987_v62, %s10497_s9  ;;  %v827_v62 = vshrl.u32 %v6170_v12, 16  ;;  %v6293_v12 = vsel %vm10323_vm3, %v835_v17, %v840_v1  ;;  %v1080_v17 = vrot.slane %v6255_v60, 3  ;;  %v1082_v1 = vrot.slane %v836_v9, 2  ;;  %v6403_v60 = vld [vmem:[%s5930_s17 + $0x84] sm:$0xff]  }
  0x72   : > { %v562_v33 = vrot.slane %v6311_v27, 1  ;;  %v978_v9 = vrot.slane %v6308_v26, 2 }
  0x73   : > { %v829_v29 = vrot.slane %v827_v62, 1  ;;  %v1075_v56 = vrot.slane %v827_v62, 2  ;;  %v555_v62 = vrot.slane %v6258_v5, 1 }
  0x74   : > { %1405 = vrot.lane.b32.xlu1 %v5979_v50, %s10498_s14 }
  0x75   : > { %1375 = vrot.lane.b32.xlu0 %v5979_v50, %s10497_s9  ;;  %v831_v37 = vor.u32 %v830_v31, %v829_v29  ;;  %v1077_v4 = vor.u32 %v1076_v58, %v1075_v56  ;;  %v843_v56 = vrot.slane %v6311_v27, 2  ;;  %v847_v58 = vrot.slane %v845_v47, 1 }
  0x77   : > { %v6229_v44 = vsel %vm10323_vm3, %v826_v36, %v831_v37  ;;  %v1078_v15 = vsel %vm1036_vm4, %v1074_v3, %v1077_v4  ;;  %v717_v37 = vrot.slane %v6240_v53, 1  ;;  %v849_v11 = vor.u32 %v848_v61, %v847_v58 }
  0x78   : > { %754 = vrot.lane.b32.xlu1 %v712_v21, %s5821_s19  ;;  %v6429_v58 = vshll.u32 %v6403_v60, 16  ;;  %v1200_v61 = vrot.slane %v6237_v48, 3 }
  0x79   : > { %675 = vrot.lane.b32.xlu0 %v544_v22, %s5822_s20  ;;  %v551_v22 = vor.u32 %v550_v57, %v6252_v59  ;;  %v1081_v59 = vor.u32 %v1080_v17, %v1079_v13  ;;  %v1203_v17 = vrot.slane %v6296_v20, 3 }
  0x7b   : > { %v556_v29 = vsel %vm10327_vm2, %v551_v22, %v555_v62 }
  0x7c   : > { %1437 = vrot.lane.b32.xlu1 %v6074_v16, %s5829_s13 }
  0x7d   : > { %1407 = vrot.lane.b32.xlu0 %v6074_v16, %s10498_s14 }
  0x80   : > { %931 = vrot.lane.b32.xlu1 %v6159_v35, %s5823_s21 }
  0x81   : > { %756 = vrot.lane.b32.xlu0 %v715_v32, %s5821_s19  ;;  %v6323_v32 = vshrl.u32 %v6296_v20, 16 }
  0x83   : > { %v842_v55 = vrot.slane %v6323_v32, 1 }
  0x84   : > { %1494 = vrot.lane.b32.xlu1 %v6099_v34, %s5830_s8 }
  0x85   : > { %1439 = vrot.lane.b32.xlu0 %v6099_v34, %s5829_s13  ;;  %v844_v10 = vor.u32 %v843_v56, %v842_v55 }
  0x87   : > { %v6395_v22 = vsel %vm10323_vm3, %v844_v10, %v849_v11 }
  0x88   : > { %1012 = vrot.lane.b32.xlu1 %v970_v30, %s5820_s18  ;;  %v563_v30 = vor.u32 %v562_v33, %v6323_v32 }
  0x89   : > { %933 = vrot.lane.b32.xlu0 %v6229_v44, %s5823_s21 }
  0x8a   : > { %v568_v45 = vsel %vm10327_vm2, %v563_v30, %v567_v41  ;;  %v1086_v30 = vrot.slane %v6323_v32, 2  ;;  %v1087_v41 = vrot.slane %v6311_v27, 3 }
  0x8c   : > { %1551 = vrot.lane.b32.xlu1 %v6159_v35, %s5831_s15 }
  0x8d   : > { %1496 = vrot.lane.b32.xlu0 %v6159_v35, %s5830_s8 }
  0x90   : > { %1157 = vrot.lane.b32.xlu1 %v1071_v54, %s5824_s22 }
  0x91   : > { %1014 = vrot.lane.b32.xlu0 %v973_v51, %s5820_s18  ;;  %v719_v51 = vrot.slane %v6296_v20, 1 }
  0x92   : > { %v6265_v2 = vpop.permute.xlu0 %1004  ;;  %v6267_v6 = vpop.permute.xlu1 %746 }
  0x93   : > { %v721_v3 = vsel %vm10325_vm1, %v719_v51, %v720_v49  ;;  %v1090_v51 = vrot.slane %v6327_v24, 3  ;;  %v6423_v49 = vshrl.u32 %v6403_v60, 16 }
  0x94   : > { %1608 = vrot.lane.b32.xlu1 %v6229_v44, %s5832_s16 }
  0x95   : > { %1553 = vrot.lane.b32.xlu0 %v6229_v44, %s5831_s15  ;;  %v851_v10 = vrot.slane %v6423_v49, 1 }
  0x96   : > { %v6281_v14 = vpop.permute.xlu1 %748 }
  0x97   : > { %v6284_v18 = vpop.permute.xlu0 %665 }
  0x98   : > { %1238 = vrot.lane.b32.xlu1 %v1196_v38, %s5825_s23 }
  0x99   : > { %1159 = vrot.lane.b32.xlu0 %v1078_v15, %s5824_s22  ;;  %v976_v15 = vsel %vm10326_vm0, %v974_v7, %v975_v8  ;;  %v1088_v7 = vor.u32 %v1087_v41, %v1086_v30  ;;  %v5734_v41 = vld [vmem:[%s5930_s17 + $0x30] sm:$0xff]  }
  0x9a   : > { %v6290_v39 = vpop.permute.xlu1 %1006 }
  0x9b   : > { %v6298_v21 = vpop.permute.xlu0 %667 }
  0x9c   : > { %1240 = vrot.lane.b32.xlu1 %v1199_v19, %s5825_s23  ;;  %v1083_v19 = vrot.slane %v6258_v5, 3  ;;  %v977_v5 = vrot.slane %v6296_v20, 2  ;;  %v1640_v20 = vsel %vm10321_vm7, %v5734_v41, %v6298_v21 }
  0x9d   : > { %1610 = vrot.lane.b32.xlu0 %v6293_v12, %s5832_s16 }
  0x9e   : > { %v6305_v23 = vpop.permute.xlu1 %925  ;;  %v979_v56 = vsel %vm10326_vm0, %v977_v5, %v978_v9 }
  0x9f   : > { %v6313_v28 = vpop.permute.xlu0 %923 }
  0xa0   : > { %1347 = vrot.lane.b32.xlu1 %v6074_v16, %s5826_s29 }
  0xa1   : > { %1345 = vrot.lane.b32.xlu0 %v5979_v50, %s5826_s29  ;;  %v716_v50 = vrot.slane %v6237_v48, 1 }
  0xa2   : > { %v6320_v31 = vpop.permute.xlu1 %1151 }
  0xa3   : > { %v6329_v36 = vpop.permute.xlu0 %1149 }
  0xa4   : > { %677 = vrot.lane.b32.xlu1 %v556_v29, %s5822_s20  ;;  %v1084_v29 = vor.u32 %v1083_v19, %v1082_v1  ;;  %v1204_v1 = vrot.slane %v6308_v26, 3 }
  0xa5   : > { %1377 = vrot.lane.b32.xlu0 %v6074_v16, %s10497_s9  ;;  %v718_v16 = vsel %vm10325_vm1, %v716_v50, %v717_v37  ;;  %v6410_v50 = vld [vmem:[%s5930_s17 + $0x8c] ss:$0 sps:$4 sm:$0x77]  }
  0xa6   : > { %v6336_v25 = vpop.permute.xlu1 %1232  ;;  %v6432_v27 = vshll.u32 %v6410_v50, 16  ;;  %v854_v32 = vshrl.u32 %v6410_v50, 16 }
  0xa7   : > { %v6340_v42 = vpop.permute.xlu0 %1230 }
  0xa8   : > { %1409 = vrot.lane.b32.xlu1 %v6099_v34, %s10498_s14  ;;  %v856_v13 = vrot.slane %v854_v32, 1  ;;  %v857_v48 = vrot.slane %v6432_v27, 2 }
  0xa9   : > { %1379 = vrot.lane.b32.xlu0 %v6099_v34, %s10497_s9 }
  0xaa   : > { %v6347_v43 = vpop.permute.xlu1 %1339  ;;  %v858_v5 = vor.u32 %v857_v48, %v856_v13 }
  0xab   : > { %v6350_v46 = vpop.permute.xlu0 %1337 }
  0xac   : > { %758 = vrot.lane.b32.xlu1 %v718_v16, %s5821_s19  ;;  %v1085_v16 = vsel %vm1036_vm4, %v1081_v59, %v1084_v29 }
  0xad   : > { %679 = vrot.lane.b32.xlu0 %v568_v45, %s5822_s20  ;;  %v1089_v45 = vrot.slane %v845_v47, 2  ;;  %v1638_v47 = vsel %vm10321_vm7, %v5933_v0, %v6284_v18  ;;  %v852_v18 = vrot.slane %v6429_v58, 2  ;;  %vm1966_vm7 = vcmask 359424  }
  0xae   : > { %v6355_v52 = vpop.permute.xlu1 %669  ;;  %v1671_v11 = vsel %vm10324_vm8, %v1638_v47, %v6267_v6 }
  0xaf   : > { %v6359_v54 = vpop.permute.xlu0 %1369  ;;  %v1091_v8 = vor.u32 %v1090_v51, %v1089_v45  ;;  %v853_v29 = vor.u32 %v852_v18, %v851_v10  ;;  %v6488_v51 = vld [vmem:[%s5930_s17 + $0x90] sm:$0xff]  }
  0xb0   : > { %1441 = vrot.lane.b32.xlu1 %v6159_v35, %s5829_s13 }
  0xb1   : > { %1411 = vrot.lane.b32.xlu0 %v6159_v35, %s10498_s14  ;;  %v1092_v59 = vsel %vm1036_vm4, %v1088_v7, %v1091_v8  ;;  %v6509_v8 = vld [vmem:[%s5930_s17 + $0x98] ss:$0 sps:$4 sm:$0x77]  }
  0xb2   : > { %v6368_v63 = vpop.permute.xlu1 %1401 }
  0xb3   : > { %v6371_v4 = vpop.permute.xlu0 %1371 }
  0xb4   : > { %935 = vrot.lane.b32.xlu1 %v6293_v12, %s5823_s21 }
  0xb5   : > { %760 = vrot.lane.b32.xlu0 %v721_v3, %s5821_s19  ;;  %v1201_v3 = vrot.slane %v6240_v53, 3 }
  0xb6   : > { %v6378_v38 = vpop.permute.xlu1 %750 }
  0xb7   : > { %v6380_v40 = vpop.permute.xlu0 %671  ;;  %v1202_v6 = vsel %vm10322_vm5, %v1200_v61, %v1201_v3 }
  0xb8   : > { %1498 = vrot.lane.b32.xlu1 %v6229_v44, %s5830_s8 }
  0xb9   : > { %1443 = vrot.lane.b32.xlu0 %v6229_v44, %s5829_s13 }
  0xba   : > { %v6392_v57 = vpop.permute.xlu1 %1433 }
  0xbb   : > { %v6397_v62 = vpop.permute.xlu0 %1403 }
  0xbc   : > { %1016 = vrot.lane.b32.xlu1 %v976_v15, %s5820_s18  ;;  %v1704_v15 = vsel %vm1702_vm9, %v1671_v11, %v6313_v28 }
  0xbd   : > { %937 = vrot.lane.b32.xlu0 %v6395_v22, %s5823_s21  ;;  %v1737_v28 = vsel %vm1735_vm10, %v1704_v15, %v6265_v2 }
  0xbe   : > { %v6405_v33 = vpop.permute.xlu1 %927  ;;  %v1770_v9 = vsel %vm1768_vm11, %v1737_v28, %v6329_v36  ;;  %v1205_v36 = vsel %vm10322_vm5, %v1203_v17, %v1204_v1  ;;  %vm1999_vm5 = vcmask 392192   ;;  %v6536_v17 = vshll.u32 %v6509_v8, 16 }
  0xbf   : > { %v6412_v37 = vpop.permute.xlu0 %752  ;;  %v1803_v26 = vsel %vm1801_vm12, %v1770_v9, %v6340_v42  ;;  %v6485_v42 = vsel %vm10323_vm3, %v853_v29, %v858_v5  ;;  %vm10331_vm3 = vcmask 424960   ;;  %v722_v28 = vrot.slane %v6403_v60, 1 }
  0xc0   : > { %1555 = vrot.lane.b32.xlu1 %v6293_v12, %s5831_s15  ;;  %v1836_v2 = vsel %vm1834_vm13, %v1803_v26, %v6350_v46  ;;  %v1673_v46 = vsel %vm10324_vm8, %v1640_v20, %v6281_v14  ;;  %vm10328_vm8 = vcmask 457728   ;;  %v591_v29 = vrot.slane %v6536_v17, 1  ;;  %v6570_v26 = vld [vmem:[%s5930_s17 + $0xb4] sm:$0xff]  }
  0xc1   : > { %1500 = vrot.lane.b32.xlu0 %v6293_v12, %s5830_s8  ;;  %v1869_v45 = vsel %vm1867_vm14, %v1836_v2, %v6359_v54  ;;  %v1706_v54 = vsel %vm1702_vm9, %v1673_v46, %v6305_v23  ;;  %v6574_v2 = vld [vmem:[%s5930_s17 + $0xbc] ss:$0 sps:$4 sm:$0x77]   ;;  %v726_v46 = vrot.slane %v6509_v8, 1 }
  0xc2   : > { %v6425_v55 = vpop.permute.xlu1 %1490  ;;  %v1739_v10 = vsel %vm1735_vm10, %v1706_v54, %v6290_v39  ;;  %v6585_v54 = vshrl.u32 %v6570_v26, 16 }
  0xc3   : > { %v6438_v24 = vpop.permute.xlu0 %1435  ;;  %v1772_v18 = vsel %vm1768_vm11, %v1739_v10, %v6320_v31  ;;  %v6532_v31 = vshrl.u32 %v6488_v51, 16  ;;  %v866_v10 = vrot.slane %v6536_v17, 2 }
  0xc4   : > { %1161 = vrot.lane.b32.xlu1 %v1085_v16, %s5824_s22  ;;  %v574_v16 = vrot.slane %v6429_v58, 1  ;;  %v1805_v13 = vsel %vm1801_vm12, %v1772_v18, %v6336_v25 }
  0xc5   : > { %1018 = vrot.lane.b32.xlu0 %v979_v56, %s5820_s18  ;;  %v1902_v56 = vsel %vm1900_vm15, %v1869_v45, %v6368_v63  ;;  %v579_v63 = vrot.slane %v6432_v27, 1  ;;  %v1838_v39 = vsel %vm1834_vm13, %v1805_v13, %v6347_v43  ;;  %v725_v45 = vrot.slane %v6488_v51, 1 }
  0xc6   : > { %v6447_v0 = vpop.permute.xlu1 %1008  ;;  %v1935_v61 = vsel %vm1933_vm6, %v1902_v56, %v6392_v57  ;;  %v575_v14 = vor.u32 %v574_v16, %v6423_v49  ;;  %v6512_v57 = vshll.u32 %v6488_v51, 16  ;;  %v1871_v25 = vsel %vm1867_vm14, %v1838_v39, %v6371_v4 }
  0xc7   : > { %v6455_v53 = vpop.permute.xlu0 %929  ;;  %v1968_v3 = vsel %vm1966_vm7, %v1935_v61, %v6425_v55  ;;  %v860_v61 = vrot.slane %v6532_v31, 1  ;;  %v727_v18 = vsel %vm10325_vm1, %v725_v45, %v726_v46 }
  0xc8   : > { %1612 = vrot.lane.b32.xlu1 %v6395_v22, %s5832_s16  ;;  %v580_v48 = vsel %vm10327_vm2, %v575_v14, %v579_v63  ;;  %v6594_v14 = vshll.u32 %v6574_v2, 16  ;;  %v890_v63 = vshrl.u32 %v6574_v2, 16 }
  0xc9   : > { %1557 = vrot.lane.b32.xlu0 %v6395_v22, %s5831_s15 }
  0xca   : > { %v1548_v19 = vpop.permute.xlu1 %1547  ;;  %v1125_v39 = vrot.slane %v6594_v14, 3 }
  0xcb   : > { %v1493_v30 = vpop.permute.xlu0 %1492  ;;  %v2001_v7 = vsel %vm1999_vm5, %v1968_v3, %v1548_v19  ;;  %v723_v19 = vrot.slane %v6410_v50, 1  ;;  %v6591_v3 = vshll.u32 %v6570_v26, 16 }
  0xcc   : > { %1242 = vrot.lane.b32.xlu1 %v1202_v6, %s5825_s23  ;;  %v586_v6 = vrot.slane %v6512_v57, 1 }
  0xcd   : > { %1163 = vrot.lane.b32.xlu0 %v1092_v59, %s5824_s22  ;;  %v1122_v13 = vrot.slane %v6591_v3, 3 }
  0xce   : > { %v6482_v21 = vpop.permute.xlu1 %1153 }
  0xcf   : > { %v6494_v47 = vpop.permute.xlu0 %1010 }
  0xd0   : > { %1244 = vrot.lane.b32.xlu1 %v1205_v36, %s5825_s23  ;;  %v863_v36 = vshrl.u32 %v6509_v8, 16 }
  0xd1   : > { %1614 = vrot.lane.b32.xlu0 %v6485_v42, %s5832_s16 }
  0xd2   : > { %v1605_v23 = vpop.permute.xlu1 %1604 }
  0xd3   : > { %v1550_v55 = vpop.permute.xlu0 %1549  ;;  %v2034_v11 = vsel %vm10331_vm3, %v2001_v7, %v1605_v23  ;;  %v861_v7 = vrot.slane %v6512_v57, 2  ;;  %v865_v23 = vrot.slane %v863_v36, 1 }
  0xd4   : > { %1351 = vrot.lane.b32.xlu1 %v6159_v35, %s5826_s29  ;;  %5452 = vmatprep.mubr.msk.bf16.mxu0 %vm10328_vm8, %v2034_v11 }
  0xd5   : > { %1349 = vrot.lane.b32.xlu0 %v6099_v34, %s5826_s29  ;;  %v1904_v34 = vsel %vm1900_vm15, %v1871_v25, %v6397_v62  ;;  %v587_v62 = vor.u32 %v586_v6, %v6532_v31 }
  0xd6   : > { %v6529_v15 = vpop.permute.xlu1 %1234  ;;  %v1937_v43 = vsel %vm1933_vm6, %v1904_v34, %v6438_v24 }
  0xd7   : > { %v6540_v1 = vpop.permute.xlu0 %1155  ;;  %v1970_v4 = vsel %vm1966_vm7, %v1937_v43, %v1493_v30  ;;  %v592_v41 = vsel %vm10327_vm2, %v587_v62, %v591_v29  ;;  %v980_v43 = vrot.slane %v6403_v60, 2  ;;  %vm10502_vm2 = vcmask 1044480  }
  0xd8   : > { %681 = vrot.lane.b32.xlu1 %v580_v48, %s5822_s20  ;;  %v2003_v5 = vsel %vm1999_vm5, %v1970_v4, %v1550_v55  ;;  %v1121_v55 = vrot.slane %v6585_v54, 2  ;;  %v1124_v48 = vrot.slane %v890_v63, 2  ;;  %v867_v4 = vor.u32 %v866_v10, %v865_v23  ;;  %v6648_v10 = vld [vmem:[%s5930_s17 + $0x9c] sm:$0xff]  }
  0xd9   : > { %1381 = vrot.lane.b32.xlu0 %v6159_v35, %s10497_s9  ;;  %v724_v35 = vsel %vm10325_vm1, %v722_v28, %v723_v19  ;;  %v981_v28 = vrot.slane %v6410_v50, 2  ;;  %v862_v19 = vor.u32 %v861_v7, %v860_v61  ;;  %vm10499_vm1 = vsmask.f32 6400 }
  0xda   : > { %v6552_v59 = vpop.permute.xlu1 %1236  ;;  %v1123_v25 = vor.u32 %v1122_v13, %v1121_v55  ;;  %v1126_v34 = vor.u32 %v1125_v39, %v1124_v48  ;;  %v6651_v55 = vld [vmem:[%s5930_s17 + $0xa4] ss:$0 sps:$4 sm:$0x77]   ;;  %v1100_v39 = vrot.slane %v6532_v31, 2  ;;  %v1207_v31 = vrot.slane %v6410_v50, 3 }
  0xdb   : > { %v1607_v24 = vpop.permute.xlu0 %1606  ;;  %v982_v45 = vsel %vm10326_vm0, %v980_v43, %v981_v28  ;;  %v6636_v61 = vsel %vm10499_vm1, %v862_v19, %v867_v4  ;;  %v1104_v43 = vrot.slane %v6536_v17, 3  ;;  %v6665_v19 = vshrl.u32 %v6648_v10, 16 }
  0xdc   : > { %v2036_v9 = vsel %vm10331_vm3, %v2003_v5, %v1607_v24  ;;  %1413 = vrot.lane.b32.xlu1 %v6229_v44, %s10498_s14  ;;  %v6619_v29 = vsel %vm1036_vm4, %v1123_v25, %v1126_v34  ;;  %v1093_v24 = vrot.slane %v6423_v49, 2  ;;  %v1101_v25 = vrot.slane %v6512_v57, 3 }
  0xdd   : > { %1383 = vrot.lane.b32.xlu0 %v6229_v44, %s10497_s9  ;;  %5453 = vmatmul.mubr.msk.bf16.vlgmr.msra.gmra.mrb[0].mxu0 %vm10328_vm8, %v2036_v9  ;;  %v1094_v9 = vrot.slane %v6429_v58, 3  ;;  %v1103_v34 = vrot.slane %v863_v36, 2  ;;  %v6668_v4 = vshll.u32 %v6648_v10, 16  ;;  %v1206_v57 = vrot.slane %v6403_v60, 3 }
  0xde   : > { %v6564_v30 = vpop.permute.xlu1 %1343  ;;  %v1102_v17 = vor.u32 %v1101_v25, %v1100_v39  ;;  %vm10500_vm1 = vcmask 31744   ;;  %v1209_v25 = vrot.slane %v6488_v51, 3 }
  0xdf   : > { %v6567_v20 = vpop.permute.xlu0 %1341  ;;  %v1095_v58 = vor.u32 %v1094_v9, %v1093_v24  ;;  %v6671_v24 = vshll.u32 %v6651_v55, 16  ;;  %v872_v9 = vshrl.u32 %v6651_v55, 16  ;;  %v1105_v36 = vor.u32 %v1104_v43, %v1103_v34 }
  0xe0   : > { %762 = vrot.lane.b32.xlu1 %v724_v35, %s5821_s19  ;;  %v1096_v35 = vrot.slane %v854_v32, 2  ;;  %v983_v32 = vrot.slane %v6488_v51, 2  ;;  %v1208_v39 = vsel %vm10502_vm2, %v1206_v57, %v1207_v31 }
  0xe1   : > { %683 = vrot.lane.b32.xlu0 %v592_v41, %s5822_s20  ;;  %v1097_v41 = vrot.slane %v6432_v27, 3  ;;  %v984_v27 = vrot.slane %v6509_v8, 2 }
  0xe2   : > { %v6578_v16 = vpop.permute.xlu1 %673 }
  0xe3   : > { %v6582_v56 = vpop.permute.xlu0 %1373  ;;  %v1098_v7 = vor.u32 %v1097_v41, %v1096_v35  ;;  %v985_v48 = vsel %vm10326_vm0, %v983_v32, %v984_v27  ;;  %v875_v32 = vrot.slane %v6671_v24, 2  ;;  %v5735_v27 = vld [vmem:[%s5930_s17 + $0x3c] sm:$0xff]   ;;  %vm10501_vm0 = vcmask 64512  }
  0xe4   : > { %1445 = vrot.lane.b32.xlu1 %v6293_v12, %s5829_s13 }
  0xe5   : > { %1415 = vrot.lane.b32.xlu0 %v6293_v12, %s10498_s14  ;;  %v1099_v13 = vsel %vm1036_vm4, %v1095_v58, %v1098_v7  ;;  %v870_v58 = vrot.slane %v6668_v4, 2  ;;  %v874_v7 = vrot.slane %v872_v9, 1 }
  0xe6   : > { %v6602_v11 = vpop.permute.xlu1 %1405 }
  0xe7   : > { %v6609_v6 = vpop.permute.xlu0 %1375 }
  0xe8   : > { %939 = vrot.lane.b32.xlu1 %v6485_v42, %s5823_s21 }
  0xe9   : > { %764 = vrot.lane.b32.xlu0 %v727_v18, %s5821_s19 }
  0xea   : > { %v6616_v62 = vpop.permute.xlu1 %754 }
  0xeb   : > { %v6621_v5 = vpop.permute.xlu0 %675 }
  0xec   : > { %1502 = vrot.lane.b32.xlu1 %v6395_v22, %s5830_s8 }
  0xed   : > { %1447 = vrot.lane.b32.xlu0 %v6395_v22, %s5829_s13 }
  0xee   : > { %v6633_v46 = vpop.permute.xlu1 %1437 }
  0xef   : > { %v6638_v49 = vpop.permute.xlu0 %1407 }
  0xf0   : > { %1020 = vrot.lane.b32.xlu1 %v982_v45, %s5820_s18  ;;  %v869_v45 = vrot.slane %v6665_v19, 1 }
  0xf1   : > { %941 = vrot.lane.b32.xlu0 %v6636_v61, %s5823_s21 }
  0xf2   : > { %v6645_v23 = vpop.permute.xlu1 %931 }
  0xf3   : > { %v6653_v18 = vpop.permute.xlu0 %756 }
  0xf4   : > { %1559 = vrot.lane.b32.xlu1 %v6485_v42, %s5831_s15 }
  0xf5   : > { %1504 = vrot.lane.b32.xlu0 %v6485_v42, %s5830_s8 }
  0xf6   : > { %v1495_v28 = vpop.permute.xlu1 %1494 }
  0xf7   : > { %v6674_v35 = vpop.permute.xlu0 %1439 }
  0xf8   : > { %1165 = vrot.lane.b32.xlu1 %v1099_v13, %s5824_s22  ;;  %v1642_v13 = vsel %vm10500_vm1, %v5735_v27, %v6355_v52  ;;  %v1210_v52 = vrot.slane %v6509_v8, 3  ;;  %v871_v27 = vor.u32 %v870_v58, %v869_v45 }
  0xf9   : > { %1022 = vrot.lane.b32.xlu0 %v985_v48, %s5820_s18  ;;  %v1675_v50 = vsel %vm10501_vm0, %v1642_v13, %v6378_v38  ;;  %v1106_v38 = vsel %vm1036_vm4, %v1102_v17, %v1105_v36  ;;  %v876_v13 = vor.u32 %v875_v32, %v874_v7  ;;  %vm10503_vm0 = vmmov %vm10502_vm2  ;;  %vm10504_vm2 = vsmask.f32 6400  ;;  %v5736_v36 = vld [vmem:[%s5930_s17 + $0x48] sm:$0xff]  }
  0xfa   : > { %v6680_v41 = vpop.permute.xlu1 %1012  ;;  %v1708_v48 = vsel %vm1702_vm9, %v1675_v50, %v6405_v33 }
  0xfb   : > { %v6690_v60 = vpop.permute.xlu0 %933  ;;  %v1741_v34 = vsel %vm1735_vm10, %v1708_v48, %v6447_v0  ;;  %v1211_v0 = vsel %vm10503_vm0, %v1209_v25, %v1210_v52  ;;  %vm10505_vm0 = vcmask 64512   ;;  %v6761_v25 = vld [vmem:[%s5930_s17 + $0xa8] sm:$0xff]  }
  0xfc   : > { %1616 = vrot.lane.b32.xlu1 %v6636_v61, %s5832_s16  ;;  %v1774_v33 = vsel %vm1768_vm11, %v1741_v34, %v6482_v21  ;;  %v6720_v21 = vsel %vm10504_vm2, %v871_v27, %v876_v13  ;;  %v598_v13 = vrot.slane %v6668_v4, 1  ;;  %vm10506_vm2 = vsmask.f32 7424 }
  0xfd   : > { %1561 = vrot.lane.b32.xlu0 %v6636_v61, %s5831_s15  ;;  %v1807_v57 = vsel %vm1801_vm12, %v1774_v33, %v6529_v15 }
  0xfe   : > { %v1552_v43 = vpop.permute.xlu1 %1551  ;;  %v1840_v51 = vsel %vm1834_vm13, %v1807_v57, %v6567_v20  ;;  %v1644_v20 = vsel %vm10500_vm1, %v5736_v36, %v6380_v40  ;;  %v603_v36 = vrot.slane %v6671_v24, 1  ;;  %vm10507_vm1 = vsmask.f32 6400 }
  0xff   : > { %v1497_v50 = vpop.permute.xlu0 %1496  ;;  %v1873_v8 = vsel %vm1867_vm14, %v1840_v51, %v6582_v56  ;;  %v1677_v56 = vsel %vm10505_vm0, %v1644_v20, %v6412_v37  ;;  %vm10508_vm0 = vcmask 1046528  }
 0x100   : > { %1246 = vrot.lane.b32.xlu1 %v1208_v39, %s5825_s23  ;;  %v1906_v15 = vsel %vm1900_vm15, %v1873_v8, %v6602_v11  ;;  %v1710_v11 = vsel %vm1702_vm9, %v1677_v56, %v6455_v53 }
 0x101   : > { %1167 = vrot.lane.b32.xlu0 %v1106_v38, %s5824_s22  ;;  %v1939_v45 = vsel %vm1933_vm6, %v1906_v15, %v6633_v46  ;;  %v1743_v46 = vsel %vm1735_vm10, %v1710_v11, %v6494_v47  ;;  %v599_v15 = vor.u32 %v598_v13, %v6665_v19  ;;  %v731_v13 = vrot.slane %v6761_v25, 1 }
 0x102   : > { %v6717_v31 = vpop.permute.xlu1 %1157  ;;  %v1972_v58 = vsel %vm1966_vm7, %v1939_v45, %v1495_v28  ;;  %v1776_v37 = vsel %vm1768_vm11, %v1743_v46, %v6540_v1 }
 0x103   : > { %v6724_v17 = vpop.permute.xlu0 %1014  ;;  %v2005_v7 = vsel %vm1999_vm5, %v1972_v58, %v1552_v43  ;;  %v1809_v53 = vsel %vm1801_vm12, %v1776_v37, %v6552_v59  ;;  %v6768_v59 = vld [vmem:[%s5930_s17 + $0xb0] ss:$0 sps:$4 sm:$0x77]   ;;  %v604_v11 = vsel %vm10506_vm2, %v599_v15, %v603_v36  ;;  %v729_v37 = vrot.slane %v6651_v55, 1 }
 0x104   : > { %1248 = vrot.lane.b32.xlu1 %v1211_v0, %s5825_s23  ;;  %v1842_v47 = vsel %vm1834_vm13, %v1809_v53, %v6564_v30  ;;  %v881_v27 = vshrl.u32 %v6768_v59, 16 }
 0x105   : > { %1618 = vrot.lane.b32.xlu0 %v6720_v21, %s5832_s16  ;;  %v1875_v39 = vsel %vm1867_vm14, %v1842_v47, %v6609_v6 }
 0x106   : > { %v1609_v40 = vpop.permute.xlu1 %1608  ;;  %v1908_v52 = vsel %vm1900_vm15, %v1875_v39, %v6638_v49  ;;  %v6779_v49 = vshrl.u32 %v6761_v25, 16  ;;  %v883_v0 = vrot.slane %v881_v27, 1 }
 0x107   : > { %v2038_v32 = vsel %vm10331_vm3, %v2005_v7, %v1609_v40  ;;  %v1554_v48 = vpop.permute.xlu0 %1553 }
 0x108   : > { %1355 = vrot.lane.b32.xlu1 %v6293_v12, %s5826_s29  ;;  %5456 = vmatprep.mubr.msk.bf16.mxu0 %vm10328_vm8, %v2038_v32  ;;  %v878_v57 = vrot.slane %v6779_v49, 1 }
 0x109   : > { %1353 = vrot.lane.b32.xlu0 %v6229_v44, %s5826_s29  ;;  %v1941_v44 = vsel %vm1933_vm6, %v1908_v52, %v6674_v35  ;;  %v6785_v35 = vshll.u32 %v6761_v25, 16  ;;  %v887_v52 = vrot.slane %v6585_v54, 1 }
 0x10a   : > { %v6754_v28 = vpop.permute.xlu1 %1238  ;;  %v1974_v30 = vsel %vm1966_vm7, %v1941_v44, %v1497_v50  ;;  %v888_v44 = vrot.slane %v6591_v3, 2 }
 0x10b   : > { %v6758_v1 = vpop.permute.xlu0 %1159  ;;  %v2007_v34 = vsel %vm1999_vm5, %v1974_v30, %v1554_v48  ;;  %v879_v51 = vrot.slane %v6785_v35, 2  ;;  %v610_v7 = vrot.slane %v6785_v35, 1  ;;  %v728_v48 = vrot.slane %v6648_v10, 1 }
 0x10c   : > { %1387 = vrot.lane.b32.xlu1 %v6395_v22, %s10497_s9  ;;  %v892_v30 = vrot.slane %v890_v63, 1 }
 0x10d   : > { %1385 = vrot.lane.b32.xlu0 %v6293_v12, %s10497_s9  ;;  %v6788_v12 = vshll.u32 %v6768_v59, 16  ;;  %v880_v56 = vor.u32 %v879_v51, %v878_v57  ;;  %v611_v53 = vor.u32 %v610_v7, %v6779_v49  ;;  %v732_v57 = vrot.slane %v6768_v59, 1 }
 0x10e   : > { %v6775_v6 = vpop.permute.xlu1 %1240  ;;  %v989_v7 = vrot.slane %v6761_v25, 2 }
 0x10f   : > { %v1611_v43 = vpop.permute.xlu0 %1610  ;;  %v884_v8 = vrot.slane %v6788_v12, 2  ;;  %v615_v47 = vrot.slane %v6788_v12, 1 }
 0x110   : > { %v2040_v38 = vsel %vm10331_vm3, %v2007_v34, %v1611_v43  ;;  %1419 = vrot.lane.b32.xlu1 %v6485_v42, %s10498_s14  ;;  %v893_v34 = vrot.slane %v6594_v14, 2 }
 0x111   : > { %1417 = vrot.lane.b32.xlu0 %v6395_v22, %s10498_s14  ;;  %5457 = vmatmul.mubr.msk.bf16.gmra.mrb[4].mxu0 %vm10328_vm8, %v2040_v38  ;;  %v885_v58 = vor.u32 %v884_v8, %v883_v0  ;;  %v730_v38 = vsel %vm10508_vm0, %v728_v48, %v729_v37  ;;  %v616_v63 = vsel %vm10506_vm2, %v611_v53, %v615_v47  ;;  %v990_v48 = vrot.slane %v6768_v59, 2 }
 0x112   : > { %v6795_v33 = vpop.permute.xlu1 %1347  ;;  %v889_v0 = vor.u32 %v888_v44, %v887_v52  ;;  %v894_v8 = vor.u32 %v893_v34, %v892_v30  ;;  %v986_v37 = vrot.slane %v6648_v10, 2  ;;  %v987_v53 = vrot.slane %v6651_v55, 2 }
 0x113   : > { %v6797_v50 = vpop.permute.xlu0 %1345  ;;  %v6824_v32 = vsel %vm10507_vm1, %v880_v56, %v885_v58  ;;  %vm10509_vm1 = vmmov %vm10508_vm0  ;;  %vm10510_vm0 = vsmask.f32 6400  ;;  %v1114_v47 = vrot.slane %v6779_v49, 2  ;;  %v1115_v52 = vrot.slane %v6785_v35, 3 }
 0x114   : > { %1451 = vrot.lane.b32.xlu1 %v6636_v61, %s5829_s13  ;;  %v733_v36 = vsel %vm10509_vm1, %v731_v13, %v732_v57  ;;  %v6859_v58 = vsel %vm10510_vm0, %v889_v0, %v894_v8  ;;  %v1117_v44 = vrot.slane %v881_v27, 2  ;;  %v1118_v30 = vrot.slane %v6788_v12, 3  ;;  %v5737_v8 = vld [vmem:[%s5930_s17 + $0x54] sm:$0xff]  }
 0x115   : > { %1449 = vrot.lane.b32.xlu0 %v6485_v42, %s5829_s13  ;;  %v1108_v13 = vrot.slane %v6668_v4, 3  ;;  %v1110_v57 = vrot.slane %v872_v9, 2  ;;  %vm10512_vm2 = vcmask 1045504   ;;  %v1116_v35 = vor.u32 %v1115_v52, %v1114_v47 }
 0x116   : > { %v6808_v20 = vpop.permute.xlu1 %677  ;;  %v991_v49 = vsel %vm10512_vm2, %v989_v7, %v990_v48  ;;  %v1119_v12 = vor.u32 %v1118_v30, %v1117_v44  ;;  %vm10513_vm1 = vmmov %vm10512_vm2  ;;  %vm10514_vm0 = vcmask 31744   ;;  %vm10515_vm8 = vcmask 64512  }
 0x117   : > { %v6810_v45 = vpop.permute.xlu0 %1377  ;;  %v988_v4 = vsel %vm10513_vm1, %v986_v37, %v987_v53  ;;  %v1215_v37 = vrot.slane %v6761_v25, 3  ;;  %v1216_v53 = vrot.slane %v6768_v59, 3  ;;  %v1212_v52 = vrot.slane %v6648_v10, 3  ;;  %vm10518_vm1 = vmmov %vm10514_vm0 }
 0x118   : > { %1508 = vrot.lane.b32.xlu1 %v6720_v21, %s5830_s8  ;;  %v1120_v48 = vsel %vm1036_vm4, %v1116_v35, %v1119_v12  ;;  %v1213_v44 = vrot.slane %v6651_v55, 3  ;;  %v6942_v12 = vld [vmem:[%s5930_s17 + $0xc0] sm:$0xff]  }
 0x119   : > { %1506 = vrot.lane.b32.xlu0 %v6636_v61, %s5830_s8 }
 0x11a   : > { %v6818_v40 = vpop.permute.xlu1 %1409 }
 0x11b   : > { %v6820_v46 = vpop.permute.xlu0 %1379 }
 0x11c   : > { %685 = vrot.lane.b32.xlu1 %v604_v11, %s5822_s20 }
 0x11d   : > { %1563 = vrot.lane.b32.xlu0 %v6720_v21, %s5831_s15 }
 0x11e   : > { %v6832_v39 = vpop.permute.xlu1 %758 }
 0x11f   : > { %v6839_v43 = vpop.permute.xlu0 %679 }
 0x120   : > { %1620 = vrot.lane.b32.xlu1 %v6824_v32, %s5832_s16 }
 0x121   : > { %1565 = vrot.lane.b32.xlu0 %v6824_v32, %s5831_s15 }
 0x122   : > { %v6848_v51 = vpop.permute.xlu1 %1441 }
 0x123   : > { %v6851_v15 = vpop.permute.xlu0 %1411 }
 0x124   : > { %766 = vrot.lane.b32.xlu1 %v730_v38, %s5821_s19  ;;  %v1107_v38 = vrot.slane %v6665_v19, 2 }
 0x125   : > { %687 = vrot.lane.b32.xlu0 %v616_v63, %s5822_s20  ;;  %v1111_v63 = vrot.slane %v6671_v24, 3  ;;  %v1646_v24 = vsel %vm10514_vm0, %v5737_v8, %v6578_v16  ;;  %vm10519_vm0 = vcmask 64512  }
 0x126   : > { %v6856_v56 = vpop.permute.xlu1 %935  ;;  %v1109_v27 = vor.u32 %v1108_v13, %v1107_v38  ;;  %v5738_v38 = vld [vmem:[%s5930_s17 + $0x60] sm:$0xff]  }
 0x127   : > { %v6861_v11 = vpop.permute.xlu0 %760  ;;  %v1112_v9 = vor.u32 %v1111_v63, %v1110_v57 }
 0x128   : > { %10511 = vst [vmem:[#allocation5_spill] sm:$0xff] %v6861_v11  ;;  %768 = vrot.lane.b32.xlu1 %v733_v36, %s5821_s19  ;;  %v1679_v11 = vsel %vm10515_vm8, %v1646_v24, %v6616_v62  ;;  %vm10516_vm8 = vcmask 1044480   ;;  %v6983_v24 = vld [vmem:[%s5930_s17 + $0xcc] sm:$0xff]  }
 0x129   : > { %1622 = vrot.lane.b32.xlu0 %v6859_v58, %s5832_s16  ;;  %v1712_v7 = vsel %vm1702_vm9, %v1679_v11, %v6645_v23  ;;  %v1113_v62 = vsel %vm1036_vm4, %v1109_v27, %v1112_v9  ;;  %v1217_v59 = vsel %vm10516_vm8, %v1215_v37, %v1216_v53  ;;  %vm10517_vm2 = vmmov %vm10516_vm8  ;;  %vm10520_vm8 = vcmask 457728  }
 0x12a   : > { %v1499_v34 = vpop.permute.xlu1 %1498  ;;  %v1745_v16 = vsel %vm1735_vm10, %v1712_v7, %v6680_v41  ;;  %v6965_v9 = vshrl.u32 %v6942_v12, 16 }
 0x12b   : > { %v6878_v0 = vpop.permute.xlu0 %1443  ;;  %v1778_v23 = vsel %vm1768_vm11, %v1745_v16, %v6717_v31  ;;  %v1214_v31 = vsel %vm10517_vm2, %v1212_v52, %v1213_v44  ;;  %vm10521_vm2 = vmmov %vm10520_vm8  ;;  %v7004_v52 = vshrl.u32 %v6983_v24, 16  ;;  %v7007_v44 = vshll.u32 %v6983_v24, 16 }
 0x12c   : > { %945 = vrot.lane.b32.xlu1 %v6824_v32, %s5823_s21  ;;  %v1811_v25 = vsel %vm1801_vm12, %v1778_v23, %v6754_v28  ;;  %v896_v16 = vrot.slane %v6965_v9, 1 }
 0x12d   : > { %943 = vrot.lane.b32.xlu0 %v6720_v21, %s5823_s21  ;;  %v1844_v41 = vsel %vm1834_vm13, %v1811_v25, %v6797_v50  ;;  %v1648_v50 = vsel %vm10518_vm1, %v5738_v38, %v6621_v5  ;;  %vm10522_vm1 = vsmask.f32 6400 }
 0x12e   : > { %v6885_v19 = vpop.permute.xlu1 %1016  ;;  %v1877_v10 = vsel %vm1867_vm14, %v1844_v41, %v6810_v45  ;;  %v1681_v45 = vsel %vm10519_vm0, %v1648_v50, %v6653_v18  ;;  %vm10523_vm0 = vmmov %vm10522_vm1 }
 0x12f   : > { %v6891_v36 = vpop.permute.xlu0 %937  ;;  %v1910_v28 = vsel %vm1900_vm15, %v1877_v10, %v6818_v40  ;;  %v1714_v40 = vsel %vm1702_vm9, %v1681_v45, %v6690_v60  ;;  %v6950_v60 = vld [vmem:[%s5930_s17 + $0xc8] ss:$0 sps:$4 sm:$0x77]  }
 0x130   : > { %1026 = vrot.lane.b32.xlu1 %v991_v49, %s5820_s18  ;;  %v1943_v13 = vsel %vm1933_vm6, %v1910_v28, %v6848_v51  ;;  %v1747_v5 = vsel %vm1735_vm10, %v1714_v40, %v6724_v17  ;;  %v906_v28 = vrot.slane %v7007_v44, 2 }
 0x131   : > { %1024 = vrot.lane.b32.xlu0 %v988_v4, %s5820_s18  ;;  %v1976_v57 = vsel %vm1966_vm7, %v1943_v13, %v1499_v34  ;;  %v1780_v18 = vsel %vm1768_vm11, %v1747_v5, %v6758_v1 }
 0x132   : > { %v1556_v47 = vpop.permute.xlu1 %1555  ;;  %v1813_v17 = vsel %vm1801_vm12, %v1780_v18, %v6775_v6  ;;  %v6975_v6 = vshll.u32 %v6950_v60, 16 }
 0x133   : > { %v1501_v11 = vpop.permute.xlu0 %1500  ;;  %v2009_v63 = vsel %vm1999_vm5, %v1976_v57, %v1556_v47  ;;  %v1846_v34 = vsel %vm1834_vm13, %v1813_v17, %v6795_v33  ;;  %v899_v33 = vshrl.u32 %v6950_v60, 16 }
 0x134   : > { %1171 = vrot.lane.b32.xlu1 %v1120_v48, %s5824_s22  ;;  %v1879_v1 = vsel %vm1867_vm14, %v1846_v34, %v6820_v46  ;;  %v639_v34 = vrot.slane %v6975_v6, 1 }
 0x135   : > { %1169 = vrot.lane.b32.xlu0 %v1113_v62, %s5824_s22  ;;  %v1912_v8 = vsel %vm1900_vm15, %v1879_v1, %v6851_v15  ;;  %v6986_v15 = vld [vmem:[%s5930_s17 + $0xd4] ss:$0 sps:$4 sm:$0x77]   ;;  %v902_v62 = vrot.slane %v6975_v6, 2 }
 0x136   : > { %v6918_v55 = vpop.permute.xlu1 %1161  ;;  %v1945_v46 = vsel %vm1933_vm6, %v1912_v8, %v6878_v0  ;;  %v901_v0 = vrot.slane %v899_v33, 1  ;;  %v7010_v23 = vshll.u32 %v6986_v15, 16 }
 0x137   : > { %v6923_v30 = vpop.permute.xlu0 %1018  ;;  %v1978_v7 = vsel %vm1966_vm7, %v1945_v46, %v1501_v11  ;;  %v908_v11 = vshrl.u32 %v6986_v15, 16 }
 0x138   : > { %1252 = vrot.lane.b32.xlu1 %v1217_v59, %s5825_s23  ;;  %v903_v10 = vor.u32 %v902_v62, %v901_v0  ;;  %v911_v50 = vrot.slane %v7010_v23, 2 }
 0x139   : > { %1250 = vrot.lane.b32.xlu0 %v1214_v31, %s5825_s23  ;;  %v905_v31 = vrot.slane %v7004_v52, 1  ;;  %v910_v38 = vrot.slane %v908_v11, 1 }
 0x13a   : > { %v1613_v49 = vpop.permute.xlu1 %1612 }
 0x13b   : > { %v2042_v51 = vsel %vm10331_vm3, %v2009_v63, %v1613_v49  ;;  %v1558_v35 = vpop.permute.xlu0 %1557  ;;  %v907_v40 = vor.u32 %v906_v28, %v905_v31  ;;  %v912_v63 = vor.u32 %v911_v50, %v910_v38  ;;  %v995_v31 = vrot.slane %v6942_v12, 2 }
 0x13c   : > { %1359 = vrot.lane.b32.xlu1 %v6485_v42, %s5826_s29  ;;  %5460 = vmatprep.mubr.msk.bf16.mxu0 %vm10520_vm8, %v2042_v51  ;;  %v2011_v37 = vsel %vm1999_vm5, %v1978_v7, %v1558_v35  ;;  %v622_v51 = vrot.slane %v6591_v3, 1  ;;  %v627_v3 = vrot.slane %v6594_v14, 1  ;;  %vm10524_vm8 = vsmask.f32 7424 }
 0x13d   : > { %1357 = vrot.lane.b32.xlu0 %v6395_v22, %s5826_s29  ;;  %v6972_v22 = vshll.u32 %v6942_v12, 16  ;;  %v7048_v18 = vsel %vm10523_vm0, %v907_v40, %v912_v63  ;;  %v735_v14 = vrot.slane %v6574_v2, 1  ;;  %v996_v28 = vrot.slane %v6950_v60, 2 }
 0x13e   : > { %v6958_v4 = vpop.permute.xlu1 %1242  ;;  %v623_v8 = vor.u32 %v622_v51, %v6585_v54  ;;  %v734_v54 = vrot.slane %v6570_v26, 1  ;;  %v1128_v38 = vrot.slane %v6965_v9, 2  ;;  %v1131_v40 = vrot.slane %v899_v33, 2 }
 0x13f   : > { %v6962_v27 = vpop.permute.xlu0 %1163  ;;  %v634_v49 = vrot.slane %v6972_v22, 1  ;;  %v1129_v50 = vrot.slane %v6972_v22, 3  ;;  %v1132_v63 = vrot.slane %v6975_v6, 3  ;;  %v992_v51 = vrot.slane %v6570_v26, 2 }
 0x140   : > { %1391 = vrot.lane.b32.xlu1 %v6636_v61, %s10497_s9 }
 0x141   : > { %1389 = vrot.lane.b32.xlu0 %v6485_v42, %s10497_s9  ;;  %v897_v42 = vrot.slane %v6972_v22, 2  ;;  %v635_v17 = vor.u32 %v634_v49, %v6965_v9  ;;  %v1130_v22 = vor.u32 %v1129_v50, %v1128_v38  ;;  %v5740_v50 = vld [vmem:[%s5930_s17 + $0x78] sm:$0xff]  }
 0x142   : > { %v6989_v48 = vpop.permute.xlu1 %1244 }
 0x143   : > { %v1615_v53 = vpop.permute.xlu0 %1614  ;;  %v898_v59 = vor.u32 %v897_v42, %v896_v16  ;;  %v640_v7 = vsel %vm10524_vm8, %v635_v17, %v639_v34  ;;  %v993_v17 = vrot.slane %v6574_v2, 2 }
 0x144   : > { %v2044_v47 = vsel %vm10331_vm3, %v2011_v37, %v1615_v53  ;;  %1423 = vrot.lane.b32.xlu1 %v6720_v21, %s10498_s14  ;;  %v737_v37 = vrot.slane %v6942_v12, 1  ;;  %v738_v53 = vrot.slane %v6950_v60, 1 }
 0x145   : > { %1421 = vrot.lane.b32.xlu0 %v6636_v61, %s10498_s14  ;;  %5461 = vmatmul.mubr.msk.bf16.gmra.mrb[8].mxu0 %vm10521_vm2, %v2044_v47  ;;  %v7035_v57 = vsel %vm10522_vm1, %v898_v59, %v903_v10  ;;  %vm10525_vm2 = vmmov %vm10524_vm8  ;;  %vm10526_vm1 = vcmask 1046528   ;;  %vm10528_vm8 = vcmask 1045504  }
 0x146   : > { %v7013_v25 = vpop.permute.xlu1 %1351  ;;  %v628_v47 = vsel %vm10525_vm2, %v623_v8, %v627_v3  ;;  %v739_v0 = vsel %vm10526_vm1, %v737_v37, %v738_v53  ;;  %vm10527_vm0 = vmmov %vm10526_vm1  ;;  %v997_v9 = vsel %vm10528_vm8, %v995_v31, %v996_v28  ;;  %v1133_v8 = vor.u32 %v1132_v63, %v1131_v40  ;;  %v5739_v3 = vld [vmem:[%s5930_s17 + $0x6c] sm:$0xff]  }
 0x147   : > { %v7015_v41 = vpop.permute.xlu0 %1349  ;;  %v736_v59 = vsel %vm10527_vm0, %v734_v54, %v735_v14  ;;  %vm10529_vm2 = vmmov %vm10528_vm8  ;;  %vm10530_vm1 = vcmask 31744   ;;  %vm10531_vm0 = vcmask 64512   ;;  %v1221_v14 = vrot.slane %v6942_v12, 3 }
 0x148   : > { %1455 = vrot.lane.b32.xlu1 %v6824_v32, %s5829_s13  ;;  %v994_v6 = vsel %vm10529_vm2, %v992_v51, %v993_v17  ;;  %v1134_v54 = vsel %vm1036_vm4, %v1130_v22, %v1133_v8  ;;  %v1219_v31 = vrot.slane %v6574_v2, 3  ;;  %vm10532_vm8 = vcmask 1044480   ;;  %v7152_v22 = vld [vmem:[%s5930_s17 + $0xd8] sm:$0xff]  }
 0x149   : > { %1453 = vrot.lane.b32.xlu0 %v6720_v21, %s5829_s13  ;;  %vm10533_vm2 = vmmov %vm10532_vm8 }
 0x14a   : > { %v7026_v13 = vpop.permute.xlu1 %681 }
 0x14b   : > { %v7028_v45 = vpop.permute.xlu0 %1381 }
 0x14c   : > { %1512 = vrot.lane.b32.xlu1 %v6859_v58, %s5830_s8 }
 0x14d   : > { %1510 = vrot.lane.b32.xlu0 %v6824_v32, %s5830_s8 }
 0x14e   : > { %v7038_v5 = vpop.permute.xlu1 %1413 }
 0x14f   : > { %v7041_v35 = vpop.permute.xlu0 %1383 }
 0x150   : > { %1569 = vrot.lane.b32.xlu1 %v7035_v57, %s5831_s15 }
 0x151   : > { %1567 = vrot.lane.b32.xlu0 %v6859_v58, %s5831_s15 }
 0x152   : > { %v7052_v1 = vpop.permute.xlu1 %762 }
 0x153   : > { %v7056_v46 = vpop.permute.xlu0 %683 }
 0x154   : > { %1626 = vrot.lane.b32.xlu1 %v7048_v18, %s5832_s16 }
 0x155   : > { %1624 = vrot.lane.b32.xlu0 %v7035_v57, %s5832_s16 }
 0x156   : > { %v1446_v16 = vpop.permute.xlu1 %1445 }
 0x157   : > { %v7068_v42 = vpop.permute.xlu0 %1415 }
 0x158   : > { %691 = vrot.lane.b32.xlu1 %v640_v7, %s5822_s20  ;;  %v1650_v7 = vsel %vm10530_vm1, %v5739_v3, %v6808_v20 }
 0x159   : > { %689 = vrot.lane.b32.xlu0 %v628_v47, %s5822_s20  ;;  %v1683_v53 = vsel %vm10531_vm0, %v1650_v7, %v6832_v39  ;;  %v1218_v39 = vrot.slane %v6570_v26, 3  ;;  %v7175_v7 = vshrl.u32 %v7152_v22, 16 }
 0x15a   : > { %v7073_v62 = vpop.permute.xlu1 %939  ;;  %v1716_v47 = vsel %vm1702_vm9, %v1683_v53, %v6856_v56 }
 0x15b   : > { %v7076_v10 = vpop.permute.xlu0 %764  ;;  %v1749_v20 = vsel %vm1735_vm10, %v1716_v47, %v6885_v19  ;;  %v5592_v47 = vld [vmem:[%s5930_s17 + $0xe4] sm:$0xff]  }
 0x15c   : > { %772 = vrot.lane.b32.xlu1 %v739_v0, %s5821_s19  ;;  %v1222_v0 = vrot.slane %v6950_v60, 3  ;;  %v1782_v56 = vsel %vm1768_vm11, %v1749_v20, %v6918_v55  ;;  %v1220_v55 = vsel %vm10533_vm2, %v1218_v39, %v1219_v31 }
 0x15d   : > { %770 = vrot.lane.b32.xlu0 %v736_v59, %s5821_s19  ;;  %v1815_v38 = vsel %vm1801_vm12, %v1782_v56, %v6958_v4  ;;  %v1474_v56 = vshrl.u32 %v5592_v47, 16 }
 0x15e   : > { %v1503_v49 = vpop.permute.xlu1 %1502  ;;  %v1848_v12 = vsel %vm1834_vm13, %v1815_v38, %v7015_v41  ;;  %v1223_v19 = vsel %vm10532_vm8, %v1221_v14, %v1222_v0  ;;  %v1652_v41 = vsel %vm10530_vm1, %v5740_v50, %v6839_v43  ;;  %vm10535_vm8 = vcmask 457728  }
 0x15f   : > { %v7089_v34 = vpop.permute.xlu0 %1447  ;;  %v1881_v26 = vsel %vm1867_vm14, %v1848_v12, %v7028_v45  ;;  %v10534_v45 = vld [vmem:[#allocation5_spill] sm:$0xff]  ;;  %vm10536_vm2 = vmmov %vm10535_vm8  ;;  %v1476_v50 = vrot.slane %v1474_v56, 1  ;;  %vm10537_vm1 = vsmask.f32 6400 }
 0x160   : > { %949 = vrot.lane.b32.xlu1 %v7035_v57, %s5823_s21  ;;  %v1914_v60 = vsel %vm1900_vm15, %v1881_v26, %v7038_v5  ;;  %v1685_v40 = vsel %vm10531_vm0, %v1652_v41, %v10534_v45  ;;  %vm10538_vm0 = vmmov %vm10537_vm1 }
 0x161   : > { %947 = vrot.lane.b32.xlu0 %v6859_v58, %s5823_s21  ;;  %v1718_v5 = vsel %vm1702_vm9, %v1685_v40, %v6891_v36  ;;  %v7160_v36 = vld [vmem:[%s5930_s17 + $0xe0] ss:$0 sps:$4 sm:$0x77]  }
 0x162   : > { %v7096_v33 = vpop.permute.xlu1 %1020  ;;  %v1751_v43 = vsel %vm1735_vm10, %v1718_v5, %v6923_v30 }
 0x163   : > { %v7102_v37 = vpop.permute.xlu0 %941  ;;  %v1784_v8 = vsel %vm1768_vm11, %v1751_v43, %v6962_v27 }
 0x164   : > { %1030 = vrot.lane.b32.xlu1 %v997_v9, %s5820_s18  ;;  %v1817_v30 = vsel %vm1801_vm12, %v1784_v8, %v6989_v48  ;;  %v7185_v48 = vshll.u32 %v7160_v36, 16 }
 0x165   : > { %1028 = vrot.lane.b32.xlu0 %v994_v6, %s5820_s18 }
 0x166   : > { %v1560_v59 = vpop.permute.xlu1 %1559  ;;  %v920_v31 = vrot.slane %v7185_v48, 2 }
 0x167   : > { %v1505_v28 = vpop.permute.xlu0 %1504 }
 0x168   : > { %1175 = vrot.lane.b32.xlu1 %v1134_v54, %s5824_s22  ;;  %v5593_v54 = vld [vmem:[%s5930_s17 + $0xec] ss:$0 sps:$4 sm:$0x77]  }
 0x169   : > { %1173 = vrot.lane.b32.xlu0 %v6619_v29, %s5824_s22  ;;  %v1947_v29 = vsel %vm1933_vm6, %v1914_v60, %v1446_v16  ;;  %v1482_v38 = vshrl.u32 %v5593_v54, 16  ;;  %v1485_v12 = vshll.u32 %v5593_v54, 16  ;;  %v5741_v54 = vld [vmem:[%s5930_s17 + $0x84] sm:$0xff]  }
 0x16a   : > { %v7129_v2 = vpop.permute.xlu1 %1165  ;;  %v1980_v63 = vsel %vm1966_vm7, %v1947_v29, %v1503_v49  ;;  %v1850_v49 = vsel %vm1834_vm13, %v1817_v30, %v7013_v25  ;;  %v917_v25 = vshrl.u32 %v7160_v36, 16 }
 0x16b   : > { %v7134_v4 = vpop.permute.xlu0 %1022  ;;  %v2013_v51 = vsel %vm1999_vm5, %v1980_v63, %v1560_v59  ;;  %v1883_v27 = vsel %vm1867_vm14, %v1850_v49, %v7041_v35  ;;  %v914_v59 = vrot.slane %v7175_v7, 1  ;;  %v1484_v29 = vrot.slane %v1482_v38, 1 }
 0x16c   : > { %1256 = vrot.lane.b32.xlu1 %v1223_v19, %s5825_s23  ;;  %v1916_v53 = vsel %vm1900_vm15, %v1883_v27, %v7068_v42  ;;  %v1487_v45 = vrot.slane %v1485_v12, 2  ;;  %v663_v49 = vrot.slane %v7185_v48, 1 }
 0x16d   : > { %1254 = vrot.lane.b32.xlu0 %v1220_v55, %s5825_s23  ;;  %v1949_v35 = vsel %vm1933_vm6, %v1916_v53, %v7089_v34 }
 0x16e   : > { %v1617_v17 = vpop.permute.xlu1 %1616  ;;  %v1982_v42 = vsel %vm1966_vm7, %v1949_v35, %v1505_v28  ;;  %v1477_v28 = vshll.u32 %v5592_v47, 16  ;;  %v1488_v43 = vor.u32 %v1487_v45, %v1484_v29  ;;  %v651_v47 = vrot.slane %v7010_v23, 1 }
 0x16f   : > { %v2046_v16 = vsel %vm10331_vm3, %v2013_v51, %v1617_v17  ;;  %v1562_v9 = vpop.permute.xlu0 %1561  ;;  %v1002_v29 = vrot.slane %v7160_v36, 2  ;;  %v1142_v45 = vrot.slane %v7175_v7, 2 }
 0x170   : > { %1363 = vrot.lane.b32.xlu1 %v6720_v21, %s5826_s29  ;;  %5464 = vmatprep.mubr.msk.bf16.mxu0 %vm10535_vm8, %v2046_v16  ;;  %v2015_v0 = vsel %vm1999_vm5, %v1982_v42, %v1562_v9  ;;  %v1479_v41 = vrot.slane %v1477_v28, 2  ;;  %v646_v9 = vrot.slane %v7007_v44, 1  ;;  %vm10539_vm8 = vcmask 31744  }
 0x171   : > { %1361 = vrot.lane.b32.xlu0 %v6636_v61, %s5826_s29  ;;  %v7182_v61 = vshll.u32 %v7152_v22, 16  ;;  %v1654_v42 = vsel %vm10539_vm8, %v5741_v54, %v7026_v13  ;;  %v740_v13 = vrot.slane %v6983_v24, 1  ;;  %vm10543_vm8 = vcmask 1046528  }
 0x172   : > { %v7168_v6 = vpop.permute.xlu1 %1246  ;;  %v1480_v17 = vor.u32 %v1479_v41, %v1476_v50  ;;  %v647_v35 = vor.u32 %v646_v9, %v7004_v52  ;;  %v1001_v50 = vrot.slane %v7152_v22, 2  ;;  %v1146_v9 = vrot.slane %v7185_v48, 3 }
 0x173   : > { %v7172_v3 = vpop.permute.xlu0 %1167  ;;  %v915_v34 = vrot.slane %v7182_v61, 2  ;;  %v658_v5 = vrot.slane %v7182_v61, 1  ;;  %v1138_v48 = vrot.slane %v908_v11, 2  ;;  %v2522_v54 = vlaneseq }
 0x174   : > { %1395 = vrot.lane.b32.xlu1 %v6824_v32, %s10497_s9  ;;  %v7235_v27 = vsel %vm10538_vm0, %v1480_v17, %v1488_v43  ;;  %v1143_v17 = vrot.slane %v7182_v61, 3  ;;  %v1145_v43 = vrot.slane %v917_v25, 2 }
 0x175   : > { %1393 = vrot.lane.b32.xlu0 %v6720_v21, %s10497_s9  ;;  %v919_v21 = vrot.slane %v917_v25, 1  ;;  %v916_v55 = vor.u32 %v915_v34, %v914_v59  ;;  %v659_v30 = vor.u32 %v658_v5, %v7175_v7  ;;  %v1135_v7 = vrot.slane %v7004_v52, 2 }
 0x176   : > { %v7195_v14 = vpop.permute.xlu1 %1248 }
 0x177   : > { %v1619_v20 = vpop.permute.xlu0 %1618  ;;  %v921_v60 = vor.u32 %v920_v31, %v919_v21  ;;  %v744_v21 = vrot.slane %v7160_v36, 1  ;;  %v741_v31 = vrot.slane %v6986_v15, 1 }
 0x178   : > { %v2048_v39 = vsel %vm10331_vm3, %v2015_v0, %v1619_v20  ;;  %1427 = vrot.lane.b32.xlu1 %v6859_v58, %s10498_s14 }
 0x179   : > { %1425 = vrot.lane.b32.xlu0 %v6824_v32, %s10498_s14  ;;  %5465 = vmatmul.mubr.msk.bf16.gmra.mrb[12].mxu0 %vm10536_vm2, %v2048_v39  ;;  %v7223_v51 = vsel %vm10537_vm1, %v916_v55, %v921_v60  ;;  %vm10540_vm2 = vcmask 64512   ;;  %vm10541_vm1 = vsmask.f32 7424  ;;  %v743_v39 = vrot.slane %v7152_v22, 1 }
 0x17a   : > { %v7209_v19 = vpop.permute.xlu1 %1355  ;;  %v1687_v20 = vsel %vm10540_vm2, %v1654_v42, %v7052_v1  ;;  %v664_v59 = vsel %vm10541_vm1, %v659_v30, %v663_v49  ;;  %vm10542_vm0 = vmmov %vm10541_vm1  ;;  %v5742_v30 = vld [vmem:[%s5930_s17 + $0x90] sm:$0xff]   ;;  %vm10545_vm1 = vcmask 31744  }
 0x17b   : > { %v1354_v26 = vpop.permute.xlu0 %1353  ;;  %v1720_v34 = vsel %vm1702_vm9, %v1687_v20, %v7073_v62  ;;  %v652_v28 = vsel %vm10542_vm0, %v647_v35, %v651_v47  ;;  %vm10544_vm2 = vmmov %vm10543_vm8  ;;  %vm10546_vm0 = vcmask 64512  }
 0x17c   : > { %1459 = vrot.lane.b32.xlu1 %v7035_v57, %s5829_s13  ;;  %v1753_v1 = vsel %vm1735_vm10, %v1720_v34, %v7096_v33  ;;  %v745_v33 = vsel %vm10543_vm8, %v743_v39, %v744_v21  ;;  %v742_v60 = vsel %vm10544_vm2, %v740_v13, %v741_v31  ;;  %vm10547_vm8 = vcmask 457728  }
 0x17d   : > { %1457 = vrot.lane.b32.xlu0 %v6859_v58, %s5829_s13  ;;  %v1786_v38 = vsel %vm1768_vm11, %v1753_v1, %v7129_v2  ;;  %vm10548_vm2 = vcmask 1045504   ;;  %v7319_v13 = vshrl.u32 %v2522_v54, 7 }
 0x17e   : > { %v7215_v40 = vpop.permute.xlu1 %1387  ;;  %v1819_v12 = vsel %vm1801_vm12, %v1786_v38, %v7168_v6  ;;  %v998_v6 = vrot.slane %v6983_v24, 2 }
 0x17f   : > { %v1386_v63 = vpop.permute.xlu0 %1385  ;;  %v1852_v55 = vsel %vm1834_vm13, %v1819_v12, %v1354_v26 }
 0x180   : > { %1516 = vrot.lane.b32.xlu1 %v7048_v18, %s5830_s8  ;;  %v1885_v41 = vsel %vm1867_vm14, %v1852_v55, %v1386_v63  ;;  %v1656_v63 = vsel %vm10545_vm1, %v5742_v30, %v7056_v46  ;;  %v1139_v46 = vrot.slane %v7010_v23, 3  ;;  %v1144_v23 = vor.u32 %v1143_v17, %v1142_v45  ;;  %vm10549_vm1 = vmmov %vm10548_vm2 }
 0x181   : > { %1514 = vrot.lane.b32.xlu0 %v7035_v57, %s5830_s8  ;;  %v1689_v61 = vsel %vm10546_vm0, %v1656_v63, %v7076_v10  ;;  %v1224_v55 = vrot.slane %v6983_v24, 3  ;;  %vm10551_vm0 = vcmask 1044480   ;;  %v2525_v17 = vadd.s32 16, %v7319_v13 }
 0x182   : > { %v7225_v16 = vpop.permute.xlu1 %1419  ;;  %v1722_v25 = vsel %vm1702_vm9, %v1689_v61, %v7102_v37  ;;  %v1147_v37 = vor.u32 %v1146_v9, %v1145_v43  ;;  %v1140_v39 = vor.u32 %v1139_v46, %v1138_v48  ;;  %v10329_v43 = vmov 0.0  }
 0x183   : > { %v1418_v8 = vpop.permute.xlu0 %1417  ;;  %v1755_v10 = vsel %vm1735_vm10, %v1722_v25, %v7134_v4  ;;  %v1003_v4 = vsel %vm10548_vm2, %v1001_v50, %v1002_v29  ;;  %v5595_v29 = vld [vmem:[%s5930_s17 + $0xf8] ss:$0 sps:$4 sm:$0x77]   ;;  %v2573_v25 = vand.u32 15, %v2525_v17 }
 0x184   : > { %1573 = vrot.lane.b32.xlu1 %v7223_v51, %s5831_s15  ;;  %v1918_v26 = vsel %vm1900_vm15, %v1885_v41, %v1418_v8  ;;  %v1136_v8 = vrot.slane %v7007_v44, 3  ;;  %v999_v44 = vrot.slane %v6986_v15, 2  ;;  %v1788_v11 = vsel %vm1768_vm11, %v1755_v10, %v7172_v3  ;;  %v5594_v41 = vld [vmem:[%s5930_s17 + $0xf0] sm:$0xff]  }
 0x185   : > { %1571 = vrot.lane.b32.xlu0 %v7048_v18, %s5831_s15  ;;  %v1821_v20 = vsel %vm1801_vm12, %v1788_v11, %v7195_v14  ;;  %v1531_v63 = vshrl.u32 %v5594_v41, 16  ;;  %v3241_v10 = vsub.s32 0, %v7319_v13 }
 0x186   : > { %v7237_v53 = vpop.permute.xlu1 %1451  ;;  %v1854_v3 = vsel %vm1834_vm13, %v1821_v20, %v7209_v19  ;;  %v1000_v21 = vsel %vm10549_vm1, %v998_v6, %v999_v44 }
 0x187   : > { %v1450_v0 = vpop.permute.xlu0 %1449  ;;  %v1887_v31 = vsel %vm1867_vm14, %v1854_v3, %v7215_v40  ;;  %v1228_v40 = vrot.slane %v7160_v36, 3  ;;  %v2524_v36 = vadd.s32 8, %v7319_v13 }
 0x188   : > { %1630 = vrot.lane.b32.xlu1 %v7235_v27, %s5832_s16  ;;  %v1951_v49 = vsel %vm1933_vm6, %v1918_v26, %v1450_v0  ;;  %v1920_v1 = vsel %vm1900_vm15, %v1887_v31, %v7225_v16  ;;  %v5596_v26 = vld [vmem:[%s5930_s17 + $0xfc] sm:$0xff]  }
 0x189   : > { %1628 = vrot.lane.b32.xlu0 %v7223_v51, %s5832_s16  ;;  %v1953_v19 = vsel %vm1933_vm6, %v1920_v1, %v7237_v53  ;;  %v2559_v53 = vand.u32 15, %v7319_v13  ;;  %v2566_v45 = vand.u32 15, %v2524_v36  ;;  %v1591_v48 = vshll.u32 %v5596_v26, 16 }
 0x18a   : > { %v7259_v56 = vpop.permute.xlu1 %1508 }
 0x18b   : > { %v1507_v62 = vpop.permute.xlu0 %1506  ;;  %v1986_v12 = vsel %vm1966_vm7, %v1953_v19, %v7259_v56  ;;  %vm2939_vm2 = vcmp.ge.s32.totalorder %v2559_v53, 1  ;;  %vm3004_vm1 = vcmp.le.s32.totalorder %v2566_v45, 14  ;;  %v1593_v3 = vrot.slane %v1591_v48, 2 }
 0x18c   : > { %695 = vrot.lane.b32.xlu1 %v664_v59, %s5822_s20  ;;  %v1984_v35 = vsel %vm1966_vm7, %v1951_v49, %v1507_v62  ;;  %v1137_v59 = vor.u32 %v1136_v8, %v1135_v7  ;;  %v1227_v62 = vrot.slane %v7152_v22, 3  ;;  %v2971_v9 = vsel %vm2939_vm2, 1.0, %v10329_v43 }
 0x18d   : > { %693 = vrot.lane.b32.xlu0 %v652_v28, %s5822_s20  ;;  %v1148_v28 = vsel %vm1036_vm4, %v1144_v23, %v1147_v37  ;;  %v1534_v49 = vshll.u32 %v5594_v41, 16  ;;  %v1539_v7 = vshrl.u32 %v5595_v29, 16  ;;  %v1542_v8 = vshll.u32 %v5595_v29, 16  ;;  %v7384_v23 = vld [vmem:[%s10312_s3] sm:$0xff] }
 0x18e   : > { %v7273_v2 = vpop.permute.xlu1 %685  ;;  %v1141_v38 = vsel %vm1036_vm4, %v1137_v59, %v1140_v39  ;;  %vm10550_vm4 = vmmov %vm10547_vm8  ;;  %v1229_v24 = vsel %vm10551_vm0, %v1227_v62, %v1228_v40  ;;  %v7379_v11 = vsel %vm3004_vm1, 1.0, %v10329_v43  ;;  %v1533_v37 = vrot.slane %v1531_v63, 1 }
 0x18f   : > { %v1564_v5 = vpop.permute.xlu0 %1563  ;;  %v1536_v20 = vrot.slane %v1534_v49, 2  ;;  %v7400_v19 = vrot.slane %v7384_v23, %v3241_v10  ;;  %v3537_v62 = vrot.slane %v7379_v11, 7  ;;  %vm10557_vm2 = vsmask.f32 6400 }
 0x190   : > { %776 = vrot.lane.b32.xlu1 %v745_v33, %s5821_s19  ;;  %v2017_v47 = vsel %vm1999_vm5, %v1984_v35, %v1564_v5  ;;  %v1225_v33 = vrot.slane %v6986_v15, 3  ;;  %v5597_v5 = vld [vmem:[%s5930_s17 + $0x104] ss:$0 sps:$4 sm:$0x77]   ;;  %v1588_v35 = vshrl.u32 %v5596_v26, 16  ;;  %vm10558_vm1 = vmmov %vm10557_vm2  ;;  %v2530_v11 = vadd.s32 56, %v7319_v13 }
 0x191   : > { %774 = vrot.lane.b32.xlu0 %v742_v60, %s5821_s19  ;;  %v1596_v46 = vshrl.u32 %v5597_v5, 16  ;;  %v1599_v54 = vshll.u32 %v5597_v5, 16  ;;  %v1537_v53 = vor.u32 %v1536_v20, %v1533_v37 }
 0x192   : > { %v1621_v52 = vpop.permute.xlu1 %1620  ;;  %v1590_v39 = vrot.slane %v1588_v35, 1 }
 0x193   : > { %v2050_v42 = vsel %vm10331_vm3, %v2017_v47, %v1621_v52  ;;  %v1566_v0 = vpop.permute.xlu0 %1565  ;;  %v7368_v47 = vrot.slane %v2971_v9, 1  ;;  %v5834_v52 = vmov 1.0   ;;  %v3971_v9 = vsub.s32 4, %v7319_v13 }
 0x194   : > { %953 = vrot.lane.b32.xlu1 %v7223_v51, %s5823_s21  ;;  %5468 = vmatprep.mubr.msk.bf16.mxu0 %vm10547_vm8, %v2050_v42  ;;  %v2019_v60 = vsel %vm1999_vm5, %v1986_v12, %v1566_v0  ;;  %vm10552_vm8 = vmmov %vm10551_vm0  ;;  %v7370_v44 = vrot.slane %v5834_v52, 1  ;;  %v3311_v42 = vsub.s32 1, %v7319_v13  ;;  %vm10554_vm0 = vcmask 1046528  }
 0x195   : > { %951 = vrot.lane.b32.xlu0 %v7048_v18, %s5823_s21  ;;  %v1226_v56 = vsel %vm10552_vm8, %v1224_v55, %v1225_v33  ;;  %v7395_v1 = vrot.slane %v5834_v52, 7  ;;  %v7407_v40 = vmul.f32 0.0, %v7368_v47  ;;  %vm3535_vm8 = vcmask 1040384  }
 0x196   : > { %v7316_v34 = vpop.permute.xlu1 %766  ;;  %10553 = vst [vmem:[#allocation5_spill] sm:$0xff] %v7370_v44  ;;  %v7393_v31 = vsel %vm10554_vm0, %v7368_v47, %v7370_v44  ;;  %v3667_v55 = vsub.s32 2, %v7319_v13 }
 0x197   : > { %v7323_v14 = vpop.permute.xlu0 %687  ;;  %10555 = vst [vmem:[#allocation6_spill] sm:$0xff] %v7395_v1  ;;  %v3243_v29 = vmul.f32 %v7400_v19, %v7407_v40  ;;  %v7433_v45 = vsel %vm3535_vm8, %v7395_v1, %v3537_v62  ;;  %v3632_v63 = vmul.f32 0.0, %v7395_v1 }
 0x198   : > { %1034 = vrot.lane.b32.xlu1 %v1003_v4, %s5820_s18  ;;  %v1541_v4 = vrot.slane %v1539_v7, 1  ;;  %v7443_v17 = vrot.slane %v7384_v23, %v3667_v55 }
 0x199   : > { %1032 = vrot.lane.b32.xlu0 %v1000_v21, %s5820_s18  ;;  %v1598_v21 = vrot.slane %v1596_v46, 1  ;;  %s5405_s18 = sshll.u32 %s5898_s28, 7  ;;  %s5836_s28 = smov [#allocation2]  }
 0x19a   : > { %v7337_v16 = vpop.permute.xlu1 %768 }
 0x19b   : > { %v1623_v22 = vpop.permute.xlu0 %1622 }
 0x19c   : > { %v2052_v50 = vsel %vm10331_vm3, %v2019_v60, %v1623_v22  ;;  %1179 = vrot.lane.b32.xlu1 %v1148_v28, %s5824_s22  ;;  %v1601_v28 = vrot.slane %v1599_v54, 2  ;;  %v2526_v60 = vadd.s32 24, %v7319_v13  ;;  %v3207_v22 = vmul.f32 0.0, %v7393_v31 }
 0x19d   : > { %1177 = vrot.lane.b32.xlu0 %v1141_v38, %s5824_s22  ;;  %5469 = vmatmul.mubr.msk.bf16.gmra.mrb[16].mxu0 %vm10550_vm4, %v2052_v50  ;;  %vm2941_vm4 = vcmp.ge.s32.totalorder %v2573_v25, 1  ;;  %v7403_v38 = vrot.slane %v7384_v23, %v3311_v42  ;;  %v1594_v50 = vor.u32 %v1593_v3, %v1590_v39  ;;  %v3633_v25 = vmul.f32 0.0, %v7433_v45 }
 0x19e   : > { %v7349_v15 = vpop.permute.xlu1 %945  ;;  %v2580_v7 = vand.u32 15, %v2526_v60  ;;  %v3244_v35 = vmul.f32 %v7400_v19, %v3207_v22  ;;  %v3901_v42 = vsub.s32 3, %v7319_v13  ;;  %v2527_v60 = vadd.s32 32, %v7319_v13 }
 0x19f   : > { %v7354_v6 = vpop.permute.xlu0 %943  ;;  %10556 = vst [vmem:[#allocation7_spill] sm:$0xff] %v7403_v38  ;;  %v3313_v41 = vmul.f32 0.0, %v7403_v38 }
 0x1a0   : > { %1260 = vrot.lane.b32.xlu1 %v1229_v24, %s5825_s23  ;;  %v1602_v24 = vor.u32 %v1601_v28, %v1598_v21  ;;  %v3669_v21 = vmul.f32 %v7443_v17, %v3632_v63 }
 0x1a1   : > { %1258 = vrot.lane.b32.xlu0 %v1226_v56, %s5825_s23  ;;  %v7424_v56 = vld [vmem:[%s10311_s2] ss:$0 sm:$0xff]  ;;  %v7462_v10 = vrot.slane %v3313_v41, 1  ;;  %s10267_s23 = scalar_lea.hbm %s10316_s7, %s5405_s18 }
 0x1a2   : > { %v7362_v30 = vpop.permute.xlu1 %1026  ;;  %v7456_v46 = vsel %vm10558_vm1, %v1594_v50, %v1602_v24  ;;  %v7503_v24 = vmul.f32 %v7443_v17, %v3633_v25  ;;  %vm10565_vm1 = vcmask 31744  }
 0x1a3   : > { %v7364_v61 = vpop.permute.xlu0 %1024 }
 0x1a4   : > { %1367 = vrot.lane.b32.xlu1 %v6859_v58, %s5826_s29 }
 0x1a5   : > { %1365 = vrot.lane.b32.xlu0 %v6824_v32, %s5826_s29  ;;  %v1544_v32 = vrot.slane %v1542_v8, 2 }
 0x1a6   : > { %v7376_v0 = vpop.permute.xlu1 %1171 }
 0x1a7   : > { %v7386_v59 = vpop.permute.xlu0 %1169  ;;  %v1545_v36 = vor.u32 %v1544_v32, %v1541_v4  ;;  %v7476_v32 = vrot.slane %v7384_v23, %v3971_v9 }
 0x1a8   : > { %1399 = vrot.lane.b32.xlu1 %v7035_v57, %s10497_s9 }
 0x1a9   : > { %1397 = vrot.lane.b32.xlu0 %v6859_v58, %s10497_s9  ;;  %v2973_v58 = vsel %vm2941_vm4, 1.0, %v10329_v43  ;;  %v7453_v48 = vsel %vm10557_vm2, %v1537_v53, %v1545_v36  ;;  %vm10559_vm4 = vmmov %vm10554_vm0  ;;  %10560 = vst [vmem:[#allocation8_spill] sm:$0xff] %v7476_v32  ;;  %vm7487_vm0 = vcmp.le.s32.totalorder %v2580_v7, 14  ;;  %s269_s9 = sand.u32 1, %s5810_s25  }
 0x1aa   : > { %v7409_v12 = vpop.permute.xlu1 %1252  ;;  %v3113_v5 = vrot.slane %v2973_v58, 1  ;;  %vm10563_vm2 = vmmov %vm10559_vm4  ;;  %s5219_s29 = scalar_lea.sflag [#allocation3], %s269_s9 }
 0x1ab   : > { %v7412_v33 = vpop.permute.xlu0 %1250 }
 0x1ac   : > { %1431 = vrot.lane.b32.xlu1 %v7048_v18, %s10498_s14  ;;  %v7473_v4 = vsel %vm10559_vm4, %v3113_v5, %v7370_v44  ;;  %v7500_v50 = vsel %vm10563_vm2, %v7370_v44, %v3113_v5  ;;  %v3736_v5 = vrot.slane %v3669_v21, 2  ;;  %vm10569_vm2 = vcmask 64512  }
 0x1ad   : > { %1429 = vrot.lane.b32.xlu0 %v7035_v57, %s10498_s14  ;;  %v7440_v57 = vld [vmem:[%s10313_s4] ss:$0 sm:$0xff]  ;;  %v3208_v21 = vmul.f32 0.0, %v7500_v50  ;;  %s5296_s14 = sshll.u32 %s269_s9, 3 }
 0x1ae   : > { %v7435_v26 = vpop.permute.xlu1 %1359  ;;  %v3276_v37 = vadd.f32 %v7440_v57, %v3243_v29  ;;  %v3277_v29 = vadd.f32 %v7440_v57, %v3244_v35  ;;  %v2529_v35 = vadd.s32 48, %v7319_v13  ;;  %s271_s19 = scalar_lea.vmem [#allocation2], %s5296_s14 }
 0x1af   : > { %v7447_v49 = vpop.permute.xlu0 %1357  ;;  %s5233_s20 = sshll.u32 %s271_s19, 4  ;;  %s10269_s20 = int_to_ptr.vmem [resolvable:$true] %s5233_s20 }
 0x1b0   : > { %v5454_v8 = vpop.f32.mrb[0].mxu0  ;;  %1463 = vrot.lane.b32.xlu1 %v7223_v51, %s5829_s13  ;;  %v3470_v9 = vadd.f32 %v7462_v10, %v3276_v37  ;;  %v7526_v37 = vsel %vm3535_vm8, %v3537_v62, %v7395_v1  ;;  %v5744_v62 = vld [vmem:[%s5930_s17 + $0x9c] sm:$0xff]  }
 0x1b1   : > { %v7460_v52 = vadd.f32 %v5454_v8, %v7424_v56  ;;  %v2171_v54 = vpop.f32.mrb[1].mxu0  ;;  %1461 = vrot.lane.b32.xlu0 %v7048_v18, %s5829_s13  ;;  %v2528_v8 = vadd.s32 40, %v7319_v13  ;;  %10564 = vst [vmem:[#allocation9_spill] sm:$0xff] %v7526_v37 }
 0x1b2   : > { %v7469_v20 = vadd.f32 %v7424_v56, %v2171_v54  ;;  %v5455_v39 = vpop.f32.mrb[2].mxu0  ;;  %v7478_v3 = vpop.permute.xlu1 %1391  ;;  %v7519_v54 = vsel %vm7487_vm0, 1.0, %v10329_v43  ;;  %v2601_v43 = vand.u32 15, %v2529_v35  ;;  %vm10568_vm0 = vmmov %vm10565_vm1 }
 0x1b3   : > { %v5365_v28 = vmul.f32 -1.442695, %v7460_v52  ;;  %v7483_v18 = vadd.f32 %v5455_v39, %v7424_v56  ;;  %v2174_v55 = vpop.f32.mrb[3].mxu0  ;;  %v7485_v58 = vpop.permute.xlu0 %1389 }
 0x1b4   : > { %v5363_v22 = vmul.f32 -1.442695, %v7469_v20  ;;  %v7494_v36 = vadd.f32 %v7424_v56, %v2174_v55  ;;  %1520 = vrot.lane.b32.xlu1 %v7235_v27, %s5830_s8 }
 0x1b5   : > { %5598 = vpow2.f32 %v5365_v28  ;;  %v5366_v41 = vmul.f32 -1.442695, %v7483_v18  ;;  %1518 = vrot.lane.b32.xlu0 %v7223_v51, %s5830_s8  ;;  %v2587_v51 = vand.u32 15, %v2527_v60  ;;  %v7533_v28 = vrot.slane %v7384_v23, %v3901_v42  ;;  %s5756_s8 = scalar_lea.vmem %s10269_s20, 128 }
 0x1b6   : > { %5600 = vpow2.f32 %v5363_v22  ;;  %v5364_v63 = vmul.f32 -1.442695, %v7494_v36  ;;  %v7511_v7 = vpop.permute.xlu1 %1423  ;;  %v7541_v60 = vadd.f32 %v7462_v10, %v3277_v29  ;;  %v2594_v42 = vand.u32 15, %v2528_v8  ;;  %p5757_p11 = scmp.ne.s32.totalorder %s10269_s20, %s5756_s8 }
 0x1b7   : > { %5602 = vpow2.f32 %v5366_v41  ;;  %v7514_v25 = vpop.permute.xlu0 %1421  ;;  %v7544_v41 = vadd.f32 %v3736_v5, %v3470_v9  ;;  %vm7549_vm4 = vcmp.ge.s32.totalorder %v2587_v51, 1  ;;  %v1658_v29 = vsel %vm10568_vm0, %v5744_v62, %v7273_v2 }
 0x1b8   : > { %5604 = vpow2.f32 %v5364_v63  ;;  %1577 = vrot.lane.b32.xlu1 %v7453_v48, %s5831_s15  ;;  %v5743_v63 = vld [vmem:[%s5930_s17 + $0xa8] sm:$0xff]   ;;  %v2531_v8 = vadd.s32 64, %v7319_v13  ;;  %v10571_v2 = vrot.slane %v7503_v24, 2  ;;  %vm10572_vm0 = vcmask 1045504   ;;  %p5758_p12 = pnand %p5757_p11, %p5915_p5 }
 0x1b9   : > { %1575 = vrot.lane.b32.xlu0 %v7235_v27, %s5831_s15  ;;  %v1660_v55 = vsel %vm10565_vm1, %v5743_v63, %v7323_v14  ;;  %v7562_v14 = vmul.f32 %v7400_v19, %v3208_v21  ;;  %vm10570_vm1 = vmmov %vm10569_vm2  ;;  %v10573_v62 = vmov 0.0  }
 0x1ba   : > { %v1456_v53 = vpop.permute.xlu1 %1455  ;;  %v1693_v9 = vsel %vm10569_vm2, %v1660_v55, %v7337_v16  ;;  %v1691_v51 = vsel %vm10570_vm1, %v1658_v29, %v7316_v34  ;;  %v7574_v16 = vsel %vm10572_vm0, %v3736_v5, %v10571_v2  ;;  %vm7586_vm2 = vcmp.le.s32.totalorder %v2594_v42, 14  ;;  %p5759_p13 = pneg %p5758_p12 }
 0x1bb   : > { %v1454_v39 = vpop.permute.xlu0 %1453  ;;  %v1726_v35 = vsel %vm1702_vm9, %v1693_v9, %v7349_v15  ;;  %v1724_v21 = vsel %vm1702_vm9, %v1691_v51, %v7354_v6  ;;  %v7584_v15 = vsel %vm7549_vm4, 1.0, %v10573_v62  ;;  %v2608_v9 = vand.u32 15, %v2530_v11 }
 0x1bc   : > { %1634 = vrot.lane.b32.xlu1 %v7456_v46, %s5832_s16  ;;  %v2532_v46 = vadd.s32 72, %v7319_v13  ;;  %v1759_v55 = vsel %vm1735_vm10, %v1726_v35, %v7362_v30  ;;  %v1757_v63 = vsel %vm1735_vm10, %v1724_v21, %v7364_v61  ;;  %vm7594_vm1 = vcmp.ge.s32.totalorder %v2601_v43, 1 }
 0x1bd   : > { %1632 = vrot.lane.b32.xlu0 %v7453_v48, %s5832_s16  ;;  %v1792_v6 = vsel %vm1768_vm11, %v1759_v55, %v7376_v0  ;;  %v1790_v42 = vsel %vm1768_vm11, %v1757_v63, %v7386_v59  ;;  %v2615_v2 = vand.u32 15, %v2531_v8  ;;  %vm3010_vm0 = vcmp.le.s32.totalorder %v2608_v9, 14 }
 0x1be   : > { %v1513_v34 = vpop.permute.xlu1 %1512  ;;  %v1825_v51 = vsel %vm1801_vm12, %v1792_v6, %v7409_v12  ;;  %v1823_v61 = vsel %vm1801_vm12, %v1790_v42, %v7412_v33  ;;  %v2622_v11 = vand.u32 15, %v2532_v46 }
 0x1bf   : > { %v5599_v5 = vpop.eup %5598  ;;  %v1511_v29 = vpop.permute.xlu0 %1510  ;;  %v1858_v0 = vsel %vm1834_vm13, %v1825_v51, %v7435_v26  ;;  %v1856_v55 = vsel %vm1834_vm13, %v1823_v61, %v7447_v49  ;;  %vm2947_vm4 = vcmp.ge.s32.totalorder %v2615_v2, 1  ;;  %v3117_v51 = vrot.slane %v7584_v15, 1 }
 0x1c0   : > { %v5601_v27 = vpop.eup %5600  ;;  %v2396_v35 = vadd.f32 1.0, %v5599_v5  ;;  %v1891_v12 = vsel %vm1867_vm14, %v1858_v0, %v7478_v3  ;;  %v1889_v33 = vsel %vm1867_vm14, %v1856_v55, %v7485_v58  ;;  %v2977_v3 = vsel %vm7594_vm1, 1.0, %v10573_v62 }
 0x1c1   : > { %v5603_v22 = vpop.eup %5602  ;;  %v2394_v43 = vadd.f32 1.0, %v5601_v27  ;;  %v1924_v26 = vsel %vm1900_vm15, %v1891_v12, %v7511_v7  ;;  %v1922_v46 = vsel %vm1900_vm15, %v1889_v33, %v7514_v25  ;;  %v2533_v27 = vadd.s32 80, %v7319_v13 }
 0x1c2   : > { %v5605_v21 = vpop.eup %5604  ;;  %5606 = vrcp.f32 %v2396_v35  ;;  %v2397_v59 = vadd.f32 1.0, %v5603_v22  ;;  %v1570_v5 = vpop.permute.xlu1 %1569  ;;  %v1957_v49 = vsel %vm1933_vm6, %v1924_v26, %v1456_v53  ;;  %v3040_v22 = vsel %vm7586_vm2, 1.0, %v10573_v62 }
 0x1c3   : > { %5608 = vrcp.f32 %v2394_v43  ;;  %v2395_v8 = vadd.f32 1.0, %v5605_v21  ;;  %v1568_v63 = vpop.permute.xlu0 %1567  ;;  %v1955_v58 = vsel %vm1933_vm6, %v1922_v46, %v1454_v39  ;;  %v1990_v6 = vsel %vm1966_vm7, %v1957_v49, %v1513_v34 }
 0x1c4   : > { %v1988_v7 = vsel %vm1966_vm7, %v1955_v58, %v1511_v29  ;;  %v2023_v25 = vsel %vm1999_vm5, %v1990_v6, %v1570_v5  ;;  %vm3012_vm2 = vcmp.le.s32.totalorder %v2622_v11, 14  ;;  %v3903_v34 = vmul.f32 %v7533_v28, %v7407_v40 }
 0x1c5   : > { %5610 = vrcp.f32 %v2395_v8  ;;  %v2021_v48 = vsel %vm1999_vm5, %v1988_v7, %v1568_v63  ;;  %v2979_v29 = vsel %vm2947_vm4, 1.0, %v10573_v62  ;;  %v10578_v35 = vsub.s32 5, %v7319_v13 }
 0x1c6   : > { %5612 = vrcp.f32 %v2397_v59  ;;  %v1627_v53 = vpop.permute.xlu1 %1626  ;;  %v10579_v61 = vsub.s32 6, %v7319_v13  ;;  %vm10580_vm1 = vcmask 457728   ;;  %v3545_v9 = vrot.slane %v3040_v22, 7 }
 0x1c7   : > { %v2056_v42 = vsel %vm10331_vm3, %v2023_v25, %v1627_v53  ;;  %v1625_v30 = vpop.permute.xlu0 %1624  ;;  %v7638_v2 = vrot.slane %v7384_v23, %v10578_v35  ;;  %v3121_v43 = vrot.slane %v2977_v3, 1  ;;  %v10582_v15 = vsub.s32 7, %v7319_v13 }
 0x1c8   : > { %v2054_v39 = vsel %vm10331_vm3, %v2021_v48, %v1625_v30  ;;  %v7643_v0 = vrot.slane %v7384_v23, %v10579_v61  ;;  %vm10581_vm3 = vmmov %vm10580_vm1  ;;  %v3042_v21 = vsel %vm3010_vm0, 1.0, %v10573_v62  ;;  %v7656_v55 = vsel %vm3012_vm2, 1.0, %v10573_v62 }
 0x1c9   : > { %5472 = vmatprep.mubr.msk.bf16.mxu0 %vm10580_vm1, %v2054_v39  ;;  %v7652_v11 = vrot.slane %v7384_v23, %v10582_v15  ;;  %10583 = vst [vmem:[#allocation10_spill] sm:$0xff] %v7656_v55  ;;  %v2629_v59 = vand.u32 15, %v2533_v27  ;;  %v3278_v5 = vadd.f32 %v7440_v57, %v7562_v14  ;;  %v10584_v8 = vrot.slane %v7519_v54, 7 }
 0x1ca   : > { %5473 = vmatmul.mubr.msk.bf16.gmra.mrb[20].mxu0 %vm10581_vm3, %v2056_v42  ;;  %v7647_v40 = vpop.permute.xlu1 %691  ;;  %v3835_v23 = vadd.f32 %v7574_v16, %v7541_v60  ;;  %v3125_v26 = vrot.slane %v2979_v29, 1  ;;  %v7671_v46 = vadd.f32 %v3903_v34, %v7544_v41  ;;  %vm10586_vm3 = vcmask 1046528  }
 0x1cb   : > { %v7658_v12 = vpop.permute.xlu0 %689  ;;  %v7666_v33 = vsel %vm3535_vm8, %v7395_v1, %v10584_v8  ;;  %v7675_v49 = vsel %vm10586_vm3, %v7370_v44, %v3117_v51  ;;  %vm10587_vm4 = vmmov %vm10586_vm3  ;;  %v10588_v22 = vmov %v10584_v8  ;;  %v7689_v16 = vsel %vm3535_vm8, %v7395_v1, %v3545_v9 }
 0x1cc   : > { %10585 = vst [vmem:[#allocation11_spill] sm:$0xff] %v7666_v33  ;;  %v5607_v63 = vpop.eup %5606  ;;  %v7679_v14 = vsel %vm10587_vm4, %v3117_v51, %v7370_v44  ;;  %v7685_v3 = vsel %vm3535_vm8, %v10588_v22, %v7395_v1  ;;  %vm10589_vm0 = vmmov %vm10586_vm3  ;;  %v3549_v58 = vrot.slane %v3042_v21, 7  ;;  %v10332_v6 = vrot.slane %v7656_v55, 7 }
 0x1cd   : > { %v5609_v60 = vpop.eup %5608  ;;  %v7693_v41 = vsel %vm10589_vm0, %v7370_v44, %v3121_v43  ;;  %v7697_v7 = vmul.f32 %v5607_v63, %v7460_v52  ;;  %vm10590_vm2 = vmmov %vm10589_vm0  ;;  %vm2949_vm1 = vcmp.ge.s32.totalorder %v2629_v59, 1  ;;  %v7710_v42 = vsel %vm3535_vm8, %v3545_v9, %v7395_v1 }
 0x1ce   : > { %v2490_v54 = vmul.f32 %v5609_v60, %v7469_v20  ;;  %v7700_v25 = vpop.permute.xlu1 %772  ;;  %v7704_v53 = vsel %vm10590_vm2, %v3121_v43, %v7370_v44  ;;  %10592 = vst [vmem:[#allocation13_spill] sm:$0xff] %v7710_v42  ;;  %v7714_v52 = vsel %vm3535_vm8, %v7395_v1, %v3549_v58  ;;  %vm10594_vm3 = vmmov %vm10589_vm0  ;;  %v7733_v9 = vsel %vm3535_vm8, %v3549_v58, %v7395_v1 }
 0x1cf   : > { %10591 = vst [vmem:[#allocation12_spill] sm:$0xff] %v7704_v53  ;;  %v5611_v27 = vpop.eup %5610  ;;  %v7706_v48 = vpop.permute.xlu0 %770  ;;  %10593 = vst [vmem:[#allocation14_spill] sm:$0xff] %v7714_v52  ;;  %v7718_v20 = vsel %vm10594_vm3, %v7370_v44, %v3125_v26  ;;  %v7739_v43 = vsel %vm3535_vm8, %v7395_v1, %v10332_v6  ;;  %v7742_v15 = vsel %vm2949_vm1, 1.0, %v10573_v62  ;;  %vm10601_vm2 = vcmask 1045504  }
 0x1d0   : > { %10595 = vst [vmem:[#allocation15_spill] sm:$0xff] %v7718_v20  ;;  %vm10596_vm4 = vmmov %vm10589_vm0  ;;  %v5613_v39 = vpop.eup %5612  ;;  %v3209_v34 = vmul.f32 %v7473_v4, %v2490_v54  ;;  %v3314_v51 = vmul.f32 %v7403_v38, %v2490_v54  ;;  %v3634_v29 = vmul.f32 %v7526_v37, %v2490_v54  ;;  %v3867_v35 = vmul.f32 %v7393_v31, %v2490_v54 }
 0x1d1   : > { %v7722_v30 = vsel %vm10596_vm4, %v3125_v26, %v7370_v44  ;;  %v7729_v61 = vmul.f32 %v5611_v27, %v7494_v36  ;;  %10598 = vst [vmem:[#allocation17_spill] sm:$0xff] %v7733_v9  ;;  %10599 = vst [vmem:[#allocation18_spill] sm:$0xff] %v7739_v43  ;;  %v3869_v36 = vmul.f32 %v7473_v4, %v7697_v7 }
 0x1d2   : > { %10597 = vst [vmem:[#allocation16_spill] sm:$0xff] %v7722_v30  ;;  %v3246_v21 = vmul.f32 %v7400_v19, %v3209_v34  ;;  %v3377_v59 = vrot.slane %v3314_v51, 1  ;;  %v3671_v8 = vmul.f32 %v7443_v17, %v3634_v29  ;;  %v7748_v26 = vpop.permute.xlu1 %949  ;;  %v3973_v63 = vmul.f32 %v7476_v32, %v2490_v54  ;;  %vm10602_vm1 = vmmov %vm10589_vm0 }
 0x1d3   : > { %v7752_v22 = vmul.f32 %v5613_v39, %v7483_v18  ;;  %v7756_v60 = vmul.f32 %v7403_v38, %v7729_v61  ;;  %v7758_v58 = vpop.permute.xlu0 %947  ;;  %v3635_v27 = vmul.f32 %v7666_v33, %v7729_v61  ;;  %v3904_v6 = vmul.f32 %v7533_v28, %v3867_v35  ;;  %vm10603_vm3 = vmmov %vm10601_vm2 }
 0x1d4   : > { %v3279_v34 = vadd.f32 %v7440_v57, %v3246_v21  ;;  %v3378_v51 = vsel %vm10589_vm0, %v7462_v10, %v3377_v59  ;;  %v3739_v29 = vrot.slane %v3671_v8, 2  ;;  %v3868_v43 = vmul.f32 %v7500_v50, %v7729_v61  ;;  %vm10604_vm4 = vmmov %vm10589_vm0 }
 0x1d5   : > { %v10342_v18 = vrot.slane %v7756_v60, 1  ;;  %v3472_v39 = vadd.f32 %v3378_v51, %v3278_v5  ;;  %v7768_v55 = vmul.f32 %v7443_v17, %v3635_v27  ;;  %v4166_v9 = vmul.f32 %v7395_v1, %v2490_v54 }
 0x1d6   : > { %v4168_v21 = vmul.f32 %v7526_v37, %v7697_v7  ;;  %v7775_v30 = vpop.permute.xlu1 %1030  ;;  %v10600_v10 = vrot.slane %v7503_v24, 2  ;;  %v3974_v5 = vmul.f32 %v7476_v32, %v7729_v61  ;;  %v4037_v8 = vrot.slane %v3973_v63, 1 }
 0x1d7   : > { %v7782_v27 = vpop.permute.xlu0 %1028  ;;  %v3380_v51 = vsel %vm10602_vm1, %v3377_v59, %v10342_v18  ;;  %v10343_v54 = vrot.slane %v7768_v55, 2  ;;  %v3905_v42 = vmul.f32 %v7533_v28, %v3868_v43  ;;  %v3937_v53 = vadd.f32 %v3904_v6, %v3835_v23  ;;  %vm10608_vm1 = vmmov %vm10589_vm0 }
 0x1d8   : > { %v3740_v35 = vsel %vm10601_vm2, %v10600_v10, %v3739_v29  ;;  %v3473_v52 = vadd.f32 %v3380_v51, %v3279_v34  ;;  %v3975_v24 = vmul.f32 %v7476_v32, %v7697_v7  ;;  %v3906_v10 = vmul.f32 %v7533_v28, %v3869_v36  ;;  %vm10605_vm2 = vmmov %vm10589_vm0 }
 0x1d9   : > { %v3836_v20 = vadd.f32 %v3740_v35, %v3472_v39  ;;  %v3742_v63 = vsel %vm10603_vm3, %v3739_v29, %v10343_v54  ;;  %v7797_v37 = vmul.f32 %v7476_v32, %v7752_v22  ;;  %v4038_v59 = vrot.slane %v3974_v5, 1 }
 0x1da   : > { %v7799_v18 = vpop.permute.xlu1 %1175  ;;  %v3837_v34 = vadd.f32 %v3742_v63, %v3473_v52  ;;  %v4040_v43 = vrot.slane %v3975_v24, 1  ;;  %v4167_v23 = vmul.f32 %v7433_v45, %v7729_v61  ;;  %v4169_v36 = vmul.f32 %v7666_v33, %v7752_v22 }
 0x1db   : > { %v3938_v39 = vadd.f32 %v3905_v42, %v3836_v20  ;;  %v7803_v6 = vpop.permute.xlu0 %1173  ;;  %v4039_v35 = vsel %vm10604_vm4, %v4037_v8, %v4038_v59  ;;  %v10347_v29 = vrot.slane %v7797_v37, 1  ;;  %v4133_v42 = vadd.f32 %v4037_v8, %v7671_v46 }
 0x1dc   : > { %v3939_v5 = vadd.f32 %v3906_v10, %v3837_v34  ;;  %v4041_v54 = vsel %vm10589_vm0, %v4038_v59, %v4040_v43  ;;  %v4134_v52 = vadd.f32 %v4039_v35, %v3937_v53  ;;  %v4203_v63 = vmul.f32 %v7638_v2, %v4166_v9 }
 0x1dd   : > { %v4043_v20 = vsel %vm10605_vm2, %v4040_v43, %v10347_v29  ;;  %v4135_v24 = vadd.f32 %v4041_v54, %v3938_v39  ;;  %v4204_v32 = vmul.f32 %v7638_v2, %v4167_v23  ;;  %v4205_v10 = vmul.f32 %v7638_v2, %v4168_v21  ;;  %v5745_v21 = vld [vmem:[%s5930_s17 + $0xc0] sm:$0xff]  }
 0x1de   : > { %v7817_v33 = vpop.permute.xlu1 %1256  ;;  %v4136_v51 = vadd.f32 %v4043_v20, %v3939_v5  ;;  %v7821_v59 = vmul.f32 %v7638_v2, %v4169_v36  ;;  %v4400_v46 = vmul.f32 %v7368_v47, %v7729_v61  ;;  %v4269_v8 = vrot.slane %v4203_v63, 2 }
 0x1df   : > { %v7825_v53 = vpop.permute.xlu0 %1254  ;;  %v4270_v54 = vrot.slane %v4204_v32, 2  ;;  %v4401_v9 = vmul.f32 %v7393_v31, %v7697_v7  ;;  %v10607_v34 = vrot.slane %v7742_v15, 1  ;;  %vm10610_vm3 = vcmask 31744   ;;  %v5746_v32 = vld [vmem:[%s5930_s17 + $0xb4] sm:$0xff]  }
 0x1e0   : > { %10606 = vst [vmem:[#allocation19_spill] sm:$0xff] %v7821_v59  ;;  %v1664_v43 = vsel %vm10610_vm3, %v5745_v21, %v7647_v40  ;;  %v4272_v23 = vrot.slane %v4205_v10, 2  ;;  %v10349_v47 = vrot.slane %v7821_v59, 2  ;;  %v4402_v35 = vmul.f32 %v7500_v50, %v7752_v22  ;;  %vm10611_vm4 = vmmov %vm10610_vm3 }
 0x1e1   : > { %v7833_v39 = vsel %vm10608_vm1, %v7370_v44, %v10607_v34  ;;  %v1662_v31 = vsel %vm10611_vm4, %v5746_v32, %v7658_v12  ;;  %vm10612_vm0 = vcmask 1045504   ;;  %v4367_v5 = vadd.f32 %v4269_v8, %v4133_v42 }
 0x1e2   : > { %10609 = vst [vmem:[#allocation20_spill] sm:$0xff] %v7833_v39  ;;  %v4271_v36 = vsel %vm10612_vm0, %v4269_v8, %v4270_v54  ;;  %v4437_v20 = vmul.f32 %v7643_v0, %v4400_v46  ;;  %v1364_v63 = vpop.permute.xlu1 %1363  ;;  %vm10613_vm2 = vmmov %vm10612_vm0  ;;  %v4438_v21 = vmul.f32 %v7643_v0, %v4401_v9  ;;  %vm10615_vm3 = vcmask 64512  }
 0x1e3   : > { %v4273_v34 = vsel %vm10613_vm2, %v4270_v54, %v4272_v23  ;;  %vm10614_vm1 = vmmov %vm10612_vm0  ;;  %v4368_v10 = vadd.f32 %v4271_v36, %v4134_v52  ;;  %v1697_v50 = vsel %vm10615_vm3, %v1664_v43, %v7700_v25  ;;  %v1362_v32 = vpop.permute.xlu0 %1361  ;;  %v2539_v42 = vadd.s32 128, %v7319_v13 }
 0x1e4   : > { %v4275_v40 = vsel %vm10614_vm1, %v4272_v23, %v10349_v47  ;;  %vm10616_vm4 = vmmov %vm10615_vm3  ;;  %v4369_v46 = vadd.f32 %v4273_v34, %v4135_v24  ;;  %v5458_v8 = vpop.f32.mrb[4].mxu0  ;;  %v4439_v54 = vmul.f32 %v7643_v0, %v4402_v35  ;;  %v4470_v39 = vadd.f32 %v4437_v20, %v4367_v5 }
 0x1e5   : > { %v1695_v12 = vsel %vm10616_vm4, %v1662_v31, %v7706_v48  ;;  %v7856_v29 = vadd.f32 %v4275_v40, %v4136_v51  ;;  %v7859_v23 = vadd.f32 %v4438_v21, %v4368_v10  ;;  %v7862_v52 = vadd.f32 %v5458_v8, %v7424_v56  ;;  %v2187_v9 = vpop.f32.mrb[5].mxu0 }
 0x1e6   : > { %v2538_v25 = vadd.s32 120, %v7319_v13  ;;  %v2540_v48 = vadd.s32 136, %v7319_v13  ;;  %v2541_v43 = vadd.s32 144, %v7319_v13  ;;  %v1730_v24 = vsel %vm1702_vm9, %v1697_v50, %v7748_v26  ;;  %v5459_v35 = vpop.f32.mrb[6].mxu0  ;;  %v1396_v31 = vpop.permute.xlu1 %1395 }
 0x1e7   : > { %v7870_v51 = vadd.f32 %v7424_v56, %v2187_v9  ;;  %v2671_v36 = vand.u32 15, %v2539_v42  ;;  %v7872_v5 = vadd.f32 %v4439_v54, %v4369_v46  ;;  %v1728_v20 = vsel %vm1702_vm9, %v1695_v12, %v7758_v58  ;;  %v2190_v26 = vpop.f32.mrb[7].mxu0  ;;  %v1394_v21 = vpop.permute.xlu0 %1393 }
 0x1e8   : > { %v1763_v34 = vsel %vm1735_vm10, %v1730_v24, %v7775_v30  ;;  %v5369_v40 = vmul.f32 -1.442695, %v7862_v52  ;;  %v7880_v10 = vadd.f32 %v5459_v35, %v7424_v56  ;;  %v1761_v50 = vsel %vm1735_vm10, %v1728_v20, %v7782_v27  ;;  %v7909_v20 = vld [vmem:[%s10312_s3 + $0x8] ss:$0 sm:$0xff] }
 0x1e9   : > { %v5367_v42 = vmul.f32 -1.442695, %v7870_v51  ;;  %v7886_v46 = vadd.f32 %v7424_v56, %v2190_v26  ;;  %v2685_v8 = vand.u32 15, %v2541_v43  ;;  %v2664_v30 = vand.u32 15, %v2538_v25 }
 0x1ea   : > { %5614 = vpow2.f32 %v5369_v40  ;;  %v5370_v58 = vmul.f32 -1.442695, %v7880_v10  ;;  %v2678_v12 = vand.u32 15, %v2540_v48  ;;  %v1796_v54 = vsel %vm1768_vm11, %v1763_v34, %v7799_v18  ;;  %v1428_v24 = vpop.permute.xlu1 %1427 }
 0x1eb   : > { %5616 = vpow2.f32 %v5367_v42  ;;  %v5368_v9 = vmul.f32 -1.442695, %v7886_v46  ;;  %vm2955_vm0 = vcmp.ge.s32.totalorder %v2671_v36, 1  ;;  %v1794_v27 = vsel %vm1768_vm11, %v1761_v50, %v7803_v6  ;;  %v1426_v43 = vpop.permute.xlu0 %1425 }
 0x1ec   : > { %v1829_v56 = vsel %vm1801_vm12, %v1796_v54, %v7817_v33  ;;  %5618 = vpow2.f32 %v5370_v58  ;;  %v4507_v25 = vmul.f32 %v7652_v11, %v7697_v7  ;;  %v1827_v48 = vsel %vm1801_vm12, %v1794_v27, %v7825_v53 }
 0x1ed   : > { %v1862_v18 = vsel %vm1834_vm13, %v1829_v56, %v1364_v63  ;;  %5620 = vpow2.f32 %v5368_v9  ;;  %vm2957_vm2 = vcmp.ge.s32.totalorder %v2685_v8, 1  ;;  %v1860_v35 = vsel %vm1834_vm13, %v1827_v48, %v1362_v32 }
 0x1ee   : > { %v7903_v36 = vsel %vm2955_vm0, 1.0, %v10573_v62  ;;  %vm3018_vm1 = vcmp.le.s32.totalorder %v2664_v30, 14  ;;  %vm3020_vm3 = vcmp.le.s32.totalorder %v2678_v12, 14  ;;  %v1895_v33 = vsel %vm1867_vm14, %v1862_v18, %v1396_v31  ;;  %v1460_v6 = vpop.permute.xlu1 %1459 }
 0x1ef   : > { %v7913_v53 = vmul.f32 %v7652_v11, %v7752_v22  ;;  %v4697_v63 = vmul.f32 %v7395_v1, %v7697_v7  ;;  %v4698_v32 = vmul.f32 %v7433_v45, %v7752_v22  ;;  %v1893_v34 = vsel %vm1867_vm14, %v1860_v35, %v1394_v21  ;;  %v1458_v40 = vpop.permute.xlu0 %1457 }
 0x1f0   : > { %v1928_v31 = vsel %vm1900_vm15, %v1895_v33, %v1428_v24  ;;  %v7922_v26 = vsel %vm2957_vm2, 1.0, %v10573_v62  ;;  %v4569_v50 = vrot.slane %v4507_v25, 1  ;;  %v1926_v42 = vsel %vm1900_vm15, %v1893_v34, %v1426_v43 }
 0x1f1   : > { %v7926_v8 = vsel %vm3018_vm1, 1.0, %v10573_v62  ;;  %v7929_v58 = vsel %vm3020_vm3, 1.0, %v10573_v62  ;;  %v10350_v45 = vrot.slane %v7913_v53, 1  ;;  %v4733_v12 = vmul.f32 %v7909_v20, %v4697_v63 }
 0x1f2   : > { %v4664_v21 = vadd.f32 %v4569_v50, %v4470_v39  ;;  %v7935_v54 = vmul.f32 %v7909_v20, %v4698_v32  ;;  %v1961_v9 = vsel %vm1933_vm6, %v1928_v31, %v1460_v6  ;;  %v1959_v24 = vsel %vm1933_vm6, %v1926_v42, %v1458_v40  ;;  %v1517_v27 = vpop.permute.xlu1 %1516 }
 0x1f3   : > { %v3210_v56 = vmul.f32 %v7675_v49, %v7729_v61  ;;  %v3211_v43 = vmul.f32 %v7679_v14, %v7697_v7  ;;  %v1515_v48 = vpop.permute.xlu0 %1514  ;;  %vm10617_vm4 = vcmask 1046528   ;;  %v4799_v18 = vrot.slane %v4733_v12, 2 }
 0x1f4   : > { %v5615_v25 = vpop.eup %5614  ;;  %v4571_v39 = vsel %vm10617_vm4, %v4569_v50, %v10350_v45  ;;  %v10354_v35 = vrot.slane %v7935_v54, 2  ;;  %v3316_v33 = vmul.f32 %v7403_v38, %v7697_v7  ;;  %v7953_v34 = vmul.f32 %v7403_v38, %v7752_v22  ;;  %vm10620_vm2 = vmmov %vm10617_vm4 }
 0x1f5   : > { %v5617_v6 = vpop.eup %5616  ;;  %v2400_v63 = vadd.f32 1.0, %v5615_v25  ;;  %v4665_v32 = vadd.f32 %v4571_v39, %v7859_v23  ;;  %v3247_v61 = vmul.f32 %v7400_v19, %v3210_v56  ;;  %vm10618_vm0 = vcmask 1045504   ;;  %vm10622_vm3 = vmmov %vm10620_vm2 }
 0x1f6   : > { %v5619_v31 = vpop.eup %5618  ;;  %v2398_v40 = vadd.f32 1.0, %v5617_v6  ;;  %v4801_v50 = vsel %vm10618_vm0, %v4799_v18, %v10354_v35  ;;  %v4897_v42 = vadd.f32 %v4799_v18, %v4664_v21  ;;  %v3248_v12 = vmul.f32 %v7400_v19, %v3211_v43  ;;  %v1574_v56 = vpop.permute.xlu1 %1573 }
 0x1f7   : > { %v5621_v47 = vpop.eup %5620  ;;  %5622 = vrcp.f32 %v2400_v63  ;;  %v1994_v25 = vsel %vm1966_vm7, %v1961_v9, %v1517_v27  ;;  %v1992_v23 = vsel %vm1966_vm7, %v1959_v24, %v1515_v48  ;;  %v4898_v39 = vadd.f32 %v4801_v50, %v4665_v32  ;;  %v1572_v38 = vpop.permute.xlu0 %1571 }
 0x1f8   : > { %5624 = vrcp.f32 %v2398_v40  ;;  %v2401_v45 = vadd.f32 1.0, %v5619_v31  ;;  %v2399_v30 = vadd.f32 1.0, %v5621_v47  ;;  %v3280_v6 = vadd.f32 %v7440_v57, %v3247_v61 }
 0x1f9   : > { %v2027_v59 = vsel %vm1999_vm5, %v1994_v25, %v1574_v56  ;;  %v4931_v35 = vpack.c.bf16 %v4898_v39, %v4897_v42  ;;  %v3281_v21 = vadd.f32 %v7440_v57, %v3248_v12  ;;  %v3381_v43 = vrot.slane %v3316_v33, 1 }
 0x1fa   : > { %5626 = vrcp.f32 %v2399_v30  ;;  %v10355_v18 = vrot.slane %v7953_v34, 1  ;;  %v3636_v9 = vmul.f32 %v7685_v3, %v7697_v7  ;;  %v3637_v24 = vmul.f32 %v7689_v16, %v7752_v22  ;;  %v1631_v27 = vpop.permute.xlu1 %1630 }
 0x1fb   : > { %v2025_v47 = vsel %vm1999_vm5, %v1992_v23, %v1572_v38  ;;  %v4956_v48 = vshrl.u32 %v4931_v35, 16  ;;  %v4959_v63 = vshll.u32 %v4931_v35, 16  ;;  %v10619_v32 = vrot.slane %v7756_v60, 1  ;;  %v1629_v30 = vpop.permute.xlu0 %1628 }
 0x1fc   : > { %vm10621_vm1 = vcmask 424960   ;;  %v3384_v31 = vsel %vm10622_vm3, %v3381_v43, %v10355_v18  ;;  %v3673_v40 = vmul.f32 %v7443_v17, %v3636_v9  ;;  %v10358_v38 = vrot.slane %v7922_v26, 1 }
 0x1fd   : > { %v3382_v61 = vsel %vm10620_vm2, %v10619_v32, %v3381_v43  ;;  %v2060_v33 = vsel %vm10621_vm1, %v2027_v59, %v1631_v27  ;;  %vm10623_vm4 = vmmov %vm10621_vm1  ;;  %v3475_v42 = vadd.f32 %v3384_v31, %v3281_v21  ;;  %v3870_v60 = vmul.f32 %v7675_v49, %v7752_v22 }
 0x1fe   : > { %v3474_v7 = vadd.f32 %v3382_v61, %v3280_v6  ;;  %v2058_v50 = vsel %vm10623_vm4, %v2025_v47, %v1629_v30  ;;  %vm10624_vm0 = vcmask 457728   ;;  %v3565_v59 = vrot.slane %v7926_v8, 7  ;;  %v696_v23 = vpop.permute.xlu1 %695  ;;  %vm10627_vm1 = vmmov %vm10622_vm3 }
 0x1ff   : > { %5476 = vmatprep.mubr.msk.bf16.mxu0 %vm10624_vm0, %v2058_v50  ;;  %v10357_v35 = vrot.slane %v7929_v58, 7  ;;  %v7986_v12 = vmul.f32 %v7443_v17, %v3637_v24  ;;  %v3743_v25 = vrot.slane %v3673_v40, 2  ;;  %vm10625_vm2 = vmmov %vm10624_vm0  ;;  %v10626_v56 = vrot.slane %v7903_v36, 1  ;;  %v694_v9 = vpop.permute.xlu0 %693 }
 0x200   : > { %5477 = vmatmul.mubr.msk.bf16.gmra.mrb[24].mxu0 %vm10625_vm2, %v2060_v33  ;;  %vm10630_vm3 = vmmov %vm10627_vm1  ;;  %v8001_v21 = vrot.slane %v4956_v48, 3  ;;  %v8003_v43 = vrot.slane %v4959_v63, 4  ;;  %5628 = vrcp.f32 %v2401_v45  ;;  %v10632_v24 = vrot.slane %v7768_v55, 2 }
 0x201   : > { %v7993_v39 = vsel %vm10627_vm1, %v7370_v44, %v10626_v56  ;;  %v10629_v6 = vmov %v10626_v56  ;;  %vm10633_vm4 = vcmask 1045504   ;;  %v10356_v27 = vrot.slane %v7986_v12, 2  ;;  %v5623_v61 = vpop.eup %5622  ;;  %vm10634_vm0 = vmmov %vm10627_vm1 }
 0x202   : > { %10628 = vst [vmem:[#allocation21_spill] sm:$0xff] %v7993_v39  ;;  %v7999_v8 = vsel %vm10630_vm3, %v10629_v6, %v7370_v44  ;;  %v3744_v47 = vsel %vm10633_vm4, %v10632_v24, %v3743_v25  ;;  %v3212_v32 = vmul.f32 %v7693_v41, %v7752_v22  ;;  %v8015_v36 = vsel %vm10634_vm0, %v7370_v44, %v10358_v38  ;;  %v5625_v63 = vpop.eup %5624  ;;  %vm10639_vm2 = vmmov %vm10633_vm4  ;;  %v777_v40 = vpop.permute.xlu1 %776  ;;  %v5747_v6 = vld [vmem:[%s5930_s17 + $0xd8] sm:$0xff]  }
 0x203   : > { %10631 = vst [vmem:[#allocation22_spill] sm:$0xff] %v7999_v8  ;;  %10635 = vst [vmem:[#allocation23_spill] sm:$0xff] %v8015_v36  ;;  %v8019_v45 = vsel %vm3535_vm8, %v7395_v1, %v3565_v59  ;;  %v3838_v55 = vadd.f32 %v3744_v47, %v3474_v7  ;;  %v3907_v48 = vmul.f32 %v7533_v28, %v3870_v60  ;;  %v8036_v31 = vadd.s32 88, %v7319_v13  ;;  %v775_v47 = vpop.permute.xlu0 %774 }
 0x204   : > { %10636 = vst [vmem:[#allocation24_spill] sm:$0xff] %v8019_v45  ;;  %v8024_v33 = vsel %vm3535_vm8, %v3565_v59, %v7395_v1  ;;  %v8030_v22 = vsel %vm3535_vm8, %v7395_v1, %v10357_v35  ;;  %v3746_v30 = vsel %vm10639_vm2, %v3743_v25, %v10356_v27  ;;  %v8039_v7 = vmul.f32 %v5625_v63, %v7870_v51  ;;  %v5627_v56 = vpop.eup %5626  ;;  %vm10643_vm3 = vmmov %vm10634_vm0  ;;  %v10649_v35 = vld [vmem:[#allocation11_spill] sm:$0xff] }
 0x205   : > { %10637 = vst [vmem:[#allocation25_spill] sm:$0xff] %v8024_v33  ;;  %10638 = vst [vmem:[#allocation26_spill] sm:$0xff] %v8030_v22  ;;  %v3839_v60 = vadd.f32 %v3746_v30, %v3475_v42  ;;  %v3940_v59 = vadd.f32 %v3907_v48, %v3838_v55  ;;  %vm10641_vm1 = vcmask 31744   ;;  %v3249_v18 = vmul.f32 %v7400_v19, %v3212_v32  ;;  %v5748_v42 = vld [vmem:[%s5930_s17 + $0xcc] sm:$0xff]   ;;  %s5760_s17 = sshll.u32 %s5836_s28, 4  ;;  %s5761_s17 = int_to_ptr.vmem [resolvable:$false] %s5760_s17 }
 0x206   : > { %10640 = vst [vmem:[#allocation27_spill] sm:$0xff] %v8036_v31  ;;  %v1668_v24 = vsel %vm10641_vm1, %v5747_v6, %v696_v23  ;;  %v10642_v25 = vrot.slane %v7742_v15, 1  ;;  %v8053_v51 = vadd.s32 96, %v7319_v13  ;;  %v8056_v63 = vmul.f32 %v5627_v56, %v7886_v46  ;;  %vm10646_vm4 = vmmov %vm10641_vm1  ;;  %v10647_v15 = vld [vmem:[#allocation9_spill] sm:$0xff]  ;;  %v10648_v6 = vld [vmem:[#allocation8_spill] sm:$0xff]  ;;  %v954_v56 = vpop.permute.xlu1 %953  ;;  %s5762_s13 = scalar_lea.vmem %s5761_s17, 256  ;;  %p5763_p0 = scmp.lt.s32.totalorder %s10269_s20, %s5761_s17 }
 0x207   : > { %v1666_v55 = vsel %vm10646_vm4, %v5748_v42, %v694_v9  ;;  %v4403_v23 = vmul.f32 %v7473_v4, %v8039_v7  ;;  %v4509_v32 = vmul.f32 %v7652_v11, %v8039_v7  ;;  %v4699_v48 = vmul.f32 %v10647_v15, %v8039_v7  ;;  %v952_v15 = vpop.permute.xlu0 %951  ;;  %vm10652_vm2 = vmmov %vm10634_vm0  ;;  %p5764_p1 = scmp.lt.s32.totalorder %s5762_s13, %s5756_s8 }
 0x208   : > { %v8050_v27 = vsel %vm10643_vm3, %v10642_v25, %v7370_v44  ;;  %10645 = vst [vmem:[#allocation29_spill] sm:$0xff] %v8053_v51  ;;  %v3871_v30 = vmul.f32 %v7679_v14, %v8039_v7  ;;  %v3977_v25 = vmul.f32 %v10648_v6, %v8039_v7  ;;  %v8074_v4 = vmul.f32 %v7652_v11, %v8056_v63  ;;  %vm10657_vm4 = vmmov %vm10634_vm0 }
 0x209   : > { %10644 = vst [vmem:[#allocation28_spill] sm:$0xff] %v8050_v27  ;;  %v4440_v9 = vmul.f32 %v7643_v0, %v4403_v23  ;;  %v4572_v42 = vrot.slane %v4509_v32, 1  ;;  %v4700_v38 = vmul.f32 %v10649_v35, %v8056_v63  ;;  %v2542_v50 = vadd.s32 152, %v7319_v13  ;;  %p5765_p2 = por %p5764_p1, %p5763_p0 }
 0x20a   : > { %v4735_v36 = vmul.f32 %v7909_v20, %v4699_v48  ;;  %v3908_v22 = vmul.f32 %v7533_v28, %v3871_v30  ;;  %v8082_v46 = vadd.s32 104, %v7319_v13  ;;  %v8085_v23 = vmul.f32 %v5623_v61, %v7862_v52  ;;  %v5629_v33 = vpop.eup %5628  ;;  %v1035_v52 = vpop.permute.xlu1 %1034 }
 0x20b   : > { %v4473_v45 = vadd.f32 %v4440_v9, %v7856_v29  ;;  %v10651_v32 = vrot.slane %v7913_v53, 1  ;;  %v4574_v35 = vrot.slane %v8074_v4, 1  ;;  %v8094_v48 = vmul.f32 %v7909_v20, %v4700_v38  ;;  %p5766_p3 = pnand %p5765_p2, %p5759_p13 }
 0x20c   : > { %10650 = vst [vmem:[#allocation9_spill] sm:$0xff] %v8082_v46  ;;  %v4802_v30 = vrot.slane %v4735_v36, 2  ;;  %v4170_v46 = vmul.f32 %v7685_v3, %v8039_v7  ;;  %v3941_v53 = vadd.f32 %v3908_v22, %v3839_v60  ;;  %v8103_v61 = vmul.f32 %v10648_v6, %v8056_v63 }
 0x20d   : > { %v4573_v39 = vsel %vm10634_vm0, %v10651_v32, %v4572_v42  ;;  %v4575_v29 = vsel %vm10652_vm2, %v4572_v42, %v4574_v35  ;;  %v4044_v9 = vrot.slane %v3977_v25, 1  ;;  %v1033_v32 = vpop.permute.xlu0 %1032  ;;  %v10653_v38 = vrot.slane %v7935_v54, 2 }
 0x20e   : > { %v4666_v8 = vadd.f32 %v4573_v39, %v7872_v5  ;;  %v2692_v5 = vand.u32 15, %v2542_v50  ;;  %v4667_v39 = vadd.f32 %v4575_v29, %v4473_v45  ;;  %vm10654_vm1 = vcmask 1045504  }
 0x20f   : > { %v4803_v36 = vsel %vm10654_vm1, %v10653_v38, %v4802_v30  ;;  %v8109_v27 = vadd.f32 %v7440_v57, %v3249_v18  ;;  %v8112_v31 = vmul.f32 %v5629_v33, %v7880_v10  ;;  %v10369_v22 = vrot.slane %v8094_v48, 2  ;;  %v1180_v18 = vpop.permute.xlu1 %1179  ;;  %vm10658_vm2 = vmmov %vm10654_vm1 }
 0x210   : > { %v4899_v60 = vadd.f32 %v4803_v36, %v4666_v8  ;;  %vm10655_vm3 = vcmask 64512   ;;  %v10656_v50 = vrot.slane %v7797_v37, 1  ;;  %v10368_v54 = vrot.slane %v8103_v61, 1 }
 0x211   : > { %v1701_v25 = vsel %vm10655_vm3, %v1668_v24, %v777_v40  ;;  %v4171_v57 = vmul.f32 %v7689_v16, %v8056_v63  ;;  %vm4954_vm0 = vsmask.f32 4352  ;;  %v4805_v10 = vsel %vm10658_vm2, %v4802_v30, %v10369_v22  ;;  %v8129_v37 = vpop.permute.xlu0 %1177 }
 0x212   : > { %v4045_v45 = vsel %vm10657_vm4, %v10656_v50, %v4044_v9  ;;  %v4207_v33 = vmul.f32 %v7638_v2, %v4170_v46  ;;  %v4405_v40 = vmul.f32 %v7679_v14, %v8085_v23  ;;  %vm3022_vm1 = vcmp.le.s32.totalorder %v2692_v5, 14 }
 0x213   : > { %v4137_v8 = vadd.f32 %v4045_v45, %v3940_v59  ;;  %v4900_v24 = vadd.f32 %v4805_v10, %v4667_v39  ;;  %v4404_v29 = vmul.f32 %v7675_v49, %v8056_v63  ;;  %v4511_v38 = vmul.f32 %v7652_v11, %v8085_v23  ;;  %v8144_v49 = vpop.permute.xlu1 %1260 }
 0x214   : > { %v1699_v36 = vsel %vm10655_vm3, %v1666_v55, %v775_v47  ;;  %v4047_v59 = vsel %vm10657_vm4, %v4044_v9, %v10368_v54  ;;  %v8140_v46 = vmul.f32 %v7638_v2, %v4171_v57  ;;  %v4276_v14 = vrot.slane %v4207_v33, 2  ;;  %v10659_v47 = vld [vmem:[#allocation19_spill] sm:$0xff]  ;;  %vm10662_vm3 = vmmov %vm10657_vm4 }
 0x215   : > { %v1734_v30 = vsel %vm1702_vm9, %v1701_v25, %v954_v56  ;;  %v1732_v5 = vsel %vm1702_vm9, %v1699_v36, %v952_v15  ;;  %v4932_v39 = vpack.c.bf16 %v4900_v24, %v4899_v60  ;;  %v4138_v50 = vadd.f32 %v4047_v59, %v3941_v53  ;;  %v8157_v56 = vpop.permute.xlu0 %1258  ;;  %vm10663_vm4 = vmmov %vm10662_vm3 }
 0x216   : > { %v8147_v45 = vsel %vm3022_vm1, 1.0, %v10573_v62  ;;  %v10660_v55 = vrot.slane %v10659_v47, 2  ;;  %v10371_v9 = vrot.slane %v8140_v46, 2  ;;  %v8155_v57 = vmul.f32 %v7652_v11, %v8112_v31  ;;  %vm10661_vm1 = vmmov %vm10658_vm2 }
 0x217   : > { %v4964_v15 = vshrl.u32 %v4932_v39, 16  ;;  %v4967_v60 = vshll.u32 %v4932_v39, 16  ;;  %v4441_v25 = vmul.f32 %v7643_v0, %v4404_v29  ;;  %v4442_v24 = vmul.f32 %v7643_v0, %v4405_v40  ;;  %v8165_v22 = vpop.permute.xlu1 %1367 }
 0x218   : > { %v4277_v10 = vsel %vm10658_vm2, %v10660_v55, %v4276_v14  ;;  %v4279_v33 = vsel %vm10661_vm1, %v4276_v14, %v10371_v9  ;;  %v4576_v36 = vrot.slane %v4511_v38, 1  ;;  %v10370_v59 = vrot.slane %v8155_v57, 1  ;;  %vm10671_vm2 = vmmov %vm10661_vm1 }
 0x219   : > { %v4371_v53 = vadd.f32 %v4277_v10, %v4137_v8  ;;  %v4966_v47 = vrot.slane %v4964_v15, 3  ;;  %v4969_v55 = vrot.slane %v4967_v60, 4  ;;  %v4372_v42 = vadd.f32 %v4279_v33, %v4138_v50  ;;  %v8178_v39 = vpop.permute.xlu0 %1365  ;;  %v5462_v15 = vpop.f32.mrb[8].mxu0 }
 0x21a   : > { %v4577_v8 = vsel %vm10662_vm3, %v4574_v35, %v4576_v36  ;;  %v4579_v29 = vsel %vm10663_vm4, %v4576_v36, %v10370_v59  ;;  %v4701_v40 = vmul.f32 %v7685_v3, %v8085_v23  ;;  %v4702_v38 = vmul.f32 %v7689_v16, %v8112_v31  ;;  %v10664_v3 = vld [vmem:[#allocation12_spill] sm:$0xff]  ;;  %v8192_v16 = vld [vmem:[%s10311_s2] ss:$0 sm:$0xff]  ;;  %vm10688_vm4 = vmmov %vm10662_vm3 }
 0x21b   : > { %v4474_v54 = vadd.f32 %v4441_v25, %v4371_v53  ;;  %v1767_v14 = vsel %vm1735_vm10, %v1734_v30, %v1035_v52  ;;  %v8180_v50 = vor.u32 %v4969_v55, %v4966_v47  ;;  %v4475_v10 = vadd.f32 %v4442_v24, %v4372_v42  ;;  %v2203_v42 = vpop.f32.mrb[9].mxu0  ;;  %v1400_v47 = vpop.permute.xlu1 %1399 }
 0x21c   : > { %v1765_v35 = vsel %vm1735_vm10, %v1732_v5, %v1033_v32  ;;  %v4737_v60 = vmul.f32 %v7909_v20, %v4701_v40  ;;  %v8185_v53 = vmul.f32 %v7909_v20, %v4702_v38  ;;  %v3213_v25 = vmul.f32 %v10664_v3, %v8039_v7  ;;  %v5463_v36 = vpop.f32.mrb[10].mxu0  ;;  %vm10667_vm10 = vmmov %vm10662_vm3 }
 0x21d   : > { %v4668_v4 = vadd.f32 %v4577_v8, %v4474_v54  ;;  %v8195_v52 = vadd.f32 %v8192_v16, %v5462_v15  ;;  %v10665_v54 = vor.u32 %v8003_v43, %v8001_v21  ;;  %v4669_v5 = vadd.f32 %v4579_v29, %v4475_v10  ;;  %v2206_v21 = vpop.f32.mrb[11].mxu0  ;;  %v1398_v43 = vpop.permute.xlu0 %1397 }
 0x21e   : > { %v1800_v33 = vsel %vm1768_vm11, %v1767_v14, %v1180_v18  ;;  %v8207_v24 = vadd.f32 %v8192_v16, %v2203_v42  ;;  %v4806_v55 = vrot.slane %v4737_v60, 2  ;;  %v10372_v8 = vrot.slane %v8185_v53, 2  ;;  %v10669_v14 = vld [vmem:[#allocation7_spill] sm:$0xff] }
 0x21f   : > { %v8203_v30 = vsel %vm4954_vm0, %v10665_v54, %v8180_v50  ;;  %v5373_v40 = vmul.f32 -1.442695, %v8195_v52  ;;  %v8212_v38 = vadd.f32 %v8192_v16, %v5463_v36  ;;  %v10666_v29 = vrot.slane %v7922_v26, 1  ;;  %v1432_v32 = vpop.permute.xlu1 %1431 }
 0x220   : > { %v3318_v10 = vmul.f32 %v10669_v14, %v8039_v7  ;;  %v5371_v15 = vmul.f32 -1.442695, %v8207_v24  ;;  %v8224_v60 = vadd.f32 %v8192_v16, %v2206_v21  ;;  %v10670_v42 = vrot.slane %v8094_v48, 2 }
 0x221   : > { %v8218_v18 = vsel %vm10667_vm10, %v10666_v29, %v7370_v44  ;;  %v3250_v36 = vmul.f32 %v7400_v19, %v3213_v25  ;;  %5630 = vpow2.f32 %v5373_v40  ;;  %v5374_v26 = vmul.f32 -1.442695, %v8212_v38  ;;  %v1430_v40 = vpop.permute.xlu0 %1429 }
 0x222   : > { %10668 = vst [vmem:[#allocation8_spill] sm:$0xff] %v8218_v18  ;;  %v4807_v54 = vsel %vm10671_vm2, %v10670_v42, %v4806_v55  ;;  %v4809_v29 = vsel %vm10661_vm1, %v4806_v55, %v10372_v8  ;;  %5632 = vpow2.f32 %v5371_v15  ;;  %v5372_v9 = vmul.f32 -1.442695, %v8224_v60 }
 0x223   : > { %v4901_v59 = vadd.f32 %v4807_v54, %v4668_v4  ;;  %v10672_v21 = vrot.slane %v7929_v58, 7  ;;  %v4902_v42 = vadd.f32 %v4809_v29, %v4669_v5  ;;  %v1798_v25 = vsel %vm1768_vm11, %v1765_v35, %v8129_v37  ;;  %v8250_v58 = vld [vmem:[%s10313_s4] ss:$0 sm:$0xff]  ;;  %v10674_v5 = vld [vmem:[#allocation13_spill] sm:$0xff]  ;;  %vm10676_vm11 = vmmov %vm10662_vm3 }
 0x224   : > { %5634 = vpow2.f32 %v5374_v26  ;;  %v8245_v55 = vmul.f32 %v10669_v14, %v8056_v63  ;;  %v3385_v4 = vrot.slane %v3318_v10, 1  ;;  %v3283_v54 = vadd.f32 %v8250_v58, %v3250_v36 }
 0x225   : > { %v8239_v48 = vsel %vm3535_vm8, %v10672_v21, %v7395_v1  ;;  %5636 = vpow2.f32 %v5372_v9  ;;  %v4933_v15 = vpack.c.bf16 %v4902_v42, %v4901_v59  ;;  %v3638_v29 = vmul.f32 %v10674_v5, %v8039_v7  ;;  %v10677_v59 = vld [vmem:[#allocation14_spill] sm:$0xff]  ;;  %v1464_v21 = vpop.permute.xlu1 %1463 }
 0x226   : > { %10673 = vst [vmem:[#allocation11_spill] sm:$0xff] %v8239_v48  ;;  %v1833_v37 = vsel %vm1801_vm12, %v1800_v33, %v8144_v49  ;;  %v10675_v35 = vrot.slane %v7953_v34, 1  ;;  %v3387_v9 = vrot.slane %v8245_v55, 1  ;;  %v3639_v10 = vmul.f32 %v10677_v59, %v8056_v63  ;;  %v1462_v49 = vpop.permute.xlu0 %1461 }
 0x227   : > { %v4973_v42 = vshrl.u32 %v4933_v15, 16  ;;  %v4976_v8 = vshll.u32 %v4933_v15, 16  ;;  %v3675_v48 = vmul.f32 %v7443_v17, %v3638_v29  ;;  %v1831_v7 = vsel %vm1801_vm12, %v1798_v25, %v8157_v56  ;;  %vm10679_vm12 = vmmov %vm10661_vm1 }
 0x228   : > { %v3386_v26 = vsel %vm10676_vm11, %v10675_v35, %v3385_v4  ;;  %v1866_v34 = vsel %vm1834_vm13, %v1833_v37, %v8165_v22  ;;  %v3388_v33 = vsel %vm10662_vm3, %v3385_v4, %v3387_v9  ;;  %v8273_v35 = vmul.f32 %v7443_v17, %v3639_v10  ;;  %vm10696_vm11 = vmmov %vm10661_vm1 }
 0x229   : > { %v3476_v36 = vadd.f32 %v3386_v26, %v8109_v27  ;;  %v1864_v15 = vsel %vm1834_vm13, %v1831_v7, %v8178_v39  ;;  %v4975_v27 = vrot.slane %v4973_v42, 3  ;;  %v4978_v26 = vrot.slane %v4976_v8, 4  ;;  %v1521_v51 = vpop.permute.xlu1 %1520  ;;  %vm10680_vm13 = vmmov %vm10661_vm1 }
 0x22a   : > { %v3477_v29 = vadd.f32 %v3388_v33, %v3283_v54  ;;  %v1899_v18 = vsel %vm1867_vm14, %v1866_v34, %v1400_v47  ;;  %v1897_v56 = vsel %vm1867_vm14, %v1864_v15, %v1398_v43  ;;  %v3747_v25 = vrot.slane %v3675_v48, 2  ;;  %v1519_v54 = vpop.permute.xlu0 %1518 }
 0x22b   : > { %v3749_v22 = vrot.slane %v8273_v35, 2  ;;  %v1932_v37 = vsel %vm1900_vm15, %v1899_v18, %v1432_v32  ;;  %v2543_v4 = vadd.s32 160, %v7319_v13  ;;  %v8282_v10 = vor.u32 %v4978_v26, %v4975_v27  ;;  %v5631_v42 = vpop.eup %5630 }
 0x22c   : > { %v3872_v39 = vmul.f32 %v7693_v41, %v8056_v63  ;;  %v1930_v8 = vsel %vm1900_vm15, %v1897_v56, %v1430_v40  ;;  %v1965_v47 = vsel %vm1933_vm6, %v1932_v37, %v1464_v21  ;;  %v10678_v43 = vrot.slane %v7986_v12, 2  ;;  %v5633_v18 = vpop.eup %5632 }
 0x22d   : > { %v3750_v32 = vsel %vm10680_vm13, %v3747_v25, %v3749_v22  ;;  %v2404_v7 = vadd.f32 1.0, %v5631_v42  ;;  %v1963_v34 = vsel %vm1933_vm6, %v1930_v8, %v1462_v49  ;;  %v2699_v33 = vand.u32 15, %v2543_v4  ;;  %v1578_v37 = vpop.permute.xlu1 %1577  ;;  %vm10701_vm13 = vmmov %vm10662_vm3 }
 0x22e   : > { %v3748_v48 = vsel %vm10679_vm12, %v10678_v43, %v3747_v25  ;;  %v3873_v15 = vmul.f32 %v10664_v3, %v8085_v23  ;;  %v5635_v40 = vpop.eup %5634  ;;  %v2402_v27 = vadd.f32 1.0, %v5633_v18  ;;  %v8300_v12 = vsel %vm4954_vm0, %v8180_v50, %v8282_v10  ;;  %v1576_v8 = vpop.permute.xlu0 %1575  ;;  %vm10699_vm12 = vmmov %vm10662_vm3 }
 0x22f   : > { %v3840_v21 = vadd.f32 %v3748_v48, %v3476_v36  ;;  %v3841_v26 = vadd.f32 %v3750_v32, %v3477_v29  ;;  %v5637_v56 = vpop.eup %5636  ;;  %5638 = vrcp.f32 %v2404_v7  ;;  %v2405_v25 = vadd.f32 1.0, %v5635_v40 }
 0x230   : > { %v2544_v42 = vadd.s32 168, %v7319_v13  ;;  %v3909_v49 = vmul.f32 %v7533_v28, %v3872_v39  ;;  %5640 = vrcp.f32 %v2402_v27  ;;  %v2403_v4 = vadd.f32 1.0, %v5637_v56 }
 0x231   : > { %v3979_v43 = vmul.f32 %v10648_v6, %v8085_v23  ;;  %v8308_v50 = vmul.f32 %v10648_v6, %v8112_v31  ;;  %5642 = vrcp.f32 %v2405_v25  ;;  %v1998_v36 = vsel %vm1966_vm7, %v1965_v47, %v1521_v51  ;;  %v1635_v40 = vpop.permute.xlu1 %1634 }
 0x232   : > { %v3910_v29 = vmul.f32 %v7533_v28, %v3873_v15  ;;  %v4172_v48 = vmul.f32 %v10674_v5, %v8085_v23  ;;  %5644 = vrcp.f32 %v2403_v4  ;;  %v1996_v39 = vsel %vm1966_vm7, %v1963_v34, %v1519_v54  ;;  %v1633_v51 = vpop.permute.xlu0 %1632  ;;  %vm10687_vm7 = vmmov %vm10662_vm3 }
 0x233   : > { %vm2959_vm14 = vcmp.ge.s32.totalorder %v2699_v33, 1  ;;  %v3942_v32 = vadd.f32 %v3909_v49, %v3840_v21  ;;  %v2031_v18 = vsel %vm1999_vm5, %v1998_v36, %v1578_v37  ;;  %v2029_v7 = vsel %vm1999_vm5, %v1996_v39, %v1576_v8 }
 0x234   : > { %v2706_v27 = vand.u32 15, %v2544_v42  ;;  %v3943_v56 = vadd.f32 %v3910_v29, %v3841_v26  ;;  %vm10681_vm15 = vcmask 424960   ;;  %v4048_v47 = vrot.slane %v3979_v43, 1 }
 0x235   : > { %v2064_v25 = vsel %vm10681_vm15, %v2031_v18, %v1635_v40  ;;  %v4050_v15 = vrot.slane %v8308_v50, 1  ;;  %v4173_v4 = vmul.f32 %v10677_v59, %v8112_v31  ;;  %vm10682_vm6 = vmmov %vm10681_vm15  ;;  %v10683_v34 = vrot.slane %v8147_v45, 7 }
 0x236   : > { %v2062_v54 = vsel %vm10682_vm6, %v2029_v7, %v1633_v51  ;;  %v8329_v21 = vsel %vm2959_vm14, 1.0, %v10573_v62  ;;  %v4209_v26 = vmul.f32 %v7638_v2, %v4172_v48  ;;  %vm10685_vm5 = vcmask 457728   ;;  %v10693_v7 = vld [vmem:[#allocation15_spill] sm:$0xff]  ;;  %vm10702_vm14 = vmmov %vm10662_vm3 }
 0x237   : > { %v8326_v33 = vsel %vm3535_vm8, %v7395_v1, %v10683_v34  ;;  %5480 = vmatprep.mubr.msk.bf16.mxu0 %vm10685_vm5, %v2062_v54  ;;  %v10686_v37 = vrot.slane %v8103_v61, 1  ;;  %v4051_v49 = vsel %vm10688_vm4, %v4048_v47, %v4050_v15  ;;  %v8340_v8 = vmul.f32 %v7638_v2, %v4173_v4  ;;  %vm10689_vm10 = vmmov %vm10685_vm5 }
 0x238   : > { %10684 = vst [vmem:[#allocation19_spill] sm:$0xff] %v8326_v33  ;;  %v4406_v43 = vmul.f32 %v7693_v41, %v8112_v31  ;;  %5481 = vmatmul.mubr.msk.bf16.gmra.mrb[28].mxu0 %vm10689_vm10, %v2064_v25  ;;  %v8347_v36 = vsel %vm1702_vm9, %v8203_v30, 0  ;;  %v4140_v61 = vadd.f32 %v4051_v49, %v3943_v56  ;;  %v4280_v48 = vrot.slane %v4209_v26, 2  ;;  %v10694_v41 = vld [vmem:[#allocation16_spill] sm:$0xff]  ;;  %vm10706_vm15 = vmmov %vm10661_vm1 }
 0x239   : > { %v4049_v42 = vsel %vm10687_vm7, %v10686_v37, %v4048_v47  ;;  %10690 = vst [vmem:[#allocation12_spill] sm:$0xff] %v8347_v36  ;;  %vm8349_vm2 = vcmp.le.s32.totalorder %v2706_v27, 14  ;;  %v4282_v18 = vrot.slane %v8340_v8, 2  ;;  %v3214_v40 = vmul.f32 %v10693_v7, %v8056_v63  ;;  %v5639_v25 = vpop.eup %5638  ;;  %vm10707_vm6 = vmmov %vm10661_vm1 }
 0x23a   : > { %v4139_v29 = vadd.f32 %v4049_v42, %v3942_v32  ;;  %v3215_v51 = vmul.f32 %v10694_v41, %v8085_v23  ;;  %v10695_v30 = vrot.slane %v8140_v46, 2  ;;  %v4443_v27 = vmul.f32 %v7643_v0, %v4406_v43  ;;  %v5641_v4 = vpop.eup %5640  ;;  %vm10712_vm7 = vmmov %vm10661_vm1 }
 0x23b   : > { %v3320_v56 = vmul.f32 %v10669_v14, %v8085_v23  ;;  %v4283_v63 = vsel %vm10696_vm11, %v4280_v48, %v4282_v18  ;;  %v3251_v34 = vmul.f32 %v7400_v19, %v3214_v40  ;;  %v8371_v26 = vmul.f32 %v10669_v14, %v8112_v31  ;;  %v5643_v46 = vpop.eup %5642  ;;  %vm10713_vm4 = vmmov %vm10661_vm1 }
 0x23c   : > { %v4281_v32 = vsel %vm10661_vm1, %v10695_v30, %v4280_v48  ;;  %v8374_v37 = vmul.f32 %v5641_v4, %v8207_v24  ;;  %v8379_v42 = vsel %vm8349_vm2, 1.0, %v10573_v62  ;;  %v4374_v49 = vadd.f32 %v4283_v63, %v4140_v61  ;;  %v5645_v48 = vpop.eup %5644  ;;  %vm10714_vm10 = vmmov %vm10662_vm3 }
 0x23d   : > { %v4373_v54 = vadd.f32 %v4281_v32, %v4139_v29  ;;  %v3252_v43 = vmul.f32 %v7400_v19, %v3215_v51  ;;  %v8383_v29 = vmul.f32 %v5639_v25, %v8195_v52  ;;  %v8387_v40 = vsel %vm1702_vm9, %v8300_v12, 0  ;;  %vm10715_vm2 = vmmov %vm10662_vm3 }
 0x23e   : > { %10697 = vst [vmem:[#allocation13_spill] sm:$0xff] %v8387_v40  ;;  %v8390_v30 = vadd.s32 176, %v7319_v13  ;;  %v8393_v32 = vmul.f32 %v5645_v48, %v8224_v60  ;;  %v4407_v61 = vmul.f32 %v10664_v3, %v8374_v37  ;;  %v4513_v39 = vmul.f32 %v7652_v11, %v8374_v37  ;;  %vm10716_vm11 = vmmov %vm10661_vm1 }
 0x23f   : > { %v4476_v24 = vadd.f32 %v4443_v27, %v4373_v54  ;;  %v3284_v52 = vadd.f32 %v8250_v58, %v3251_v34  ;;  %v4703_v51 = vmul.f32 %v10674_v5, %v8374_v37  ;;  %v3285_v12 = vadd.f32 %v8250_v58, %v3252_v43 }
 0x240   : > { %v3389_v25 = vrot.slane %v3320_v56, 1  ;;  %v10376_v4 = vrot.slane %v8371_v26, 1  ;;  %v8405_v27 = vmul.f32 %v5643_v46, %v8212_v38  ;;  %v4444_v60 = vmul.f32 %v7643_v0, %v4407_v61 }
 0x241   : > { %v8410_v3 = vmul.f32 %v7652_v11, %v8393_v32  ;;  %v4580_v63 = vrot.slane %v4513_v39, 1  ;;  %v4704_v54 = vmul.f32 %v10677_v59, %v8393_v32  ;;  %v4739_v5 = vmul.f32 %v7909_v20, %v4703_v51 }
 0x242   : > { %10698 = vst [vmem:[#allocation14_spill] sm:$0xff] %v8405_v27  ;;  %v3390_v56 = vsel %vm10662_vm3, %v3387_v9, %v3389_v25  ;;  %v3392_v38 = vsel %vm10699_vm12, %v3389_v25, %v10376_v4  ;;  %v4477_v34 = vadd.f32 %v4444_v60, %v4374_v49  ;;  %v10700_v46 = vrot.slane %v8155_v57, 1  ;;  %v10703_v25 = vld [vmem:[#allocation17_spill] sm:$0xff]  ;;  %v10704_v57 = vld [vmem:[#allocation18_spill] sm:$0xff]  ;;  %vm10718_vm3 = vmmov %vm10715_vm2 }
 0x243   : > { %v10378_v48 = vrot.slane %v8410_v3, 1  ;;  %v3478_v61 = vadd.f32 %v3390_v56, %v3284_v52  ;;  %v8426_v59 = vmul.f32 %v7909_v20, %v4704_v54  ;;  %v4810_v51 = vrot.slane %v4739_v5, 2  ;;  %vm10719_vm12 = vmmov %vm10715_vm2 }
 0x244   : > { %v4581_v43 = vsel %vm10701_vm13, %v10700_v46, %v4580_v63  ;;  %v3479_v55 = vadd.f32 %v3392_v38, %v3285_v12  ;;  %v3640_v49 = vmul.f32 %v10703_v25, %v8085_v23  ;;  %v3641_v60 = vmul.f32 %v10704_v57, %v8112_v31 }
 0x245   : > { %v4670_v39 = vadd.f32 %v4581_v43, %v4476_v24  ;;  %v4583_v9 = vsel %vm10702_vm14, %v4580_v63, %v10378_v48  ;;  %v3874_v46 = vmul.f32 %v10693_v7, %v8112_v31  ;;  %v10705_v24 = vrot.slane %v8185_v53, 2  ;;  %vm10725_vm14 = vmmov %vm10661_vm1 }
 0x246   : > { %v4671_v52 = vadd.f32 %v4583_v9, %v4477_v34  ;;  %v10377_v12 = vrot.slane %v8426_v59, 2  ;;  %v3875_v5 = vmul.f32 %v10694_v41, %v8374_v37  ;;  %v3677_v56 = vmul.f32 %v7443_v17, %v3640_v49 }
 0x247   : > { %v4811_v54 = vsel %vm10706_vm15, %v10705_v24, %v4810_v51  ;;  %v8445_v23 = vmul.f32 %v7443_v17, %v3641_v60  ;;  %v3911_v38 = vmul.f32 %v7533_v28, %v3874_v46  ;;  %v3981_v43 = vmul.f32 %v10648_v6, %v8374_v37  ;;  %v10708_v24 = vld [vmem:[#allocation27_spill] sm:$0xff]  ;;  %vm10726_vm15 = vmmov %vm10661_vm1 }
 0x248   : > { %v4903_v63 = vadd.f32 %v4811_v54, %v4670_v39  ;;  %v4813_v34 = vsel %vm10707_vm6, %v4810_v51, %v10377_v12  ;;  %v3912_v53 = vmul.f32 %v7533_v28, %v3875_v5  ;;  %v8456_v9 = vmul.f32 %v10648_v6, %v8393_v32  ;;  %vm10731_vm6 = vmmov %vm10715_vm2 }
 0x249   : > { %v4904_v39 = vadd.f32 %v4813_v34, %v4671_v52  ;;  %v3751_v49 = vrot.slane %v3677_v56, 2  ;;  %v10379_v60 = vrot.slane %v8445_v23, 2  ;;  %v4174_v46 = vmul.f32 %v10703_v25, %v8374_v37 }
 0x24a   : > { %v10709_v54 = vand.u32 15, %v10708_v24  ;;  %v4052_v5 = vrot.slane %v3981_v43, 1  ;;  %v10385_v47 = vrot.slane %v8456_v9, 1  ;;  %v4175_v4 = vmul.f32 %v10704_v57, %v8393_v32 }
 0x24b   : > { %v4408_v52 = vmul.f32 %v10693_v7, %v8393_v32  ;;  %v4934_v56 = vpack.c.bf16 %v4904_v39, %v4903_v63  ;;  %v3752_v34 = vsel %vm10712_vm7, %v3749_v22, %v3751_v49  ;;  %v3754_v24 = vsel %vm10713_vm4, %v3751_v49, %v10379_v60  ;;  %vm10735_vm7 = vmmov %vm10661_vm1 }
 0x24c   : > { %vm8463_vm5 = vcmp.le.s32.totalorder %v10709_v54, 14  ;;  %v4211_v54 = vmul.f32 %v7638_v2, %v4174_v46  ;;  %v3842_v43 = vadd.f32 %v3752_v34, %v3478_v61  ;;  %v3843_v12 = vadd.f32 %v3754_v24, %v3479_v55  ;;  %vm10736_vm4 = vmmov %vm10661_vm1 }
 0x24d   : > { %v4053_v48 = vsel %vm10714_vm10, %v4050_v15, %v4052_v5  ;;  %v4055_v7 = vsel %vm10715_vm2, %v4052_v5, %v10385_v47  ;;  %v4982_v63 = vshrl.u32 %v4934_v56, 16  ;;  %v4985_v35 = vshll.u32 %v4934_v56, 16 }
 0x24e   : > { %v8486_v22 = vmul.f32 %v7638_v2, %v4175_v4  ;;  %v4284_v39 = vrot.slane %v4211_v54, 2  ;;  %v2713_v49 = vand.u32 15, %v8390_v30  ;;  %v3944_v60 = vadd.f32 %v3911_v38, %v3842_v43 }
 0x24f   : > { %v3945_v46 = vadd.f32 %v3912_v53, %v3843_v12  ;;  %v4409_v61 = vmul.f32 %v10694_v41, %v8383_v29  ;;  %v4984_v50 = vrot.slane %v4982_v63, 3  ;;  %v4987_v55 = vrot.slane %v4985_v35, 4 }
 0x250   : > { %v4285_v15 = vsel %vm10661_vm1, %v4282_v18, %v4284_v39  ;;  %v10384_v5 = vrot.slane %v8486_v22, 2  ;;  %v4141_v56 = vadd.f32 %v4053_v48, %v3944_v60  ;;  %v4445_v4 = vmul.f32 %v7643_v0, %v4408_v52  ;;  %v5466_v52 = vpop.f32.mrb[12].mxu0 }
 0x251   : > { %v4142_v34 = vadd.f32 %v4055_v7, %v3945_v46  ;;  %v4515_v30 = vmul.f32 %v7652_v11, %v8383_v29  ;;  %v8498_v38 = vor.u32 %v4987_v55, %v4984_v50  ;;  %v8505_v8 = vmul.f32 %v7652_v11, %v8405_v27  ;;  %v2219_v63 = vpop.f32.mrb[13].mxu0 }
 0x252   : > { %v4287_v41 = vsel %vm10716_vm11, %v4284_v39, %v10384_v5  ;;  %v4705_v18 = vmul.f32 %v10703_v25, %v8383_v29  ;;  %v4375_v48 = vadd.f32 %v4285_v15, %v4141_v56  ;;  %v4446_v53 = vmul.f32 %v7643_v0, %v4409_v61  ;;  %vm10739_vm11 = vmmov %vm10715_vm2 }
 0x253   : > { %v4376_v12 = vadd.f32 %v4287_v41, %v4142_v34  ;;  %v4706_v60 = vmul.f32 %v10704_v57, %v8405_v27  ;;  %v8515_v24 = vsel %vm4954_vm0, %v8282_v10, %v8498_v38  ;;  %v4584_v54 = vrot.slane %v4515_v30, 1  ;;  %v5467_v10 = vpop.f32.mrb[14].mxu0 }
 0x254   : > { %v10383_v43 = vrot.slane %v8505_v8, 1  ;;  %v4741_v7 = vmul.f32 %v7909_v20, %v4705_v18  ;;  %v8520_v25 = vadd.f32 %v8192_v16, %v5466_v52  ;;  %v4478_v35 = vadd.f32 %v4445_v4, %v4375_v48  ;;  %v2222_v34 = vpop.f32.mrb[15].mxu0 }
 0x255   : > { %v4479_v39 = vadd.f32 %v4446_v53, %v4376_v12  ;;  %v8525_v57 = vsel %vm8463_vm5, 1.0, %v10573_v62  ;;  %v8528_v46 = vadd.f32 %v8192_v16, %v2219_v63  ;;  %v10717_v61 = vrot.slane %v8410_v3, 1  ;;  %v10722_v53 = vld [vmem:[#allocation20_spill] sm:$0xff]  ;;  %vm10732_vm5 = vmmov %vm10715_vm2 }
 0x256   : > { %v4587_v55 = vsel %vm10719_vm12, %v4584_v54, %v10383_v43  ;;  %v8537_v15 = vmul.f32 %v7909_v20, %v4706_v60  ;;  %v5377_v56 = vmul.f32 -1.442695, %v8520_v25  ;;  %v8541_v51 = vadd.f32 %v8192_v16, %v5467_v10  ;;  %vm10746_vm12 = vmmov %vm10715_vm2 }
 0x257   : > { %v4585_v50 = vsel %vm10718_vm3, %v10717_v61, %v4584_v54  ;;  %vm8543_vm13 = vcmp.ge.s32.totalorder %v2713_v49, 1  ;;  %v4673_v30 = vadd.f32 %v4587_v55, %v4479_v39  ;;  %v5375_v41 = vmul.f32 -1.442695, %v8528_v46  ;;  %v10723_v49 = vld [vmem:[#allocation28_spill] sm:$0xff]  ;;  %vm10742_vm3 = vmmov %vm10715_vm2 }
 0x258   : > { %v4672_v3 = vadd.f32 %v4585_v50, %v4478_v35  ;;  %v8549_v18 = vadd.f32 %v8192_v16, %v2222_v34  ;;  %v4814_v48 = vrot.slane %v4741_v7, 2  ;;  %v10382_v20 = vrot.slane %v8537_v15, 2  ;;  %v10728_v34 = vld [vmem:[#allocation10_spill] sm:$0xff] }
 0x259   : > { %5646 = vpow2.f32 %v5377_v56  ;;  %v5378_v12 = vmul.f32 -1.442695, %v8541_v51  ;;  %v3216_v60 = vmul.f32 %v10722_v53, %v8112_v31  ;;  %v3217_v52 = vmul.f32 %v10723_v49, %v8374_v37 }
 0x25a   : > { %5648 = vpow2.f32 %v5375_v41  ;;  %v5376_v54 = vmul.f32 -1.442695, %v8549_v18  ;;  %v10724_v63 = vrot.slane %v8426_v59, 2  ;;  %v4817_v7 = vsel %vm10726_vm15, %v4814_v48, %v10382_v20  ;;  %vm10754_vm15 = vmmov %vm10736_vm4 }
 0x25b   : > { %5650 = vpow2.f32 %v5378_v12  ;;  %v4906_v10 = vadd.f32 %v4817_v7, %v4673_v30  ;;  %v3253_v61 = vmul.f32 %v7400_v19, %v3216_v60  ;;  %v3254_v31 = vmul.f32 %v7400_v19, %v3217_v52 }
 0x25c   : > { %v4815_v35 = vsel %vm10725_vm14, %v10724_v63, %v4814_v48  ;;  %5652 = vpow2.f32 %v5376_v54  ;;  %v3322_v50 = vmul.f32 %v10669_v14, %v8374_v37  ;;  %v8570_v59 = vmul.f32 %v10669_v14, %v8393_v32 }
 0x25d   : > { %v4905_v39 = vadd.f32 %v4815_v35, %v4672_v3  ;;  %v3286_v56 = vadd.f32 %v8250_v58, %v3253_v61  ;;  %v10729_v41 = vrot.slane %v10728_v34, 7  ;;  %v10380_v30 = vrot.slane %v8525_v57, 7 }
 0x25e   : > { %10727 = vst [vmem:[#allocation15_spill] sm:$0xff] %v8570_v59  ;;  %v3287_v48 = vadd.f32 %v8250_v58, %v3254_v31  ;;  %v3393_v12 = vrot.slane %v3322_v50, 1  ;;  %v10381_v60 = vrot.slane %v8570_v59, 1  ;;  %v3876_v7 = vmul.f32 %v10722_v53, %v8393_v32 }
 0x25f   : > { %v4935_v55 = vpack.c.bf16 %v4906_v10, %v4905_v39  ;;  %v8577_v3 = vsel %vm3535_vm8, %v10729_v41, %v7395_v1  ;;  %v8588_v35 = vsel %vm3535_vm8, %v7395_v1, %v10380_v30  ;;  %v10730_v39 = vrot.slane %v8371_v26, 1 }
 0x260   : > { %v3642_v52 = vmul.f32 %v8577_v3, %v8374_v37  ;;  %v3396_v61 = vsel %vm10732_vm5, %v3393_v12, %v10381_v60  ;;  %v3643_v37 = vmul.f32 %v8588_v35, %v8393_v32  ;;  %v8604_v30 = vsel %vm8543_vm13, 1.0, %v10573_v62  ;;  %vm10749_vm13 = vmmov %vm10715_vm2 }
 0x261   : > { %v4991_v54 = vshrl.u32 %v4935_v55, 16  ;;  %v4994_v63 = vshll.u32 %v4935_v55, 16  ;;  %v3394_v10 = vsel %vm10731_vm6, %v10730_v39, %v3393_v12  ;;  %v3481_v41 = vadd.f32 %v3396_v61, %v3287_v48  ;;  %vm10756_vm6 = vmmov %vm10715_vm2 }
 0x262   : > { %v3679_v31 = vmul.f32 %v7443_v17, %v3642_v52  ;;  %v3480_v34 = vadd.f32 %v3394_v10, %v3286_v56  ;;  %v8607_v26 = vmul.f32 %v7443_v17, %v3643_v37  ;;  %v3877_v12 = vmul.f32 %v10723_v49, %v8383_v29  ;;  %vm10761_vm5 = vmmov %vm10715_vm2 }
 0x263   : > { %v4993_v50 = vrot.slane %v4991_v54, 3  ;;  %v4996_v55 = vrot.slane %v4994_v63, 4  ;;  %v5647_v60 = vpop.eup %5646  ;;  %v3913_v52 = vmul.f32 %v7533_v28, %v3876_v7  ;;  %v3983_v56 = vmul.f32 %v10648_v6, %v8383_v29 }
 0x264   : > { %v3755_v39 = vrot.slane %v3679_v31, 2  ;;  %v8618_v4 = vmul.f32 %v10648_v6, %v8405_v27  ;;  %v5649_v48 = vpop.eup %5648  ;;  %v2408_v54 = vadd.f32 1.0, %v5647_v60  ;;  %v10734_v63 = vrot.slane %v8445_v23, 2 }
 0x265   : > { %v8611_v20 = vor.u32 %v4996_v55, %v4993_v50  ;;  %v10390_v61 = vrot.slane %v8607_v26, 2  ;;  %v4176_v37 = vmul.f32 %v8577_v3, %v8383_v29  ;;  %v5651_v31 = vpop.eup %5650  ;;  %v2406_v7 = vadd.f32 1.0, %v5649_v48 }
 0x266   : > { %10733 = vst [vmem:[#allocation16_spill] sm:$0xff] %v8618_v4  ;;  %v3756_v10 = vsel %vm10735_vm7, %v10734_v63, %v3755_v39  ;;  %v2546_v50 = vadd.s32 184, %v7319_v13  ;;  %v5653_v5 = vpop.eup %5652  ;;  %5654 = vrcp.f32 %v2408_v54  ;;  %v2409_v60 = vadd.f32 1.0, %v5651_v31  ;;  %vm10765_vm7 = vmmov %vm10736_vm4 }
 0x267   : > { %v4998_v55 = vsel %vm4954_vm0, %v8498_v38, %v8611_v20  ;;  %v3844_v43 = vadd.f32 %v3756_v10, %v3480_v34  ;;  %v3758_v23 = vsel %vm10736_vm4, %v3755_v39, %v10390_v61  ;;  %v3914_v63 = vmul.f32 %v7533_v28, %v3877_v12  ;;  %vm10775_vm4 = vmmov %vm10715_vm2 }
 0x268   : > { %5656 = vrcp.f32 %v2406_v7  ;;  %v2407_v47 = vadd.f32 1.0, %v5653_v5  ;;  %v2720_v40 = vand.u32 15, %v2546_v50  ;;  %v2547_v48 = vadd.s32 192, %v7319_v13 }
 0x269   : > { %5658 = vrcp.f32 %v2409_v60  ;;  %v3845_v36 = vadd.f32 %v3758_v23, %v3481_v41  ;;  %v3946_v33 = vadd.f32 %v3913_v52, %v3844_v43  ;;  %v4056_v59 = vrot.slane %v3983_v56, 1 }
 0x26a   : > { %5660 = vrcp.f32 %v2407_v47  ;;  %v3577_v38 = vrot.slane %v8379_v42, 7  ;;  %v2548_v34 = vadd.s32 200, %v7319_v13  ;;  %v2727_v54 = vand.u32 15, %v2547_v48 }
 0x26b   : > { %vm3026_vm10 = vcmp.le.s32.totalorder %v2720_v40, 14  ;;  %v3947_v10 = vadd.f32 %v3914_v63, %v3845_v36  ;;  %v10737_v39 = vrot.slane %v8456_v9, 1  ;;  %v10388_v5 = vrot.slane %v8618_v4, 1 }
 0x26c   : > { %v3153_v31 = vrot.slane %v8604_v30, 1  ;;  %v2734_v7 = vand.u32 15, %v2548_v34  ;;  %vm2963_vm1 = vcmp.ge.s32.totalorder %v2727_v54, 1  ;;  %v10738_v47 = vrot.slane %v8329_v21, 1 }
 0x26d   : > { %v4057_v12 = vsel %vm10715_vm2, %v10737_v39, %v4056_v59  ;;  %v2995_v40 = vsel %vm2963_vm1, 1.0, %v10573_v62  ;;  %v4177_v36 = vmul.f32 %v8588_v35, %v8405_v27  ;;  %v4213_v9 = vmul.f32 %v7638_v2, %v4176_v37  ;;  %vm10784_vm1 = vmmov %vm10715_vm2 }
 0x26e   : > { %v4143_v43 = vadd.f32 %v4057_v12, %v3946_v33  ;;  %v8646_v42 = vsel %vm10739_vm11, %v10738_v47, %v7370_v44  ;;  %v10741_v41 = vmov %v10738_v47  ;;  %v10744_v33 = vrot.slane %v8147_v45, 7  ;;  %vm10786_vm11 = vmmov %vm10765_vm7 }
 0x26f   : > { %10740 = vst [vmem:[#allocation17_spill] sm:$0xff] %v8646_v42  ;;  %v8656_v30 = vsel %vm10742_vm3, %v7370_v44, %v10741_v41  ;;  %v3058_v56 = vsel %vm3026_vm10, 1.0, %v10573_v62  ;;  %v4059_v50 = vsel %vm10746_vm12, %v4056_v59, %v10388_v5  ;;  %v3157_v60 = vrot.slane %v2995_v40, 1  ;;  %vm10787_vm3 = vmmov %vm10765_vm7 }
 0x270   : > { %10743 = vst [vmem:[#allocation18_spill] sm:$0xff] %v8656_v30  ;;  %v8662_v52 = vsel %vm3535_vm8, %v10744_v33, %v7395_v1  ;;  %v4144_v37 = vadd.f32 %v4059_v50, %v3947_v10  ;;  %v8669_v21 = vmul.f32 %v7638_v2, %v4177_v36  ;;  %v4288_v23 = vrot.slane %v4213_v9, 2  ;;  %v5655_v59 = vpop.eup %5654 }
 0x271   : > { %10745 = vst [vmem:[#allocation27_spill] sm:$0xff] %v8662_v52  ;;  %v8673_v63 = vsel %vm3535_vm8, %v7395_v1, %v3577_v38  ;;  %v8677_v45 = vsel %vm10749_vm13, %v7370_v44, %v3153_v31  ;;  %v8681_v48 = vsel %vm1702_vm9, %v8515_v24, 0  ;;  %vm3028_vm14 = vcmp.le.s32.totalorder %v2734_v7, 14  ;;  %vm10790_vm13 = vmmov %vm10784_vm1 }
 0x272   : > { %10747 = vst [vmem:[#allocation20_spill] sm:$0xff] %v8669_v21  ;;  %10748 = vst [vmem:[#allocation28_spill] sm:$0xff] %v8673_v63  ;;  %v3581_v34 = vrot.slane %v3058_v56, 7  ;;  %v8684_v54 = vsel %vm1702_vm9, %v4998_v55, 0  ;;  %v10753_v10 = vrot.slane %v8486_v22, 2  ;;  %v10389_v12 = vrot.slane %v8669_v21, 2  ;;  %v5657_v47 = vpop.eup %5656 }
 0x273   : > { %10750 = vst [vmem:[#allocation10_spill] sm:$0xff] %v8677_v45  ;;  %10751 = vst [vmem:[#allocation30_spill] sm:$0xff] %v8681_v48  ;;  %v8691_v40 = vmul.f32 %v5655_v59, %v8520_v25  ;;  %v8695_v24 = vsel %vm10756_vm6, %v3153_v31, %v7370_v44  ;;  %v8699_v7 = vsel %vm3535_vm8, %v3577_v38, %v7395_v1  ;;  %v5659_v36 = vpop.eup %5658  ;;  %v8706_v9 = vsel %vm3028_vm14, 1.0, %v10573_v62 }
 0x274   : > { %10752 = vst [vmem:[#allocation31_spill] sm:$0xff] %v8684_v54  ;;  %v4289_v39 = vsel %vm10754_vm15, %v10753_v10, %v4288_v23  ;;  %10757 = vst [vmem:[#allocation33_spill] sm:$0xff] %v8695_v24  ;;  %v8703_v22 = vsel %vm3535_vm8, %v7395_v1, %v3581_v34  ;;  %v8710_v25 = vsel %vm10761_vm5, %v3157_v60, %v7370_v44  ;;  %v5661_v41 = vpop.eup %5660  ;;  %v10767_v10 = vld [vmem:[#allocation25_spill] sm:$0xff]  ;;  %v5470_v54 = vpop.f32.mrb[16].mxu0  ;;  %v10782_v24 = vld [vmem:[#allocation23_spill] sm:$0xff] }
 0x275   : > { %10755 = vst [vmem:[#allocation32_spill] sm:$0xff] %v8691_v40  ;;  %10758 = vst [vmem:[#allocation34_spill] sm:$0xff] %v8699_v7  ;;  %v4377_v55 = vadd.f32 %v4289_v39, %v4143_v43  ;;  %v4410_v31 = vmul.f32 %v10722_v53, %v8405_v27  ;;  %v8715_v38 = vmul.f32 %v5659_v36, %v8541_v51  ;;  %v10764_v43 = vld [vmem:[#allocation22_spill] sm:$0xff] }
 0x276   : > { %10759 = vst [vmem:[#allocation35_spill] sm:$0xff] %v8703_v22  ;;  %10760 = vst [vmem:[#allocation36_spill] sm:$0xff] %v8706_v9  ;;  %v3223_v33 = vmul.f32 %v10764_v43, %v8691_v40  ;;  %v3328_v56 = vmul.f32 %v10669_v14, %v8691_v40  ;;  %v4291_v50 = vsel %vm10765_vm7, %v4288_v23, %v10389_v12  ;;  %v10770_v12 = vld [vmem:[#allocation9_spill] sm:$0xff] }
 0x277   : > { %10762 = vst [vmem:[#allocation37_spill] sm:$0xff] %v8710_v25  ;;  %10763 = vst [vmem:[#allocation38_spill] sm:$0xff] %v8715_v38  ;;  %v8725_v59 = vmul.f32 %v5661_v41, %v8549_v18  ;;  %v3648_v53 = vmul.f32 %v10767_v10, %v8691_v40  ;;  %v8731_v51 = vsel %vm3535_vm8, %v3581_v34, %v7395_v1  ;;  %v10771_v41 = vld [vmem:[#allocation21_spill] sm:$0xff] }
 0x278   : > { %10768 = vst [vmem:[#allocation25_spill] sm:$0xff] %v8731_v51  ;;  %v4378_v39 = vadd.f32 %v4291_v50, %v4144_v37  ;;  %v8734_v36 = vmul.f32 %v5657_v47, %v8528_v46  ;;  %v8738_v5 = vmul.f32 %v10669_v14, %v8715_v38  ;;  %v10773_v37 = vld [vmem:[#allocation24_spill] sm:$0xff]  ;;  %v10774_v46 = vld [vmem:[#allocation26_spill] sm:$0xff]  ;;  %v3260_v50 = vmul.f32 %v7400_v19, %v3223_v33  ;;  %v2235_v33 = vpop.f32.mrb[17].mxu0  ;;  %vm10793_vm15 = vmmov %vm10784_vm1 }
 0x279   : > { %10766 = vst [vmem:[#allocation22_spill] sm:$0xff] %v8725_v59  ;;  %v3222_v61 = vmul.f32 %v10771_v41, %v8725_v59  ;;  %v8746_v21 = vmul.f32 %v10669_v14, %v8725_v59  ;;  %v3647_v34 = vmul.f32 %v10773_v37, %v8725_v59  ;;  %v3649_v47 = vmul.f32 %v10774_v46, %v8715_v38  ;;  %vm10797_vm6 = vmmov %vm10787_vm3 }
 0x27a   : > { %10769 = vst [vmem:[#allocation39_spill] sm:$0xff] %v8734_v36  ;;  %v3405_v4 = vrot.slane %v3328_v56, 1  ;;  %v8755_v23 = vsel %vm10775_vm4, %v7370_v44, %v3157_v60  ;;  %v4447_v18 = vmul.f32 %v7643_v0, %v4410_v31  ;;  %v3685_v25 = vmul.f32 %v7443_v17, %v3648_v53  ;;  %v10778_v31 = vld [vmem:[#allocation29_spill] sm:$0xff]  ;;  %v5471_v53 = vpop.f32.mrb[18].mxu0  ;;  %vm10801_vm5 = vmmov %vm10787_vm3 }
 0x27b   : > { %10772 = vst [vmem:[#allocation9_spill] sm:$0xff] %v8746_v21  ;;  %10776 = vst [vmem:[#allocation21_spill] sm:$0xff] %v8755_v23  ;;  %v3259_v48 = vmul.f32 %v7400_v19, %v3222_v61  ;;  %v10403_v40 = vrot.slane %v8746_v21, 1  ;;  %v8761_v51 = vmul.f32 %v7443_v17, %v3647_v34  ;;  %v8765_v22 = vadd.f32 %v8192_v16, %v5470_v54 }
 0x27c   : > { %v8768_v56 = vmul.f32 %v7443_v17, %v3649_v47  ;;  %v4411_v60 = vmul.f32 %v10723_v49, %v8734_v36  ;;  %v10779_v23 = vand.u32 15, %v10778_v31  ;;  %v8779_v34 = vadd.f32 %v8192_v16, %v2235_v33  ;;  %vm10802_vm7 = vmmov %vm10784_vm1 }
 0x27d   : > { %10777 = vst [vmem:[#allocation24_spill] sm:$0xff] %v8761_v51  ;;  %v3292_v54 = vadd.f32 %v8250_v58, %v3259_v48  ;;  %v3406_v47 = vsel %vm10715_vm2, %v10403_v40, %v3405_v4  ;;  %v5381_v49 = vmul.f32 -1.442695, %v8765_v22  ;;  %v8788_v31 = vadd.f32 %v8192_v16, %v5471_v53  ;;  %vm10804_vm4 = vmmov %vm10784_vm1 }
 0x27e   : > { %vm8774_vm10 = vcmp.ge.s32.totalorder %v10779_v23, 1  ;;  %v2238_v23 = vpop.f32.mrb[19].mxu0  ;;  %v3224_v45 = vmul.f32 %v10782_v24, %v8715_v38  ;;  %v5379_v63 = vmul.f32 -1.442695, %v8779_v34  ;;  %v3293_v40 = vadd.f32 %v8250_v58, %v3260_v50  ;;  %vm10811_vm2 = vmmov %vm10784_vm1 }
 0x27f   : > { %v8795_v48 = vadd.f32 %v8192_v16, %v2238_v23  ;;  %v3767_v21 = vrot.slane %v3685_v25, 2  ;;  %5662 = vpow2.f32 %v5381_v49  ;;  %v5382_v7 = vmul.f32 -1.442695, %v8788_v31 }
 0x280   : > { %v3486_v52 = vadd.f32 %v3406_v47, %v3292_v54  ;;  %v10409_v53 = vrot.slane %v8768_v56, 2  ;;  %5664 = vpow2.f32 %v5379_v63  ;;  %v10783_v30 = vrot.slane %v8738_v5, 1 }
 0x281   : > { %v5380_v42 = vmul.f32 -1.442695, %v8795_v48  ;;  %v10785_v46 = vrot.slane %v8761_v51, 2  ;;  %5666 = vpow2.f32 %v5382_v7  ;;  %v8808_v25 = vmul.f32 %v7400_v19, %v3224_v45 }
 0x282   : > { %v3408_v33 = vsel %vm10784_vm1, %v3405_v4, %v10783_v30  ;;  %v3882_v50 = vmul.f32 %v10771_v41, %v8715_v38  ;;  %v4480_v54 = vadd.f32 %v4447_v18, %v4377_v55  ;;  %v2549_v63 = vadd.s32 208, %v7319_v13 }
 0x283   : > { %v3768_v16 = vsel %vm10786_vm11, %v10785_v46, %v3767_v21  ;;  %5668 = vpow2.f32 %v5380_v42  ;;  %v4448_v47 = vmul.f32 %v7643_v0, %v4411_v60  ;;  %v4517_v4 = vmul.f32 %v7652_v11, %v8734_v36  ;;  %vm10818_vm11 = vmmov %vm10787_vm3 }
 0x284   : > { %v8816_v30 = vadd.f32 %v3408_v33, %v3293_v40  ;;  %v8821_v7 = vsel %vm10787_vm3, %v3767_v21, %v10409_v53  ;;  %v8823_v45 = vadd.f32 %v3768_v16, %v3486_v52  ;;  %v8827_v55 = vmul.f32 %v7652_v11, %v8725_v59  ;;  %vm10827_vm3 = vmmov %vm10784_vm1 }
 0x285   : > { %v2741_v42 = vand.u32 15, %v2549_v63  ;;  %v4481_v18 = vadd.f32 %v4448_v47, %v4378_v39  ;;  %v4588_v46 = vrot.slane %v4517_v4, 1  ;;  %v4707_v60 = vmul.f32 %v8577_v3, %v8734_v36  ;;  %v8846_v3 = vld [vmem:[%s10312_s3 + $0x8] ss:$0 sm:$0xff] }
 0x286   : > { %10788 = vst [vmem:[#allocation29_spill] sm:$0xff] %v8827_v55  ;;  %v8832_v40 = vmul.f32 %v7533_v28, %v3882_v50  ;;  %v10408_v49 = vrot.slane %v8827_v55, 1  ;;  %v4708_v21 = vmul.f32 %v8588_v35, %v8725_v59  ;;  %v2983_v52 = vsel %vm8774_vm10, 1.0, %v10573_v62  ;;  %vm10809_vm10 = vmmov %vm10784_vm1 }
 0x287   : > { %vm2965_vm12 = vcmp.ge.s32.totalorder %v2741_v42, 1  ;;  %v10789_v23 = vrot.slane %v8505_v8, 1  ;;  %v4743_v33 = vmul.f32 %v8846_v3, %v4707_v60  ;;  %v10791_v16 = vand.u32 15, %v10770_v12 }
 0x288   : > { %v8853_v35 = vmul.f32 %v10648_v6, %v8715_v38  ;;  %v4591_v8 = vsel %vm10793_vm15, %v4588_v46, %v10408_v49  ;;  %v8859_v50 = vmul.f32 %v8846_v3, %v4708_v21  ;;  %v4181_v63 = vmul.f32 %v10773_v37, %v8715_v38  ;;  %vm10833_vm15 = vmmov %vm10784_vm1 }
 0x289   : > { %v4589_v39 = vsel %vm10790_vm13, %v10789_v23, %v4588_v46  ;;  %vm3016_vm14 = vcmp.le.s32.totalorder %v10791_v16, 14  ;;  %v8864_v47 = vsel %vm2965_vm12, 1.0, %v10573_v62  ;;  %v4675_v12 = vadd.f32 %v4591_v8, %v4481_v18  ;;  %v5663_v42 = vpop.eup %5662  ;;  %vm10828_vm12 = vmmov %vm10784_vm1 }
 0x28a   : > { %10792 = vst [vmem:[#allocation23_spill] sm:$0xff] %v8853_v35  ;;  %v4674_v61 = vadd.f32 %v4589_v39, %v4480_v54  ;;  %10794 = vst [vmem:[#allocation40_spill] sm:$0xff] %v8859_v50  ;;  %v4818_v4 = vrot.slane %v4743_v33, 2  ;;  %v10414_v60 = vrot.slane %v8859_v50, 2  ;;  %v8868_v23 = vsel %vm3016_vm14, 1.0, %v10573_v62  ;;  %v5665_v46 = vpop.eup %5664  ;;  %v10825_v50 = vld [vmem:[#allocation19_spill] sm:$0xff] }
 0x28b   : > { %10795 = vst [vmem:[#allocation41_spill] sm:$0xff] %v8868_v23  ;;  %v3133_v16 = vrot.slane %v2983_v52, 1  ;;  %v3324_v54 = vmul.f32 %v10669_v14, %v8383_v29  ;;  %v2412_v21 = vadd.f32 1.0, %v5663_v42  ;;  %v10796_v39 = vrot.slane %v8537_v15, 2  ;;  %v5667_v52 = vpop.eup %5666  ;;  %vm10830_vm13 = vmmov %vm10801_vm5 }
 0x28c   : > { %v8877_v18 = vmul.f32 %v10669_v14, %v8405_v27  ;;  %v10799_v33 = vrot.slane %v8525_v57, 7  ;;  %v2410_v53 = vadd.f32 1.0, %v5665_v46  ;;  %v4821_v42 = vsel %vm10801_vm5, %v4818_v4, %v10414_v60  ;;  %vm10831_vm14 = vmmov %vm10801_vm5 }
 0x28d   : > { %v4819_v49 = vsel %vm10797_vm6, %v10796_v39, %v4818_v4  ;;  %v8890_v15 = vsel %vm10802_vm7, %v7370_v44, %v3133_v16  ;;  %v5669_v39 = vpop.eup %5668  ;;  %5670 = vrcp.f32 %v2412_v21  ;;  %v2413_v55 = vadd.f32 1.0, %v5667_v52  ;;  %vm10834_vm6 = vmmov %vm10784_vm1 }
 0x28e   : > { %10798 = vst [vmem:[#allocation42_spill] sm:$0xff] %v8877_v18  ;;  %v8883_v8 = vsel %vm3535_vm8, %v10799_v33, %v7395_v1  ;;  %v4907_v51 = vadd.f32 %v4819_v49, %v4674_v61  ;;  %10803 = vst [vmem:[#allocation44_spill] sm:$0xff] %v8890_v15  ;;  %v4908_v38 = vadd.f32 %v4821_v42, %v4675_v12  ;;  %5672 = vrcp.f32 %v2410_v53  ;;  %v10807_v42 = vld [vmem:[#allocation15_spill] sm:$0xff] }
 0x28f   : > { %10800 = vst [vmem:[#allocation43_spill] sm:$0xff] %v8883_v8  ;;  %v8894_v57 = vsel %vm10804_vm4, %v3133_v16, %v7370_v44  ;;  %v2411_v33 = vadd.f32 1.0, %v5669_v39  ;;  %v3218_v46 = vmul.f32 %v8890_v15, %v8393_v32  ;;  %5674 = vrcp.f32 %v2413_v55  ;;  %vm10835_vm5 = vmmov %vm10784_vm1 }
 0x290   : > { %10805 = vst [vmem:[#allocation45_spill] sm:$0xff] %v8894_v57  ;;  %v3219_v49 = vmul.f32 %v8894_v57, %v8383_v29  ;;  %v4936_v61 = vpack.c.bf16 %v4908_v38, %v4907_v51  ;;  %v3397_v4 = vrot.slane %v3324_v54, 1  ;;  %v10416_v60 = vrot.slane %v8877_v18, 1  ;;  %vm10836_vm7 = vmmov %vm10784_vm1 }
 0x291   : > { %5676 = vrcp.f32 %v2411_v33  ;;  %v3255_v12 = vmul.f32 %v7400_v19, %v3218_v46  ;;  %v10415_v16 = vrot.slane %v8868_v23, 7  ;;  %v8905_v53 = vmul.f32 %v7638_v2, %v4181_v63  ;;  %vm10840_vm4 = vmmov %vm10818_vm11 }
 0x292   : > { %v3256_v21 = vmul.f32 %v7400_v19, %v3219_v49  ;;  %v5000_v52 = vshrl.u32 %v4936_v61, 16  ;;  %v5003_v32 = vshll.u32 %v4936_v61, 16  ;;  %v10808_v39 = vrot.slane %v10807_v42, 1 }
 0x293   : > { %10806 = vst [vmem:[#allocation46_spill] sm:$0xff] %v8905_v53  ;;  %v10417_v38 = vrot.slane %v8864_v47, 1  ;;  %v3288_v51 = vadd.f32 %v8250_v58, %v3255_v12  ;;  %v8916_v54 = vsel %vm3535_vm8, %v7395_v1, %v10415_v16  ;;  %v3644_v63 = vmul.f32 %v8883_v8, %v8383_v29 }
 0x294   : > { %v3398_v55 = vsel %vm10809_vm10, %v10808_v39, %v3397_v4  ;;  %10810 = vst [vmem:[#allocation15_spill] sm:$0xff] %v8916_v54  ;;  %v5002_v33 = vrot.slane %v5000_v52, 3  ;;  %v5005_v46 = vrot.slane %v5003_v32, 4  ;;  %v3289_v49 = vadd.f32 %v8250_v58, %v3256_v21  ;;  %vm10841_vm10 = vmmov %vm10840_vm4 }
 0x295   : > { %v3645_v61 = vmul.f32 %v8916_v54, %v8405_v27  ;;  %v3400_v12 = vsel %vm10811_vm2, %v3397_v4, %v10416_v60  ;;  %v3482_v42 = vadd.f32 %v3398_v55, %v3288_v51  ;;  %v8927_v39 = vmul.f32 %v7443_v17, %v3644_v63  ;;  %vm10842_vm2 = vmmov %vm10840_vm4 }
 0x296   : > { %v3878_v16 = vmul.f32 %v8890_v15, %v8405_v27  ;;  %v3294_v29 = vadd.f32 %v8250_v58, %v8808_v25  ;;  %v10812_v52 = vrot.slane %v8706_v9, 7  ;;  %v8939_v32 = vor.u32 %v5005_v46, %v5002_v33 }
 0x297   : > { %v8942_v4 = vmul.f32 %v7443_v17, %v3645_v61  ;;  %v3851_v55 = vadd.f32 %v8821_v7, %v8816_v30  ;;  %v8948_v51 = vadd.f32 %v8832_v40, %v8823_v45  ;;  %v10418_v63 = vrot.slane %v8927_v39, 2  ;;  %v5671_v60 = vpop.eup %5670 }
 0x298   : > { %v8937_v21 = vsel %vm3535_vm8, %v7395_v1, %v10812_v52  ;;  %10814 = vst [vmem:[#allocation48_spill] sm:$0xff] %v8939_v32  ;;  %v8957_v33 = vsel %vm10784_vm1, %v7370_v44, %v10417_v38  ;;  %v8962_v30 = vsel %vm4954_vm0, %v8611_v20, %v8939_v32  ;;  %v8964_v7 = vadd.f32 %v3400_v12, %v3289_v49  ;;  %v5673_v45 = vpop.eup %5672  ;;  %vm10843_vm1 = vmmov %vm10842_vm2 }
 0x299   : > { %10813 = vst [vmem:[#allocation47_spill] sm:$0xff] %v8937_v21  ;;  %10815 = vst [vmem:[#allocation49_spill] sm:$0xff] %v8942_v4  ;;  %v8967_v40 = vmul.f32 %v5671_v60, %v8765_v22  ;;  %v10817_v46 = vrot.slane %v8607_v26, 2  ;;  %v8976_v38 = vmul.f32 %v8894_v57, %v8734_v36  ;;  %v8979_v52 = vmul.f32 %v7533_v28, %v3878_v16  ;;  %v5675_v20 = vpop.eup %5674 }
 0x29a   : > { %10816 = vst [vmem:[#allocation50_spill] sm:$0xff] %v8957_v33  ;;  %v8982_v49 = vmul.f32 %v5673_v45, %v8779_v34  ;;  %v8988_v12 = vadd.s32 112, %v7319_v13  ;;  %v10824_v34 = vld [vmem:[#allocation11_spill] sm:$0xff]  ;;  %v10826_v59 = vrot.slane %v8738_v5, 1 }
 0x29b   : > { %v3760_v61 = vsel %vm10818_vm11, %v10817_v46, %v10418_v63  ;;  %10819 = vst [vmem:[#allocation51_spill] sm:$0xff] %v8979_v52  ;;  %v5677_v26 = vpop.eup %5676  ;;  %v8991_v46 = vmul.f32 %v5675_v20, %v8788_v31  ;;  %v10823_v63 = vld [vmem:[#allocation8_spill] sm:$0xff]  ;;  %v3991_v16 = vmul.f32 %v10648_v6, %v8967_v40  ;;  %v4184_v45 = vmul.f32 %v10824_v34, %v8967_v40  ;;  %vm10848_vm11 = vmmov %vm10827_vm3 }
 0x29c   : > { %10820 = vst [vmem:[#allocation52_spill] sm:$0xff] %v8982_v49  ;;  %v8985_v60 = vadd.f32 %v3760_v61, %v3482_v42  ;;  %10822 = vst [vmem:[#allocation54_spill] sm:$0xff] %v8988_v12  ;;  %v3885_v25 = vmul.f32 %v10823_v63, %v8967_v40  ;;  %v9000_v22 = vmul.f32 %v5677_v26, %v8795_v48 }
 0x29d   : > { %v3225_v42 = vmul.f32 %v10823_v63, %v8982_v49  ;;  %v3330_v61 = vmul.f32 %v10669_v14, %v8982_v49  ;;  %v3650_v31 = vmul.f32 %v10824_v34, %v8982_v49  ;;  %v3883_v20 = vmul.f32 %v10764_v43, %v8982_v49 }
 0x29e   : > { %10821 = vst [vmem:[#allocation53_spill] sm:$0xff] %v8985_v60  ;;  %v3922_v18 = vmul.f32 %v7533_v28, %v3885_v25  ;;  %v3989_v27 = vmul.f32 %v10648_v6, %v8982_v49  ;;  %v9015_v48 = vmul.f32 %v10648_v6, %v8991_v46  ;;  %v9020_v23 = vmul.f32 %v10669_v14, %v9000_v22 }
 0x29f   : > { %v3262_v26 = vmul.f32 %v7400_v19, %v3225_v42  ;;  %v3409_v32 = vrot.slane %v3330_v61, 1  ;;  %v3651_v57 = vmul.f32 %v10825_v50, %v9000_v22  ;;  %v3687_v15 = vmul.f32 %v7443_v17, %v3650_v31 }
 0x2a0   : > { %v3884_v25 = vmul.f32 %v10782_v24, %v9000_v22  ;;  %v3920_v54 = vmul.f32 %v7533_v28, %v3883_v20  ;;  %v3990_v8 = vmul.f32 %v10648_v6, %v9000_v22  ;;  %v10441_v61 = vrot.slane %v9020_v23, 1 }
 0x2a1   : > { %v3295_v42 = vadd.f32 %v8250_v58, %v3262_v26  ;;  %v3410_v36 = vsel %vm10827_vm3, %v10826_v59, %v3409_v32  ;;  %v9036_v52 = vmul.f32 %v7443_v17, %v3651_v57  ;;  %v3771_v60 = vrot.slane %v3687_v15, 2 }
 0x2a2   : > { %v3488_v31 = vadd.f32 %v3410_v36, %v3294_v29  ;;  %v3921_v9 = vmul.f32 %v7533_v28, %v3884_v25  ;;  %v3953_v1 = vadd.f32 %v3920_v54, %v3851_v55  ;;  %v3412_v20 = vsel %vm10828_vm12, %v3409_v32, %v10441_v61  ;;  %vm10849_vm12 = vmmov %vm10843_vm1 }
 0x2a3   : > { %v10440_v58 = vrot.slane %v9036_v52, 2  ;;  %v4068_v26 = vrot.slane %v3989_v27, 1  ;;  %v4070_v5 = vrot.slane %v3990_v8, 1  ;;  %v3489_v33 = vadd.f32 %v3412_v20, %v3295_v42 }
 0x2a4   : > { %v10829_v59 = vrot.slane %v8768_v56, 2  ;;  %v4072_v57 = vrot.slane %v3991_v16, 1  ;;  %v10439_v36 = vrot.slane %v9015_v48, 1  ;;  %v10832_v29 = vrot.slane %v8853_v35, 1 }
 0x2a5   : > { %v3774_v15 = vsel %vm10831_vm14, %v3771_v60, %v10440_v58  ;;  %v4071_v27 = vsel %vm10834_vm6, %v4068_v26, %v4070_v5  ;;  %vm10854_vm14 = vmmov %vm10827_vm3 }
 0x2a6   : > { %v3772_v21 = vsel %vm10830_vm13, %v10829_v59, %v3771_v60  ;;  %v4069_v32 = vsel %vm10833_vm15, %v10832_v29, %v4068_v26  ;;  %v3853_v8 = vadd.f32 %v3774_v15, %v3489_v33  ;;  %v4073_v55 = vsel %vm10835_vm5, %v4070_v5, %v4072_v57  ;;  %v10837_v60 = vld [vmem:[#allocation26_spill] sm:$0xff]  ;;  %vm10852_vm13 = vmmov %vm10843_vm1 }
 0x2a7   : > { %v3852_v54 = vadd.f32 %v3772_v21, %v3488_v31  ;;  %v4075_v56 = vsel %vm10836_vm7, %v4072_v57, %v10439_v36  ;;  %v4149_v16 = vadd.f32 %v4069_v32, %v8948_v51  ;;  %v4150_v42 = vadd.f32 %v4071_v27, %v3953_v1  ;;  %v5474_v57 = vpop.f32.mrb[20].mxu0  ;;  %vm10855_vm15 = vmmov %vm10827_vm3 }
 0x2a8   : > { %v4182_v21 = vmul.f32 %v10767_v10, %v8982_v49  ;;  %v4183_v31 = vmul.f32 %v10837_v60, %v9000_v22  ;;  %v3955_v20 = vadd.f32 %v3922_v18, %v3853_v8  ;;  %v4185_v33 = vmul.f32 %v10825_v50, %v8991_v46  ;;  %v2251_v32 = vpop.f32.mrb[21].mxu0  ;;  %vm10857_vm6 = vmmov %vm10843_vm1 }
 0x2a9   : > { %v3954_v25 = vadd.f32 %v3921_v9, %v3852_v54  ;;  %v4221_v26 = vmul.f32 %v7638_v2, %v4184_v45  ;;  %v4416_v5 = vmul.f32 %v10771_v41, %v9000_v22  ;;  %v4417_v9 = vmul.f32 %v10764_v43, %v8967_v40  ;;  %v9080_v41 = vld [vmem:[%s10311_s2] ss:$0 sm:$0xff]  ;;  %vm10859_vm5 = vmmov %vm10843_vm1 }
 0x2aa   : > { %v4219_v51 = vmul.f32 %v7638_v2, %v4182_v21  ;;  %v4220_v1 = vmul.f32 %v7638_v2, %v4183_v31  ;;  %v4152_v15 = vadd.f32 %v4075_v56, %v3955_v20  ;;  %v9073_v18 = vmul.f32 %v7638_v2, %v4185_v33  ;;  %10838 = vst [vmem:[#allocation8_spill] sm:$0xff] %v9080_v41  ;;  %v5475_v56 = vpop.f32.mrb[22].mxu0 }
 0x2ab   : > { %v4151_v59 = vadd.f32 %v4073_v55, %v3954_v25  ;;  %v4304_v54 = vrot.slane %v4221_v26, 2  ;;  %v4418_v45 = vmul.f32 %v10782_v24, %v8991_v46  ;;  %v9083_v29 = vadd.f32 %v9080_v41, %v5474_v57  ;;  %v2254_v33 = vpop.f32.mrb[23].mxu0 }
 0x2ac   : > { %v4300_v27 = vrot.slane %v4219_v51, 2  ;;  %v4302_v43 = vrot.slane %v4220_v1, 2  ;;  %v4453_v8 = vmul.f32 %v7643_v0, %v4416_v5  ;;  %v9087_v55 = vadd.f32 %v9080_v41, %v2251_v32 }
 0x2ad   : > { %v10443_v25 = vrot.slane %v9073_v18, 2  ;;  %v4454_v24 = vmul.f32 %v7643_v0, %v4417_v9  ;;  %v4455_v21 = vmul.f32 %v7643_v0, %v4418_v45  ;;  %v5385_v31 = vmul.f32 -1.442695, %v9083_v29 }
 0x2ae   : > { %v9094_v20 = vadd.f32 %v9080_v41, %v5475_v56  ;;  %v10839_v26 = vrot.slane %v8905_v53, 2  ;;  %v4303_v51 = vsel %vm10841_vm10, %v4300_v27, %v4302_v43  ;;  %v5383_v1 = vmul.f32 -1.442695, %v9087_v55 }
 0x2af   : > { %v9102_v57 = vadd.f32 %v9080_v41, %v2254_v33  ;;  %v4305_v9 = vsel %vm10842_vm2, %v4302_v43, %v4304_v54  ;;  %v4307_v45 = vsel %vm10843_vm1, %v4304_v54, %v10443_v25  ;;  %5678 = vpow2.f32 %v5385_v31  ;;  %v10845_v31 = vld [vmem:[#allocation18_spill] sm:$0xff] }
 0x2b0   : > { %v4301_v5 = vsel %vm10840_vm4, %v10839_v26, %v4300_v27  ;;  %v5386_v32 = vmul.f32 -1.442695, %v9094_v20  ;;  %v4384_v36 = vadd.f32 %v4303_v51, %v4150_v42  ;;  %5680 = vpow2.f32 %v5383_v1  ;;  %v10846_v51 = vld [vmem:[#allocation17_spill] sm:$0xff]  ;;  %vm10864_vm4 = vmmov %vm10843_vm1 }
 0x2b1   : > { %v4383_v56 = vadd.f32 %v4301_v5, %v4149_v16  ;;  %v5384_v26 = vmul.f32 -1.442695, %v9102_v57  ;;  %v4385_v27 = vadd.f32 %v4305_v9, %v4151_v59  ;;  %v9110_v58 = vadd.f32 %v4307_v45, %v4152_v15  ;;  %vm10868_vm1 = vmmov %vm10827_vm3 }
 0x2b2   : > { %5682 = vpow2.f32 %v5386_v32  ;;  %v4487_v61 = vadd.f32 %v4454_v24, %v4384_v36  ;;  %v9114_v43 = vmul.f32 %v7652_v11, %v9000_v22  ;;  %v4523_v16 = vmul.f32 %v7652_v11, %v8967_v40 }
 0x2b3   : > { %v4486_v33 = vadd.f32 %v4453_v8, %v4383_v56  ;;  %5684 = vpow2.f32 %v5384_v26  ;;  %v9116_v54 = vadd.f32 %v4455_v21, %v4385_v27  ;;  %v9122_v42 = vmul.f32 %v7652_v11, %v8991_v46 }
 0x2b4   : > { %10844 = vst [vmem:[#allocation11_spill] sm:$0xff] %v9114_v43  ;;  %v10442_v59 = vrot.slane %v9114_v43, 1  ;;  %v4712_v15 = vmul.f32 %v10773_v37, %v9000_v22  ;;  %v4713_v36 = vmul.f32 %v10767_v10, %v8967_v40  ;;  %v4714_v8 = vmul.f32 %v10837_v60, %v8991_v46 }
 0x2b5   : > { %v4600_v24 = vrot.slane %v4523_v16, 1  ;;  %v10444_v21 = vrot.slane %v9122_v42, 1  ;;  %v3226_v5 = vmul.f32 %v10845_v31, %v9000_v22  ;;  %v3227_v1 = vmul.f32 %v10846_v51, %v8967_v40 }
 0x2b6   : > { %v9137_v9 = vmul.f32 %v8846_v3, %v4712_v15  ;;  %v4749_v37 = vmul.f32 %v8846_v3, %v4713_v36  ;;  %v9141_v45 = vmul.f32 %v8846_v3, %v4714_v8  ;;  %v3332_v10 = vmul.f32 %v10669_v14, %v8967_v40  ;;  %v9158_v8 = vld [vmem:[%s10313_s4] ss:$0 sm:$0xff] }
 0x2b7   : > { %v4601_v60 = vsel %vm10848_vm11, %v10442_v59, %v4600_v24  ;;  %v4603_v22 = vsel %vm10827_vm3, %v4600_v24, %v10444_v21  ;;  %v3263_v32 = vmul.f32 %v7400_v19, %v3226_v5  ;;  %v3264_v56 = vmul.f32 %v7400_v19, %v3227_v1  ;;  %vm10871_vm11 = vmmov %vm10868_vm1 }
 0x2b8   : > { %10847 = vst [vmem:[#allocation19_spill] sm:$0xff] %v9137_v9  ;;  %v4680_v26 = vadd.f32 %v4601_v60, %v4486_v33  ;;  %v4681_v27 = vadd.f32 %v4603_v22, %v4487_v61  ;;  %v10451_v16 = vrot.slane %v9137_v9, 2  ;;  %v4830_v15 = vrot.slane %v4749_v37, 2  ;;  %v10850_v37 = vld [vmem:[#allocation27_spill] sm:$0xff]  ;;  %v10851_v22 = vld [vmem:[#allocation28_spill] sm:$0xff]  ;;  %vm10873_vm3 = vmmov %vm10868_vm1 }
 0x2b9   : > { %v10455_v36 = vrot.slane %v9141_v45, 2  ;;  %v3296_v59 = vadd.f32 %v9158_v8, %v3263_v32  ;;  %v3297_v24 = vadd.f32 %v9158_v8, %v3264_v56  ;;  %v9164_v5 = vmul.f32 %v10669_v14, %v8991_v46  ;;  %v5679_v33 = vpop.eup %5678 }
 0x2ba   : > { %v4831_v61 = vsel %vm10849_vm12, %v10451_v16, %v4830_v15  ;;  %v3413_v1 = vrot.slane %v3332_v10, 1  ;;  %v3652_v60 = vmul.f32 %v10850_v37, %v8967_v40  ;;  %v3653_v25 = vmul.f32 %v10851_v22, %v8991_v46  ;;  %v5681_v21 = vpop.eup %5680  ;;  %vm10874_vm12 = vmmov %vm10868_vm1 }
 0x2bb   : > { %v2416_v32 = vadd.f32 1.0, %v5679_v33  ;;  %v4833_v56 = vsel %vm10852_vm13, %v4830_v15, %v10455_v36  ;;  %v4913_v43 = vadd.f32 %v4831_v61, %v4680_v26  ;;  %v10457_v53 = vrot.slane %v9164_v5, 1  ;;  %vm10876_vm13 = vmmov %vm10864_vm4 }
 0x2bc   : > { %v5683_v35 = vpop.eup %5682  ;;  %v2414_v9 = vadd.f32 1.0, %v5681_v21  ;;  %v4914_v49 = vadd.f32 %v4833_v56, %v4681_v27  ;;  %v10853_v10 = vrot.slane %v9020_v23, 1  ;;  %v3689_v40 = vmul.f32 %v7443_v17, %v3652_v60 }
 0x2bd   : > { %v5685_v41 = vpop.eup %5684  ;;  %5686 = vrcp.f32 %v2416_v32  ;;  %v2417_v14 = vadd.f32 1.0, %v5683_v35  ;;  %v3416_v33 = vsel %vm10855_vm15, %v3413_v1, %v10457_v53  ;;  %v9185_v21 = vmul.f32 %v7443_v17, %v3653_v25  ;;  %vm10878_vm15 = vmmov %vm10868_vm1 }
 0x2be   : > { %v3414_v16 = vsel %vm10854_vm14, %v10853_v10, %v3413_v1  ;;  %5688 = vrcp.f32 %v2414_v9  ;;  %v2415_v26 = vadd.f32 1.0, %v5685_v41  ;;  %v4939_v61 = vpack.c.bf16 %v4914_v49, %v4913_v43  ;;  %v10858_v41 = vld [vmem:[#allocation10_spill] sm:$0xff]  ;;  %vm10877_vm14 = vmmov %vm10864_vm4 }
 0x2bf   : > { %v3490_v15 = vadd.f32 %v3414_v16, %v3296_v59  ;;  %v3491_v36 = vadd.f32 %v3416_v33, %v3297_v24  ;;  %5690 = vrcp.f32 %v2417_v14  ;;  %v3775_v23 = vrot.slane %v3689_v40, 2 }
 0x2c0   : > { %v3886_v27 = vmul.f32 %v10845_v31, %v8991_v46  ;;  %5692 = vrcp.f32 %v2415_v26  ;;  %v5027_v60 = vshrl.u32 %v4939_v61, 16  ;;  %v5030_v35 = vshll.u32 %v4939_v61, 16 }
 0x2c1   : > { %v2554_v32 = vadd.s32 248, %v7319_v13  ;;  %v10856_v1 = vrot.slane %v9036_v52, 2  ;;  %v10456_v49 = vrot.slane %v9185_v21, 2  ;;  %v3228_v25 = vmul.f32 %v10858_v41, %v8991_v46 }
 0x2c2   : > { %v3923_v14 = vmul.f32 %v7533_v28, %v3886_v27  ;;  %v5029_v43 = vrot.slane %v5027_v60, 3  ;;  %v5032_v9 = vrot.slane %v5030_v35, 4  ;;  %v2552_v52 = vadd.s32 232, %v7319_v13 }
 0x2c3   : > { %v3776_v59 = vsel %vm10857_vm6, %v10856_v1, %v3775_v23  ;;  %v2776_v24 = vand.u32 15, %v2554_v32  ;;  %v3778_v56 = vsel %vm10859_vm5, %v3775_v23, %v10456_v49  ;;  %v3265_v10 = vmul.f32 %v7400_v19, %v3228_v25  ;;  %vm10880_vm6 = vmmov %vm10864_vm4 }
 0x2c4   : > { %v3854_v16 = vadd.f32 %v3776_v59, %v3490_v15  ;;  %v2553_v40 = vadd.s32 240, %v7319_v13  ;;  %v3855_v33 = vadd.f32 %v3778_v56, %v3491_v36  ;;  %v9205_v46 = vmul.f32 %v7533_v28, %v8976_v38  ;;  %vm10881_vm5 = vmmov %vm10868_vm1 }
 0x2c5   : > { %vm3034_vm7 = vcmp.le.s32.totalorder %v2776_v24, 14  ;;  %v2762_v61 = vand.u32 15, %v2552_v52  ;;  %v9209_v23 = vor.u32 %v5032_v9, %v5029_v43  ;;  %v9212_v35 = vadd.f32 %v9158_v8, %v3265_v10 }
 0x2c6   : > { %v3956_v26 = vadd.f32 %v3923_v14, %v3854_v16  ;;  %v3066_v15 = vsel %vm3034_vm7, 1.0, %v10573_v62  ;;  %v2769_v27 = vand.u32 15, %v2553_v40  ;;  %v9216_v36 = vsel %vm1702_vm9, %v8962_v30, 0  ;;  %vm10882_vm7 = vmmov %vm10864_vm4 }
 0x2c7   : > { %10860 = vst [vmem:[#allocation26_spill] sm:$0xff] %v9209_v23  ;;  %10861 = vst [vmem:[#allocation18_spill] sm:$0xff] %v9216_v36  ;;  %v10862_v32 = vrot.slane %v8942_v4, 2  ;;  %v10863_v38 = vrot.slane %v8927_v39, 2  ;;  %v5687_v59 = vpop.eup %5686  ;;  %v9223_v14 = vrot.slane %v3066_v15, 7  ;;  %vm3032_vm2 = vcmp.le.s32.totalorder %v2762_v61, 14 }
 0x2c8   : > { %vm2969_vm10 = vcmp.ge.s32.totalorder %v2769_v27, 1  ;;  %v9226_v25 = vadd.s32 216, %v7319_v13  ;;  %v5689_v43 = vpop.eup %5688  ;;  %v9229_v9 = vmul.f32 %v5687_v59, %v9083_v29  ;;  %v10867_v39 = vrot.slane %v8864_v47, 1 }
 0x2c9   : > { %v3762_v1 = vsel %vm10864_vm4, %v10863_v38, %v10862_v32  ;;  %10865 = vst [vmem:[#allocation17_spill] sm:$0xff] %v9223_v14  ;;  %v9232_v30 = vsel %vm2969_vm10, 1.0, %v10573_v62  ;;  %v9241_v24 = vadd.s32 224, %v7319_v13  ;;  %v5691_v56 = vpop.eup %5690  ;;  %v9244_v10 = vmul.f32 %v5689_v43, %v9087_v55  ;;  %vm10883_vm4 = vmmov %vm10868_vm1 }
 0x2ca   : > { %10866 = vst [vmem:[#allocation27_spill] sm:$0xff] %v9232_v30  ;;  %v9238_v16 = vsel %vm10868_vm1, %v10867_v39, %v7370_v44  ;;  %v9247_v52 = vsel %vm3032_vm2, 1.0, %v10573_v62  ;;  %v9251_v40 = vadd.f32 %v3762_v1, %v8964_v7  ;;  %v5693_v15 = vpop.eup %5692  ;;  %v9254_v47 = vmul.f32 %v5691_v56, %v9094_v20  ;;  %vm10884_vm10 = vmmov %vm10880_vm6 }
 0x2cb   : > { %10869 = vst [vmem:[#allocation28_spill] sm:$0xff] %v9247_v52  ;;  %v4421_v13 = vmul.f32 %v10846_v51, %v9229_v9  ;;  %v4527_v61 = vmul.f32 %v7652_v11, %v9229_v9  ;;  %v4717_v55 = vmul.f32 %v10850_v37, %v9229_v9  ;;  %v9263_v27 = vmul.f32 %v5693_v15, %v9102_v57  ;;  %vm10886_vm2 = vmmov %vm10880_vm6 }
 0x2cc   : > { %v4419_v7 = vmul.f32 %v10823_v63, %v9244_v10  ;;  %v4525_v32 = vmul.f32 %v7652_v11, %v9244_v10  ;;  %v4715_v20 = vmul.f32 %v10824_v34, %v9244_v10  ;;  %v3887_v38 = vmul.f32 %v10846_v51, %v9244_v10 }
 0x2cd   : > { %v3993_v1 = vmul.f32 %v10648_v6, %v9244_v10  ;;  %v4186_v59 = vmul.f32 %v10850_v37, %v9244_v10  ;;  %v4458_v57 = vmul.f32 %v7643_v0, %v4421_v13  ;;  %v4526_v63 = vmul.f32 %v7652_v11, %v9263_v27 }
 0x2ce   : > { %v4456_v43 = vmul.f32 %v7643_v0, %v4419_v7  ;;  %v4604_v39 = vrot.slane %v4525_v32, 1  ;;  %v4716_v34 = vmul.f32 %v10825_v50, %v9263_v27  ;;  %v4751_v56 = vmul.f32 %v8846_v3, %v4715_v20 }
 0x2cf   : > { %v3924_v51 = vmul.f32 %v7533_v28, %v3887_v38  ;;  %v9287_v15 = vmul.f32 %v10648_v6, %v9263_v27  ;;  %v4076_v37 = vrot.slane %v3993_v1, 1  ;;  %v10870_v7 = vrot.slane %v9122_v42, 1 }
 0x2d0   : > { %v4489_v13 = vadd.f32 %v4456_v43, %v9110_v58  ;;  %v4606_v29 = vrot.slane %v4526_v63, 1  ;;  %v4752_v32 = vmul.f32 %v8846_v3, %v4716_v34  ;;  %v4834_v49 = vrot.slane %v4751_v56, 2 }
 0x2d1   : > { %v4605_v60 = vsel %vm10871_vm11, %v10870_v7, %v4604_v39  ;;  %v3957_v20 = vadd.f32 %v3924_v51, %v3855_v33  ;;  %v10872_v38 = vrot.slane %v9015_v48, 1  ;;  %v4078_v58 = vrot.slane %v9287_v15, 1  ;;  %vm10893_vm11 = vmmov %vm10868_vm1 }
 0x2d2   : > { %v4682_v50 = vadd.f32 %v4605_v60, %v9116_v54  ;;  %v4607_v4 = vsel %vm10874_vm12, %v4604_v39, %v4606_v29  ;;  %v4836_v1 = vrot.slane %v4752_v32, 2  ;;  %v10875_v7 = vrot.slane %v9141_v45, 2  ;;  %vm10896_vm12 = vmmov %vm10886_vm2 }
 0x2d3   : > { %v4077_v53 = vsel %vm10873_vm3, %v10872_v38, %v4076_v37  ;;  %v4683_v42 = vadd.f32 %v4607_v4, %v4489_v13  ;;  %v4187_v54 = vmul.f32 %v10851_v22, %v9263_v27  ;;  %v4223_v33 = vmul.f32 %v7638_v2, %v4186_v59  ;;  %vm10895_vm3 = vmmov %vm10886_vm2 }
 0x2d4   : > { %v4153_v43 = vadd.f32 %v4077_v53, %v3956_v26  ;;  %v4835_v63 = vsel %vm10876_vm13, %v10875_v7, %v4834_v49  ;;  %v4837_v48 = vsel %vm10877_vm14, %v4834_v49, %v4836_v1  ;;  %v4079_v39 = vsel %vm10878_vm15, %v4076_v37, %v4078_v58  ;;  %vm10898_vm13 = vmmov %vm10868_vm1 }
 0x2d5   : > { %v4915_v60 = vadd.f32 %v4835_v63, %v4682_v50  ;;  %v4420_v53 = vmul.f32 %v10845_v31, %v9263_v27  ;;  %v4916_v4 = vadd.f32 %v4837_v48, %v4683_v42  ;;  %v4154_v26 = vadd.f32 %v4079_v39, %v3957_v20  ;;  %vm10899_vm14 = vmmov %vm10868_vm1 }
 0x2d6   : > { %v9313_v45 = vmul.f32 %v7638_v2, %v4187_v54  ;;  %v4308_v34 = vrot.slane %v4223_v33, 2  ;;  %v9318_v59 = vmul.f32 %v7652_v11, %v9254_v47  ;;  %v4608_v49 = vrot.slane %v4527_v61, 1  ;;  %vm10902_vm15 = vmmov %vm10886_vm2 }
 0x2d7   : > { %v4457_v56 = vmul.f32 %v7643_v0, %v4420_v53  ;;  %v4718_v51 = vmul.f32 %v10851_v22, %v9254_v47  ;;  %v4940_v37 = vpack.c.bf16 %v4916_v4, %v4915_v60  ;;  %v10879_v13 = vrot.slane %v9073_v18, 2  ;;  %v10885_v60 = vld [vmem:[#allocation33_spill] sm:$0xff] }
 0x2d8   : > { %v4310_v32 = vrot.slane %v9313_v45, 2  ;;  %v4753_v50 = vmul.f32 %v8846_v3, %v4717_v55  ;;  %v4609_v38 = vsel %vm10881_vm5, %v4606_v29, %v4608_v49  ;;  %v10460_v42 = vrot.slane %v9318_v59, 1  ;;  %vm10907_vm5 = vmmov %vm10868_vm1 }
 0x2d9   : > { %v4309_v31 = vsel %vm10880_vm6, %v10879_v13, %v4308_v34  ;;  %v9330_v7 = vmul.f32 %v8846_v3, %v4718_v51  ;;  %v5036_v61 = vshrl.u32 %v4940_v37, 16  ;;  %v5039_v63 = vshll.u32 %v4940_v37, 16  ;;  %vm10903_vm6 = vmmov %vm10886_vm2 }
 0x2da   : > { %v4387_v20 = vadd.f32 %v4309_v31, %v4153_v43  ;;  %v4311_v18 = vsel %vm10882_vm7, %v4308_v34, %v4310_v32  ;;  %v4838_v22 = vrot.slane %v4753_v50, 2  ;;  %v4611_v55 = vsel %vm10883_vm4, %v4608_v49, %v10460_v42  ;;  %v10887_v34 = vld [vmem:[#allocation7_spill] sm:$0xff]  ;;  %vm10908_vm7 = vmmov %vm10868_vm1 }
 0x2db   : > { %v4388_v54 = vadd.f32 %v4311_v18, %v4154_v26  ;;  %v10459_v29 = vrot.slane %v9330_v7, 2  ;;  %v5038_v43 = vrot.slane %v5036_v61, 3  ;;  %v5041_v48 = vrot.slane %v5039_v63, 4 }
 0x2dc   : > { %v4490_v33 = vadd.f32 %v4457_v56, %v4387_v20  ;;  %v4839_v3 = vsel %vm10884_vm10, %v4836_v1, %v4838_v22  ;;  %v3229_v39 = vmul.f32 %v10885_v60, %v9244_v10  ;;  %v3334_v56 = vmul.f32 %v10887_v34, %v9244_v10  ;;  %v10888_v1 = vld [vmem:[#allocation34_spill] sm:$0xff]  ;;  %v10889_v20 = vld [vmem:[#allocation35_spill] sm:$0xff]  ;;  %vm10911_vm10 = vmmov %vm10868_vm1 }
 0x2dd   : > { %v4491_v53 = vadd.f32 %v4458_v57, %v4388_v54  ;;  %v4841_v26 = vsel %vm10886_vm2, %v4838_v22, %v10459_v29  ;;  %v5042_v51 = vor.u32 %v5041_v48, %v5038_v43  ;;  %v9350_v37 = vmul.f32 %v10887_v34, %v9263_v27  ;;  %v5478_v54 = vpop.f32.mrb[24].mxu0 }
 0x2de   : > { %v4684_v4 = vadd.f32 %v4609_v38, %v4490_v33  ;;  %v3266_v49 = vmul.f32 %v7400_v19, %v3229_v39  ;;  %v3654_v13 = vmul.f32 %v10888_v1, %v9244_v10  ;;  %v3417_v50 = vrot.slane %v3334_v56, 1 }
 0x2df   : > { %v4685_v31 = vadd.f32 %v4611_v55, %v4491_v53  ;;  %v3655_v38 = vmul.f32 %v10889_v20, %v9263_v27  ;;  %v5043_v61 = vsel %vm4954_vm0, %v9209_v23, %v5042_v51  ;;  %v10461_v18 = vrot.slane %v9350_v37, 1  ;;  %v2267_v53 = vpop.f32.mrb[25].mxu0 }
 0x2e0   : > { %v4917_v57 = vadd.f32 %v4839_v3, %v4684_v4  ;;  %v3299_v63 = vadd.f32 %v9158_v8, %v3266_v49  ;;  %v3691_v22 = vmul.f32 %v7443_v17, %v3654_v13  ;;  %5485 = vmatprep.subr.msk.bf16.mxu1 %vm1702_vm9, %v5043_v61  ;;  %v10890_v10 = vrot.slane %v9164_v5, 1  ;;  %v10891_v3 = vld [vmem:[#allocation8_spill] sm:$0xff]  ;;  %v5479_v13 = vpop.f32.mrb[26].mxu0 }
 0x2e1   : > { %v4918_v33 = vadd.f32 %v4841_v26, %v4685_v31  ;;  %v9366_v43 = vmul.f32 %v7443_v17, %v3655_v38  ;;  %v3888_v48 = vmul.f32 %v10858_v41, %v9263_v27  ;;  %v9371_v39 = vadd.f32 %v10891_v3, %v5478_v54  ;;  %v10892_v4 = vld [vmem:[#allocation12_spill] sm:$0xff] }
 0x2e2   : > { %v3418_v55 = vsel %vm10868_vm1, %v10890_v10, %v3417_v50  ;;  %5427 = vmatpush3.bf16.xpose.msra.mxu1 %v10892_v4  ;;  %v3420_v26 = vsel %vm10893_vm11, %v3417_v50, %v10461_v18  ;;  %v3779_v56 = vrot.slane %v3691_v22, 2  ;;  %v9379_v49 = vadd.f32 %v10891_v3, %v2267_v53  ;;  %v2270_v4 = vpop.f32.mrb[27].mxu0  ;;  %vm10916_vm11 = vmmov %vm10886_vm2 }
 0x2e3   : > { %v3492_v5 = vadd.f32 %v3418_v55, %v9212_v35  ;;  %v4941_v31 = vpack.c.bf16 %v4918_v33, %v4917_v57  ;;  %v3493_v38 = vadd.f32 %v3420_v26, %v3299_v63  ;;  %v10463_v61 = vrot.slane %v9366_v43, 2 }
 0x2e4   : > { %v5389_v54 = vmul.f32 -1.442695, %v9371_v39  ;;  %v9384_v10 = vadd.f32 %v10891_v3, %v5479_v13  ;;  %v10894_v29 = vrot.slane %v9185_v21, 2  ;;  %v3889_v35 = vmul.f32 %v10885_v60, %v9229_v9 }
 0x2e5   : > { %v5387_v22 = vmul.f32 -1.442695, %v9379_v49  ;;  %v9393_v57 = vadd.f32 %v10891_v3, %v2270_v4  ;;  %v5045_v63 = vshrl.u32 %v4941_v31, 16  ;;  %v5048_v33 = vshll.u32 %v4941_v31, 16 }
 0x2e6   : > { %v3780_v50 = vsel %vm10895_vm3, %v10894_v29, %v3779_v56  ;;  %5694 = vpow2.f32 %v5389_v54  ;;  %v5390_v55 = vmul.f32 -1.442695, %v9384_v10  ;;  %v3782_v53 = vsel %vm10896_vm12, %v3779_v56, %v10463_v61  ;;  %vm10926_vm3 = vmmov %vm10907_vm5 }
 0x2e7   : > { %v3856_v21 = vadd.f32 %v3780_v50, %v3492_v5  ;;  %5696 = vpow2.f32 %v5387_v22  ;;  %v5388_v29 = vmul.f32 -1.442695, %v9393_v57  ;;  %v5047_v26 = vrot.slane %v5045_v63, 3  ;;  %vm10927_vm12 = vmmov %vm10926_vm3 }
 0x2e8   : > { %v5050_v13 = vrot.slane %v5048_v33, 4  ;;  %5698 = vpow2.f32 %v5390_v55  ;;  %v3857_v42 = vadd.f32 %v3782_v53, %v3493_v38  ;;  %v3925_v4 = vmul.f32 %v7533_v28, %v3888_v48 }
 0x2e9   : > { %v3926_v18 = vmul.f32 %v7533_v28, %v3889_v35  ;;  %5700 = vpow2.f32 %v5388_v29  ;;  %v3995_v54 = vmul.f32 %v10648_v6, %v9229_v9  ;;  %v9408_v5 = vmul.f32 %v10648_v6, %v9254_v47 }
 0x2ea   : > { %v9402_v31 = vor.u32 %v5050_v13, %v5047_v26  ;;  %v3958_v56 = vadd.f32 %v3925_v4, %v3856_v21  ;;  %v4188_v22 = vmul.f32 %v10888_v1, %v9229_v9  ;;  %v4189_v48 = vmul.f32 %v10889_v20, %v9254_v47  ;;  %v10897_v21 = vld [vmem:[#allocation13_spill] sm:$0xff] }
 0x2eb   : > { %v3959_v50 = vadd.f32 %v3926_v18, %v3857_v42  ;;  %v4080_v35 = vrot.slane %v3995_v54, 1  ;;  %v10462_v63 = vrot.slane %v9408_v5, 1  ;;  %v4422_v33 = vmul.f32 %v10858_v41, %v9254_v47  ;;  %v10900_v26 = vld [vmem:[#allocation21_spill] sm:$0xff] }
 0x2ec   : > { %v5052_v38 = vsel %vm4954_vm0, %v5042_v51, %v9402_v31  ;;  %v4225_v55 = vmul.f32 %v7638_v2, %v4188_v22  ;;  %v9422_v42 = vmul.f32 %v7638_v2, %v4189_v48  ;;  %v2748_v53 = vand.u32 15, %v9226_v25  ;;  %v10901_v48 = vld [vmem:[#allocation37_spill] sm:$0xff] }
 0x2ed   : > { %5486 = vmatprep.subr.msk.bf16.mxu1 %vm1702_vm9, %v5052_v38  ;;  %v4081_v51 = vsel %vm10898_vm13, %v4078_v58, %v4080_v35  ;;  %v4083_v41 = vsel %vm10899_vm14, %v4080_v35, %v10462_v63  ;;  %v4459_v29 = vmul.f32 %v7643_v0, %v4422_v33  ;;  %v3230_v13 = vmul.f32 %v10900_v26, %v9263_v27  ;;  %vm10936_vm13 = vmmov %vm10926_vm3 }
 0x2ee   : > { %5429 = vmatpush3.bf16.xpose.msra.mxu1 %v10897_v21  ;;  %v4155_v4 = vadd.f32 %v4081_v51, %v3958_v56  ;;  %v4156_v54 = vadd.f32 %v4083_v41, %v3959_v50  ;;  %v4312_v22 = vrot.slane %v4225_v55, 2  ;;  %v10466_v25 = vrot.slane %v9422_v42, 2  ;;  %v10904_v50 = vld [vmem:[#allocation25_spill] sm:$0xff]  ;;  %v10905_v21 = vld [vmem:[#allocation47_spill] sm:$0xff]  ;;  %vm10937_vm14 = vmmov %vm10926_vm3 }
 0x2ef   : > { %v3231_v38 = vmul.f32 %v10901_v48, %v9229_v9  ;;  %v3267_v15 = vmul.f32 %v7400_v19, %v3230_v13  ;;  %v3336_v58 = vmul.f32 %v10887_v34, %v9229_v9  ;;  %v9444_v35 = vmul.f32 %v10887_v34, %v9254_v47 }
 0x2f0   : > { %v5695_v33 = vpop.eup %5694  ;;  %v4313_v27 = vsel %vm10902_vm15, %v4310_v32, %v4312_v22  ;;  %v4315_v56 = vsel %vm10903_vm6, %v4312_v22, %v10466_v25  ;;  %v3656_v55 = vmul.f32 %v10904_v50, %v9229_v9  ;;  %v3657_v51 = vmul.f32 %v10905_v21, %v9254_v47  ;;  %vm10939_vm15 = vmmov %vm10886_vm2 }
 0x2f1   : > { %v5697_v41 = vpop.eup %5696  ;;  %v2420_v13 = vadd.f32 1.0, %v5695_v33  ;;  %v4389_v63 = vadd.f32 %v4313_v27, %v4155_v4  ;;  %v9456_v18 = vadd.f32 %v4315_v56, %v4156_v54  ;;  %v3268_v61 = vmul.f32 %v7400_v19, %v3231_v38  ;;  %vm10940_vm6 = vmmov %vm10886_vm2 }
 0x2f2   : > { %v5699_v45 = vpop.eup %5698  ;;  %v2418_v23 = vadd.f32 1.0, %v5697_v41  ;;  %v3300_v32 = vadd.f32 %v9158_v8, %v3267_v15  ;;  %v3421_v12 = vrot.slane %v3336_v58, 1  ;;  %v10469_v22 = vrot.slane %v9444_v35, 1  ;;  %v10913_v41 = vld [vmem:[#allocation36_spill] sm:$0xff] }
 0x2f3   : > { %v5701_v25 = vpop.eup %5700  ;;  %5702 = vrcp.f32 %v2420_v13  ;;  %v2421_v9 = vadd.f32 1.0, %v5699_v45  ;;  %v9461_v36 = vadd.f32 %v4459_v29, %v4389_v63  ;;  %v3301_v14 = vadd.f32 %v9158_v8, %v3268_v61  ;;  %v10909_v29 = vld [vmem:[#allocation50_spill] sm:$0xff] }
 0x2f4   : > { %5704 = vrcp.f32 %v2418_v23  ;;  %v2419_v4 = vadd.f32 1.0, %v5701_v25  ;;  %v10906_v54 = vrot.slane %v9350_v37, 1  ;;  %v3424_v15 = vsel %vm10908_vm7, %v3421_v12, %v10469_v22  ;;  %vm10943_vm7 = vmmov %vm10926_vm3 }
 0x2f5   : > { %5706 = vrcp.f32 %v2421_v9  ;;  %v3495_v33 = vadd.f32 %v3424_v15, %v3301_v14  ;;  %v3693_v27 = vmul.f32 %v7443_v17, %v3656_v55  ;;  %v9472_v63 = vmul.f32 %v7443_v17, %v3657_v51  ;;  %v10912_v51 = vld [vmem:[#allocation6_spill] sm:$0xff] }
 0x2f6   : > { %v3422_v38 = vsel %vm10907_vm5, %v10906_v54, %v3421_v12  ;;  %5708 = vrcp.f32 %v2419_v4  ;;  %v3890_v23 = vmul.f32 %v10900_v26, %v9254_v47  ;;  %vm3030_vm4 = vcmp.le.s32.totalorder %v2748_v53, 14  ;;  %vm10942_vm5 = vmmov %vm10926_vm3 }
 0x2f7   : > { %v3494_v58 = vadd.f32 %v3422_v38, %v3300_v32  ;;  %v3783_v37 = vrot.slane %v3693_v27, 2  ;;  %v3062_v61 = vsel %vm3030_vm4, 1.0, %v10573_v62  ;;  %v3232_v25 = vmul.f32 %v10909_v29, %v9254_v47  ;;  %vm10946_vm4 = vmmov %vm10886_vm2 }
 0x2f8   : > { %v2755_v12 = vand.u32 15, %v9241_v24  ;;  %v10910_v14 = vrot.slane %v9232_v30, 1  ;;  %v10468_v55 = vrot.slane %v9472_v63, 2  ;;  %v10914_v13 = vrot.slane %v10913_v41, 7 }
 0x2f9   : > { %v3589_v45 = vrot.slane %v3062_v61, 7  ;;  %v10915_v32 = vrot.slane %v9366_v43, 2  ;;  %v3269_v24 = vmul.f32 %v7400_v19, %v3232_v25  ;;  %v9499_v9 = vadd.f32 %v9205_v46, %v9251_v40  ;;  %v10920_v46 = vld [vmem:[#allocation51_spill] sm:$0xff] }
 0x2fa   : > { %v9484_v56 = vsel %vm10911_vm10, %v7370_v44, %v10910_v14  ;;  %v9491_v53 = vsel %vm3535_vm8, %v10914_v13, %v10912_v51  ;;  %vm2967_vm1 = vcmp.ge.s32.totalorder %v2755_v12, 1  ;;  %v3786_v4 = vsel %vm10916_vm11, %v3783_v37, %v10468_v55  ;;  %v10919_v12 = vld [vmem:[#allocation53_spill] sm:$0xff]  ;;  %v10924_v13 = vld [vmem:[#allocation43_spill] sm:$0xff]  ;;  %v10928_v55 = vld [vmem:[#allocation44_spill] sm:$0xff] }
 0x2fb   : > { %v3784_v47 = vsel %vm10886_vm2, %v10915_v32, %v3783_v37  ;;  %v3927_v38 = vmul.f32 %v7533_v28, %v3890_v23  ;;  %v2999_v15 = vsel %vm2967_vm1, 1.0, %v10573_v62  ;;  %v10917_v43 = vrot.slane %v9247_v52, 7  ;;  %v10921_v37 = vld [vmem:[#allocation39_spill] sm:$0xff]  ;;  %v10922_v23 = vld [vmem:[#allocation22_spill] sm:$0xff]  ;;  %vm10947_vm10 = vmmov %vm10886_vm2 }
 0x2fc   : > { %v3858_v54 = vadd.f32 %v3784_v47, %v3494_v58  ;;  %v3859_v61 = vadd.f32 %v3786_v4, %v3495_v33  ;;  %v3165_v25 = vrot.slane %v2999_v15, 1  ;;  %v9514_v40 = vadd.f32 %v10920_v46, %v10919_v12  ;;  %vm10948_vm2 = vmmov %vm10926_vm3 }
 0x2fd   : > { %v9510_v27 = vsel %vm3535_vm8, %v10912_v51, %v10917_v43  ;;  %v9520_v58 = vmul.f32 %v10648_v6, %v10921_v37  ;;  %v9524_v41 = vmul.f32 %v10648_v6, %v10922_v23  ;;  %v4178_v32 = vmul.f32 %v10924_v13, %v10921_v37  ;;  %v5703_v47 = vpop.eup %5702  ;;  %vm10949_vm1 = vmmov %vm10948_vm2 }
 0x2fe   : > { %10918 = vst [vmem:[#allocation10_spill] sm:$0xff] %v9510_v27  ;;  %v9516_v14 = vadd.f32 %v3927_v38, %v3858_v54  ;;  %v9529_v33 = vadd.f32 %v9158_v8, %v3269_v24  ;;  %v9533_v4 = vsel %vm3535_vm8, %v10912_v51, %v3589_v45  ;;  %v9537_v54 = vsel %vm3535_vm8, %v3589_v45, %v10912_v51  ;;  %v10925_v38 = vld [vmem:[#allocation15_spill] sm:$0xff]  ;;  %v5705_v43 = vpop.eup %5704  ;;  %vm10950_vm11 = vmmov %vm10946_vm4 }
 0x2ff   : > { %10923 = vst [vmem:[#allocation33_spill] sm:$0xff] %v9524_v41  ;;  %v4179_v15 = vmul.f32 %v10925_v38, %v10922_v23  ;;  %v9542_v12 = vmul.f32 %v5703_v47, %v9371_v39  ;;  %v9546_v46 = vsel %vm10926_vm3, %v7370_v44, %v3165_v25  ;;  %v9550_v24 = vsel %vm10927_vm12, %v3165_v25, %v7370_v44  ;;  %v5707_v45 = vpop.eup %5706  ;;  %vm10951_vm3 = vmmov %vm10946_vm4 }
 0x300   : > { %v9554_v22 = vmul.f32 %v10928_v55, %v10922_v23  ;;  %v9557_v37 = vmul.f32 %v5705_v43, %v9379_v49  ;;  %v9562_v47 = vmul.f32 %v7638_v2, %v4178_v32  ;;  %v5709_v52 = vpop.eup %5708  ;;  %v9565_v30 = vmul.f32 %v5707_v45, %v9384_v10  ;;  %v10932_v23 = vld [vmem:[#allocation32_spill] sm:$0xff]  ;;  %v10933_v49 = vld [vmem:[#allocation45_spill] sm:$0xff]  ;;  %vm10954_vm12 = vmmov %vm10949_vm1 }
 0x301   : > { %v4425_v25 = vmul.f32 %v10901_v48, %v9542_v12  ;;  %v9570_v55 = vmul.f32 %v7638_v2, %v4179_v15  ;;  %v9574_v43 = vmul.f32 %v10933_v49, %v10932_v23  ;;  %v9577_v62 = vmul.f32 %v5709_v52, %v9393_v57 }
 0x302   : > { %10929 = vst [vmem:[#allocation7_spill] sm:$0xff] %v9554_v22  ;;  %10930 = vst [vmem:[#allocation34_spill] sm:$0xff] %v9562_v47  ;;  %v4423_v32 = vmul.f32 %v10885_v60, %v9557_v37  ;;  %v4529_v10 = vmul.f32 %v7652_v11, %v9557_v37  ;;  %v4719_v45 = vmul.f32 %v10888_v1, %v9557_v37  ;;  %v10935_v38 = vrot.slane %v9318_v59, 1 }
 0x303   : > { %10931 = vst [vmem:[#allocation35_spill] sm:$0xff] %v9570_v55  ;;  %10934 = vst [vmem:[#allocation8_spill] sm:$0xff] %v9574_v43  ;;  %v3661_v15 = vmul.f32 %v9510_v27, %v9565_v30  ;;  %v3891_v39 = vmul.f32 %v10901_v48, %v9557_v37  ;;  %v9591_v49 = vmul.f32 %v7652_v11, %v9542_v12  ;;  %v9603_v48 = vld [vmem:[%s10312_s3 + $0x8] ss:$0 sm:$0xff] }
 0x304   : > { %v4721_v52 = vmul.f32 %v10904_v50, %v9542_v12  ;;  %v4460_v60 = vmul.f32 %v7643_v0, %v4423_v32  ;;  %v4530_v57 = vmul.f32 %v7652_v11, %v9577_v62  ;;  %v4612_v44 = vrot.slane %v4529_v10, 1 }
 0x305   : > { %v4720_v1 = vmul.f32 %v10889_v20, %v9577_v62  ;;  %v4755_v27 = vmul.f32 %v9603_v48, %v4719_v45  ;;  %v9607_v43 = vmul.f32 %v7443_v17, %v3661_v15  ;;  %v3928_v51 = vmul.f32 %v7533_v28, %v3891_v39 }
 0x306   : > { %v3997_v32 = vmul.f32 %v10648_v6, %v9557_v37  ;;  %v4493_v10 = vadd.f32 %v4460_v60, %v9456_v18  ;;  %v4613_v20 = vsel %vm10936_vm13, %v10935_v38, %v4612_v44  ;;  %v4614_v22 = vrot.slane %v4530_v57, 1  ;;  %vm10955_vm13 = vmmov %vm10949_vm1 }
 0x307   : > { %v4756_v13 = vmul.f32 %v9603_v48, %v4720_v1  ;;  %v4686_v23 = vadd.f32 %v4613_v20, %v9461_v36  ;;  %v4842_v45 = vrot.slane %v4755_v27, 2  ;;  %v9620_v15 = vmul.f32 %v9484_v56, %v9565_v30 }
 0x308   : > { %v4615_v55 = vsel %vm10937_vm14, %v4612_v44, %v4614_v22  ;;  %v3961_v18 = vadd.f32 %v3928_v51, %v3859_v61  ;;  %v9626_v59 = vmul.f32 %v10648_v6, %v9577_v62  ;;  %v10938_v60 = vrot.slane %v9330_v7, 2  ;;  %vm10957_vm14 = vmmov %vm10951_vm3 }
 0x309   : > { %v4844_v47 = vrot.slane %v4756_v13, 2  ;;  %v4687_v38 = vadd.f32 %v4615_v55, %v4493_v10  ;;  %v4084_v27 = vrot.slane %v3997_v32, 1  ;;  %v4190_v57 = vmul.f32 %v10904_v50, %v9557_v37 }
 0x30a   : > { %v4843_v36 = vsel %vm10939_vm15, %v10938_v60, %v4842_v45  ;;  %v4086_v44 = vrot.slane %v9626_v59, 1  ;;  %v4191_v51 = vmul.f32 %v10905_v21, %v9577_v62  ;;  %v10941_v13 = vrot.slane %v9408_v5, 1  ;;  %vm10958_vm15 = vmmov %vm10951_vm3 }
 0x30b   : > { %v4845_v1 = vsel %vm10940_vm6, %v4842_v45, %v4844_v47  ;;  %v4919_v20 = vadd.f32 %v4843_v36, %v4686_v23  ;;  %v4227_v7 = vmul.f32 %v7638_v2, %v4190_v57  ;;  %v4424_v32 = vmul.f32 %v10900_v26, %v9577_v62  ;;  %v9655_v26 = vld [vmem:[%s10314_s5] sm:$0x3]  ;;  %vm10960_vm6 = vmmov %vm10949_vm1 }
 0x30c   : > { %v4920_v61 = vadd.f32 %v4845_v1, %v4687_v38  ;;  %v4085_v55 = vsel %vm10942_vm5, %v10941_v13, %v4084_v27  ;;  %v4087_v50 = vsel %vm10943_vm7, %v4084_v27, %v4086_v44  ;;  %v9648_v10 = vmul.f32 %v7638_v2, %v4191_v51  ;;  %10944 = vst [vmem:[#allocation12_spill] sm:$0xff] %v9655_v26  ;;  %vm10961_vm5 = vmmov %vm10949_vm1 }
 0x30d   : > { %v4157_v23 = vadd.f32 %v4085_v55, %v9516_v14  ;;  %v4462_v45 = vmul.f32 %v7643_v0, %v4425_v25  ;;  %v4158_v5 = vadd.f32 %v4087_v50, %v3961_v18  ;;  %v4316_v60 = vrot.slane %v4227_v7, 2  ;;  %5442 = vmatprep.mubr.msk.bf16.mxu1 %vm1702_vm9, %v9655_v26  ;;  %vm10962_vm7 = vmmov %vm10951_vm3 }
 0x30e   : > { %v4942_v38 = vpack.c.bf16 %v4920_v61, %v4919_v20  ;;  %v4461_v36 = vmul.f32 %v7643_v0, %v4424_v32  ;;  %v4318_v57 = vrot.slane %v9648_v10, 2  ;;  %v9660_v14 = vmul.f32 %v7652_v11, %v9565_v30 }
 0x30f   : > { %v4616_v27 = vrot.slane %v9591_v49, 1  ;;  %v4722_v25 = vmul.f32 %v10905_v21, %v9565_v30  ;;  %v10945_v20 = vrot.slane %v9422_v42, 2  ;;  %v4757_v61 = vmul.f32 %v9603_v48, %v4721_v52 }
 0x310   : > { %v5054_v18 = vshrl.u32 %v4942_v38, 16  ;;  %v5057_v1 = vshll.u32 %v4942_v38, 16  ;;  %v4319_v13 = vsel %vm10947_vm10, %v4316_v60, %v4318_v57  ;;  %v10483_v21 = vrot.slane %v9660_v14, 1  ;;  %vm10964_vm10 = vmmov %vm10949_vm1 }
 0x311   : > { %v4317_v51 = vsel %vm10946_vm4, %v10945_v20, %v4316_v60  ;;  %v4617_v49 = vsel %vm10948_vm2, %v4614_v22, %v4616_v27  ;;  %v4392_v50 = vadd.f32 %v4319_v13, %v4158_v5  ;;  %v9677_v38 = vmul.f32 %v9603_v48, %v4722_v25  ;;  %vm10963_vm4 = vmmov %vm10951_vm3 }
 0x312   : > { %v4391_v55 = vadd.f32 %v4317_v51, %v4157_v23  ;;  %v5056_v7 = vrot.slane %v5054_v18, 3  ;;  %v5059_v32 = vrot.slane %v5057_v1, 4  ;;  %v4619_v52 = vsel %vm10949_vm1, %v4616_v27, %v10483_v21  ;;  %vm10968_vm2 = vmmov %vm10949_vm1 }
 0x313   : > { %v4846_v20 = vrot.slane %v4757_v61, 2  ;;  %v3233_v60 = vmul.f32 %v9238_v16, %v9557_v37  ;;  %v4495_v22 = vadd.f32 %v4462_v45, %v4392_v50  ;;  %v10482_v51 = vrot.slane %v9677_v38, 2 }
 0x314   : > { %v4494_v42 = vadd.f32 %v4461_v36, %v4391_v55  ;;  %v9684_v23 = vor.u32 %v5059_v32, %v5056_v7  ;;  %v3338_v5 = vmul.f32 %v10887_v34, %v9557_v37  ;;  %v9693_v27 = vmul.f32 %v10887_v34, %v9577_v62  ;;  %v5482_v55 = vpop.f32.mrb[28].mxu0 }
 0x315   : > { %v4847_v25 = vsel %vm10950_vm11, %v4844_v47, %v4846_v20  ;;  %v3270_v36 = vmul.f32 %v7400_v19, %v3233_v60  ;;  %v4689_v61 = vadd.f32 %v4619_v52, %v4495_v22  ;;  %v4849_v45 = vsel %vm10951_vm3, %v4846_v20, %v10482_v51  ;;  %vm10971_vm11 = vmmov %vm10949_vm1 }
 0x316   : > { %v4688_v18 = vadd.f32 %v4617_v49, %v4494_v42  ;;  %v5061_v1 = vsel %vm4954_vm0, %v9402_v31, %v9684_v23  ;;  %v3425_v13 = vrot.slane %v3338_v5, 1  ;;  %v3427_v7 = vrot.slane %v9693_v27, 1  ;;  %v2283_v31 = vpop.f32.mrb[29].mxu0  ;;  %v10952_v42 = vld [vmem:[#allocation30_spill] sm:$0xff] }
 0x317   : > { %5487 = vmatprep.subr.msk.bf16.mxu1 %vm1702_vm9, %v5061_v1  ;;  %v3303_v49 = vadd.f32 %v9158_v8, %v3270_v36  ;;  %v3658_v32 = vmul.f32 %v9491_v53, %v9557_v37  ;;  %v9707_v50 = vadd.f32 %v10891_v3, %v5482_v55  ;;  %v4922_v52 = vadd.f32 %v4849_v45, %v4689_v61 }
 0x318   : > { %v4921_v47 = vadd.f32 %v4847_v25, %v4688_v18  ;;  %5431 = vmatpush3.bf16.xpose.msra.mxu1 %v10952_v42  ;;  %v10953_v20 = vrot.slane %v9444_v35, 1  ;;  %v3659_v22 = vmul.f32 %v9533_v4, %v9577_v62  ;;  %v9716_v5 = vadd.f32 %v10891_v3, %v2283_v31  ;;  %v5483_v18 = vpop.f32.mrb[30].mxu0 }
 0x319   : > { %v3428_v37 = vsel %vm10955_vm13, %v3425_v13, %v3427_v7  ;;  %v3695_v36 = vmul.f32 %v7443_v17, %v3658_v32  ;;  %v5393_v1 = vmul.f32 -1.442695, %v9707_v50  ;;  %v9725_v35 = vadd.f32 %v10891_v3, %v5483_v18  ;;  %v2286_v61 = vpop.f32.mrb[31].mxu0  ;;  %vm10978_vm13 = vmmov %vm10951_vm3 }
 0x31a   : > { %v3426_v60 = vsel %vm10954_vm12, %v10953_v20, %v3425_v13  ;;  %v4943_v45 = vpack.c.bf16 %v4922_v52, %v4921_v47  ;;  %v3497_v55 = vadd.f32 %v3428_v37, %v3303_v49  ;;  %v5391_v31 = vmul.f32 -1.442695, %v9716_v5  ;;  %vm10974_vm12 = vmmov %vm10951_vm3 }
 0x31b   : > { %v3496_v25 = vadd.f32 %v3426_v60, %v9529_v33  ;;  %v9729_v42 = vadd.f32 %v10891_v3, %v2286_v61  ;;  %v9732_v20 = vmul.f32 %v7443_v17, %v3659_v22  ;;  %v3787_v13 = vrot.slane %v3695_v36, 2 }
 0x31c   : > { %5710 = vpow2.f32 %v5393_v1  ;;  %v5394_v33 = vmul.f32 -1.442695, %v9725_v35  ;;  %v5063_v32 = vshrl.u32 %v4943_v45, 16  ;;  %v5066_v60 = vshll.u32 %v4943_v45, 16 }
 0x31d   : > { %5712 = vpow2.f32 %v5391_v31  ;;  %v5392_v18 = vmul.f32 -1.442695, %v9729_v42  ;;  %v10956_v47 = vrot.slane %v9472_v63, 2  ;;  %v3789_v52 = vrot.slane %v9732_v20, 2 }
 0x31e   : > { %5714 = vpow2.f32 %v5394_v33  ;;  %v5065_v3 = vrot.slane %v5063_v32, 3  ;;  %v5068_v37 = vrot.slane %v5066_v60, 4  ;;  %v3892_v1 = vmul.f32 %v10909_v29, %v9577_v62 }
 0x31f   : > { %v3788_v49 = vsel %vm10957_vm14, %v10956_v47, %v3787_v13  ;;  %5716 = vpow2.f32 %v5392_v18  ;;  %v3790_v36 = vsel %vm10958_vm15, %v3787_v13, %v3789_v52  ;;  %v3893_v61 = vmul.f32 %v9238_v16, %v9542_v12  ;;  %vm10980_vm14 = vmmov %vm10951_vm3 }
 0x320   : > { %v3860_v22 = vadd.f32 %v3788_v49, %v3496_v25  ;;  %v9747_v63 = vor.u32 %v5068_v37, %v5065_v3  ;;  %v3861_v45 = vadd.f32 %v3790_v36, %v3497_v55  ;;  %v3999_v31 = vmul.f32 %v10648_v6, %v9542_v12  ;;  %vm10991_vm15 = vmmov %vm10949_vm1 }
 0x321   : > { %v9753_v25 = vmul.f32 %v10648_v6, %v9565_v30  ;;  %v3929_v33 = vmul.f32 %v7533_v28, %v3892_v1  ;;  %v3930_v13 = vmul.f32 %v7533_v28, %v3893_v61  ;;  %v4192_v32 = vmul.f32 %v9491_v53, %v9542_v12  ;;  %v10959_v61 = vld [vmem:[#allocation31_spill] sm:$0xff] }
 0x322   : > { %v4193_v60 = vmul.f32 %v9533_v4, %v9565_v30  ;;  %v5070_v55 = vsel %vm4954_vm0, %v9684_v23, %v9747_v63  ;;  %v4088_v18 = vrot.slane %v3999_v31, 1  ;;  %v4426_v49 = vmul.f32 %v10909_v29, %v9565_v30 }
 0x323   : > { %v10481_v47 = vrot.slane %v9753_v25, 1  ;;  %5488 = vmatprep.subr.msk.bf16.mxu1 %vm1702_vm9, %v5070_v55  ;;  %v3962_v3 = vadd.f32 %v3929_v33, %v3860_v22  ;;  %v3963_v37 = vadd.f32 %v3930_v13, %v3861_v45  ;;  %v4229_v36 = vmul.f32 %v7638_v2, %v4192_v32 }
 0x324   : > { %v9770_v1 = vmul.f32 %v7638_v2, %v4193_v60  ;;  %5433 = vmatpush3.bf16.xpose.msra.mxu1 %v10959_v61  ;;  %v4089_v23 = vsel %vm10960_vm6, %v4086_v44, %v4088_v18  ;;  %v4463_v29 = vmul.f32 %v7643_v0, %v4426_v49  ;;  %v3234_v22 = vmul.f32 %v9546_v46, %v9577_v62  ;;  %vm10995_vm6 = vmmov %vm10949_vm1 }
 0x325   : > { %v4091_v31 = vsel %vm10961_vm5, %v4088_v18, %v10481_v47  ;;  %v4159_v45 = vadd.f32 %v4089_v23, %v3962_v3  ;;  %v4320_v13 = vrot.slane %v4229_v36, 2  ;;  %v3235_v59 = vmul.f32 %v9550_v24, %v9542_v12  ;;  %vm10997_vm5 = vmmov %vm10949_vm1 }
 0x326   : > { %v4160_v33 = vadd.f32 %v4091_v31, %v3963_v37  ;;  %v10487_v32 = vrot.slane %v9770_v1, 2  ;;  %v5711_v60 = vpop.eup %5710  ;;  %v3271_v44 = vmul.f32 %v7400_v19, %v3234_v22  ;;  %v3340_v55 = vmul.f32 %v10887_v34, %v9542_v12 }
 0x327   : > { %v9790_v18 = vmul.f32 %v10887_v34, %v9565_v30  ;;  %v5713_v49 = vpop.eup %5712  ;;  %v2424_v62 = vadd.f32 1.0, %v5711_v60  ;;  %v4321_v3 = vsel %vm10962_vm7, %v4318_v57, %v4320_v13  ;;  %v3660_v36 = vmul.f32 %v9537_v54, %v9542_v12  ;;  %vm11001_vm7 = vmmov %vm10949_vm1 }
 0x328   : > { %v4323_v37 = vsel %vm10963_vm4, %v4320_v13, %v10487_v32  ;;  %v5715_v61 = vpop.eup %5714  ;;  %v2422_v23 = vadd.f32 1.0, %v5713_v49  ;;  %v4393_v31 = vadd.f32 %v4321_v3, %v4159_v45  ;;  %v3272_v47 = vmul.f32 %v7400_v19, %v3235_v59  ;;  %vm11002_vm4 = vmmov %vm10949_vm1 }
 0x329   : > { %v9800_v22 = vadd.f32 %v4323_v37, %v4160_v33  ;;  %v5717_v51 = vpop.eup %5716  ;;  %5718 = vrcp.f32 %v2424_v62  ;;  %v2425_v60 = vadd.f32 1.0, %v5715_v61  ;;  %v3304_v10 = vadd.f32 %v9158_v8, %v3271_v44 }
 0x32a   : > { %v3429_v57 = vrot.slane %v3340_v55, 1  ;;  %5720 = vrcp.f32 %v2422_v23  ;;  %v2423_v21 = vadd.f32 1.0, %v5717_v51  ;;  %v9804_v39 = vadd.f32 %v4463_v29, %v4393_v31  ;;  %v10966_v29 = vld [vmem:[#allocation16_spill] sm:$0xff] }
 0x32b   : > { %v3305_v13 = vadd.f32 %v9158_v8, %v3272_v47  ;;  %5722 = vrcp.f32 %v2425_v60  ;;  %v10485_v45 = vrot.slane %v9790_v18, 1  ;;  %v3697_v33 = vmul.f32 %v7443_v17, %v3660_v36  ;;  %v10972_v36 = vld [vmem:[#allocation34_spill] sm:$0xff] }
 0x32c   : > { %v3430_v12 = vsel %vm10964_vm10, %v3427_v7, %v3429_v57  ;;  %5724 = vrcp.f32 %v2423_v21  ;;  %v3894_v44 = vmul.f32 %v9546_v46, %v9565_v30  ;;  %v10965_v51 = vrot.slane %v9520_v58, 1  ;;  %vm11004_vm10 = vmmov %vm10951_vm3 }
 0x32d   : > { %v3498_v59 = vadd.f32 %v3430_v12, %v3304_v10  ;;  %v10967_v55 = vrot.slane %v10966_v29, 1  ;;  %v3432_v27 = vsel %vm10949_vm1, %v3429_v57, %v10485_v45  ;;  %v3791_v7 = vrot.slane %v3697_v33, 2  ;;  %v10975_v10 = vld [vmem:[#allocation35_spill] sm:$0xff]  ;;  %v10979_v33 = vld [vmem:[#allocation32_spill] sm:$0xff]  ;;  %v10981_v29 = vld [vmem:[#allocation38_spill] sm:$0xff] }
 0x32e   : > { %v10969_v47 = vrot.slane %v9524_v41, 1  ;;  %v10970_v49 = vmov %v10965_v51  ;;  %v3273_v30 = vmul.f32 %v7400_v19, %v9620_v15  ;;  %v3499_v3 = vadd.f32 %v3432_v27, %v3305_v13  ;;  %v10976_v15 = vld [vmem:[#allocation20_spill] sm:$0xff] }
 0x32f   : > { %v4061_v8 = vsel %vm10968_vm2, %v10967_v55, %v10965_v51  ;;  %v4292_v61 = vrot.slane %v10972_v36, 2  ;;  %v3792_v23 = vsel %vm10951_vm3, %v3789_v52, %v3791_v7  ;;  %v10973_v31 = vrot.slane %v9607_v43, 2  ;;  %v10986_v36 = vld [vmem:[#allocation17_spill] sm:$0xff]  ;;  %vm11006_vm2 = vmmov %vm10949_vm1 }
 0x330   : > { %v4063_v21 = vsel %vm10971_vm11, %v10970_v49, %v10969_v47  ;;  %v4145_v62 = vadd.f32 %v4061_v8, %v9514_v40  ;;  %v3931_v60 = vmul.f32 %v7533_v28, %v3894_v44  ;;  %v10484_v40 = vrot.slane %v10975_v10, 2  ;;  %v10985_v49 = vld [vmem:[#allocation15_spill] sm:$0xff]  ;;  %vm11007_vm1 = vmmov %vm10951_vm3 }
 0x331   : > { %v4146_v37 = vadd.f32 %v4063_v21, %v9499_v9  ;;  %v3794_v58 = vsel %vm10974_vm12, %v3791_v7, %v10973_v31  ;;  %v3862_v57 = vadd.f32 %v3792_v23, %v3498_v59  ;;  %v10977_v13 = vrot.slane %v10976_v15, 2  ;;  %v10983_v59 = vld [vmem:[#allocation43_spill] sm:$0xff]  ;;  %v10988_v23 = vld [vmem:[#allocation8_spill] sm:$0xff]  ;;  %vm11008_vm11 = vmmov %vm11006_vm2 }
 0x332   : > { %v9840_v12 = vadd.f32 %v3794_v58, %v3499_v3  ;;  %v4519_v20 = vmul.f32 %v7652_v11, %v10979_v33  ;;  %v4295_v52 = vsel %vm10980_vm14, %v4292_v61, %v10484_v40  ;;  %v9852_v44 = vmul.f32 %v7652_v11, %v10981_v29  ;;  %v10984_v7 = vld [vmem:[#allocation7_spill] sm:$0xff]  ;;  %vm11010_vm3 = vmmov %vm11007_vm1 }
 0x333   : > { %v4293_v9 = vsel %vm10978_vm13, %v10977_v13, %v4292_v61  ;;  %v4709_v55 = vmul.f32 %v10983_v59, %v10979_v33  ;;  %v9856_v8 = vadd.f32 %v3931_v60, %v3862_v57  ;;  %v4380_v27 = vadd.f32 %v4295_v52, %v4146_v37  ;;  %v5719_v3 = vpop.eup %5718  ;;  %v10987_v61 = vld [vmem:[#allocation6_spill] sm:$0xff]  ;;  %v9876_v15 = vld [vmem:[%s10313_s4] ss:$0 sm:$0xff]  ;;  %vm11014_vm12 = vmmov %vm11007_vm1 }
 0x334   : > { %v4379_v51 = vadd.f32 %v4293_v9, %v4145_v62  ;;  %10982 = vst [vmem:[#allocation13_spill] sm:$0xff] %v9852_v44  ;;  %v4449_v47 = vmul.f32 %v7643_v0, %v10984_v7  ;;  %v4710_v21 = vmul.f32 %v10985_v49, %v10981_v29  ;;  %v9865_v62 = vsel %vm3535_vm8, %v10987_v61, %v10986_v36  ;;  %v5721_v57 = vpop.eup %5720  ;;  %v10993_v40 = vld [vmem:[#allocation27_spill] sm:$0xff]  ;;  %vm11015_vm13 = vmmov %vm11007_vm1 }
 0x335   : > { %v4450_v31 = vmul.f32 %v7643_v0, %v10988_v23  ;;  %v4592_v58 = vrot.slane %v4519_v20, 1  ;;  %v10486_v60 = vrot.slane %v9852_v44, 1  ;;  %v9871_v37 = vmul.f32 %v5719_v3, %v9707_v50  ;;  %v5723_v59 = vpop.eup %5722  ;;  %v10989_v50 = vld [vmem:[#allocation29_spill] sm:$0xff]  ;;  %vm11016_vm14 = vmmov %vm11006_vm2 }
 0x336   : > { %v9879_v13 = vadd.f32 %v9876_v15, %v3273_v30  ;;  %v4482_v9 = vadd.f32 %v4449_v47, %v4379_v51  ;;  %v9882_v52 = vmul.f32 %v9603_v48, %v4709_v55  ;;  %v9885_v20 = vmul.f32 %v5721_v57, %v9716_v5  ;;  %v10992_v23 = vld [vmem:[#allocation5_spill] sm:$0xff]  ;;  %v5725_v51 = vpop.eup %5724 }
 0x337   : > { %v9887_v7 = vadd.f32 %v4450_v31, %v4380_v27  ;;  %v10990_v49 = vrot.slane %v10989_v50, 1  ;;  %v10994_v45 = vrot.slane %v10993_v40, 1  ;;  %v3664_v55 = vmul.f32 %v10986_v36, %v9871_v37 }
 0x338   : > { %v9902_v5 = vmul.f32 %v10648_v6, %v9871_v37  ;;  %v9905_v27 = vmul.f32 %v5723_v59, %v9725_v35  ;;  %v9908_v47 = vmul.f32 %v9603_v48, %v4710_v21  ;;  %v9911_v31 = vmul.f32 %v5725_v51, %v9729_v42 }
 0x339   : > { %v4593_v3 = vsel %vm10991_vm15, %v10990_v49, %v4592_v58  ;;  %v9896_v30 = vsel %vm10995_vm6, %v10994_v45, %v10992_v23  ;;  %v4427_v45 = vmul.f32 %v9238_v16, %v9885_v20  ;;  %v4533_v40 = vmul.f32 %v7652_v11, %v9885_v20  ;;  %vm11018_vm15 = vmmov %vm11006_vm2 }
 0x33a   : > { %10996 = vst [vmem:[#allocation21_spill] sm:$0xff] %v9905_v27  ;;  %v4595_v57 = vsel %vm10997_vm5, %v4592_v58, %v10486_v60  ;;  %v9922_v35 = vmul.f32 %v10648_v6, %v9905_v27  ;;  %v4723_v21 = vmul.f32 %v9491_v53, %v9885_v20  ;;  %v9926_v59 = vadd.f32 %v4593_v3, %v4482_v9  ;;  %v10999_v9 = vld [vmem:[#allocation10_spill] sm:$0xff]  ;;  %vm11019_vm6 = vmmov %vm11007_vm1 }
 0x33b   : > { %v9930_v16 = vmul.f32 %v7443_v17, %v3664_v55  ;;  %v4197_v50 = vmul.f32 %v9865_v62, %v9905_v27  ;;  %v9936_v58 = vmul.f32 %v7652_v11, %v9905_v27  ;;  %v4429_v49 = vmul.f32 %v9550_v24, %v9871_v37  ;;  %vm11020_vm5 = vmmov %vm11007_vm1 }
 0x33c   : > { %v9943_v53 = vmul.f32 %v9484_v56, %v9905_v27  ;;  %v4726_v3 = vmul.f32 %v10999_v9, %v9905_v27  ;;  %v4464_v55 = vmul.f32 %v7643_v0, %v4427_v45  ;;  %v4534_v32 = vmul.f32 %v7652_v11, %v9911_v31 }
 0x33d   : > { %10998 = vst [vmem:[#allocation37_spill] sm:$0xff] %v9930_v16  ;;  %v9950_v42 = vmul.f32 %v7638_v2, %v4197_v50  ;;  %v4620_v26 = vrot.slane %v4533_v40, 1  ;;  %v4724_v36 = vmul.f32 %v9533_v4, %v9911_v31  ;;  %v4759_v44 = vmul.f32 %v9603_v48, %v4723_v21 }
 0x33e   : > { %v4497_v51 = vadd.f32 %v4464_v55, %v9800_v22  ;;  %v3895_v27 = vmul.f32 %v9550_v24, %v9885_v20  ;;  %v11000_v60 = vrot.slane %v9660_v14, 1  ;;  %v4622_v10 = vrot.slane %v4534_v32, 1 }
 0x33f   : > { %v4001_v40 = vmul.f32 %v10648_v6, %v9885_v20  ;;  %v4760_v55 = vmul.f32 %v9603_v48, %v4724_v36  ;;  %v4850_v4 = vrot.slane %v4759_v44, 2  ;;  %v9972_v24 = vmul.f32 %v10648_v6, %v9911_v31 }
 0x340   : > { %v4621_v50 = vsel %vm11001_vm7, %v11000_v60, %v4620_v26  ;;  %v3932_v21 = vmul.f32 %v7533_v28, %v3895_v27  ;;  %v4623_v41 = vsel %vm11002_vm4, %v4620_v26, %v4622_v10  ;;  %v4194_v32 = vmul.f32 %v9537_v54, %v9885_v20  ;;  %vm11022_vm7 = vmmov %vm11007_vm1 }
 0x341   : > { %v4690_v22 = vadd.f32 %v4621_v50, %v9804_v39  ;;  %v4092_v14 = vrot.slane %v4001_v40, 1  ;;  %v4691_v60 = vadd.f32 %v4623_v41, %v4497_v51  ;;  %v11003_v45 = vrot.slane %v9677_v38, 2  ;;  %vm11027_vm4 = vmmov %vm11006_vm2 }
 0x342   : > { %v4852_v50 = vrot.slane %v4760_v55, 2  ;;  %v3965_v44 = vadd.f32 %v3932_v21, %v9840_v12  ;;  %v11005_v27 = vrot.slane %v9753_v25, 1  ;;  %v4094_v29 = vrot.slane %v9972_v24, 1 }
 0x343   : > { %v4851_v39 = vsel %vm11004_vm10, %v11003_v45, %v4850_v4  ;;  %v4195_v40 = vmul.f32 %v10999_v9, %v9911_v31  ;;  %v4231_v38 = vmul.f32 %v7638_v2, %v4194_v32  ;;  %v4428_v51 = vmul.f32 %v9546_v46, %v9911_v31 }
 0x344   : > { %v4923_v36 = vadd.f32 %v4851_v39, %v4690_v22  ;;  %v4093_v26 = vsel %vm11006_vm2, %v11005_v27, %v4092_v14  ;;  %v4853_v16 = vsel %vm11007_vm1, %v4850_v4, %v4852_v50  ;;  %v4095_v25 = vsel %vm11008_vm11, %v4092_v14, %v4094_v29  ;;  %v11012_v27 = vld [vmem:[#allocation40_spill] sm:$0xff]  ;;  %vm11034_vm11 = vmmov %vm11006_vm2 }
 0x345   : > { %v4161_v41 = vadd.f32 %v4093_v26, %v9856_v8  ;;  %v4924_v12 = vadd.f32 %v4853_v16, %v4691_v60  ;;  %v9995_v45 = vmul.f32 %v7638_v2, %v4195_v40  ;;  %v4466_v22 = vmul.f32 %v7643_v0, %v4429_v49 }
 0x346   : > { %v4162_v9 = vadd.f32 %v4095_v25, %v3965_v44  ;;  %v4324_v55 = vrot.slane %v4231_v38, 2  ;;  %v4465_v4 = vmul.f32 %v7643_v0, %v4428_v51  ;;  %v4535_v8 = vmul.f32 %v7652_v11, %v9871_v37 }
 0x347   : > { %v4944_v21 = vpack.c.bf16 %v4924_v12, %v4923_v36  ;;  %v4326_v46 = vrot.slane %v9995_v45, 2  ;;  %v4725_v16 = vmul.f32 %v9537_v54, %v9871_v37  ;;  %v10005_v14 = vmul.f32 %v9603_v48, %v4726_v3 }
 0x348   : > { %v11009_v32 = vrot.slane %v9770_v1, 2  ;;  %v4624_v60 = vrot.slane %v4535_v8, 1  ;;  %v4677_v39 = vadd.f32 %v4595_v57, %v9887_v7  ;;  %v11011_v44 = vrot.slane %v9882_v52, 2 }
 0x349   : > { %v11013_v26 = vrot.slane %v11012_v27, 2  ;;  %v5072_v40 = vshrl.u32 %v4944_v21, 16  ;;  %v5075_v38 = vshll.u32 %v4944_v21, 16  ;;  %v4327_v54 = vsel %vm11015_vm13, %v4324_v55, %v4326_v46  ;;  %vm11042_vm13 = vmmov %vm11007_vm1 }
 0x34a   : > { %v4325_v49 = vsel %vm11010_vm3, %v11009_v32, %v4324_v55  ;;  %v4396_v51 = vadd.f32 %v4327_v54, %v4162_v9  ;;  %v4625_v1 = vsel %vm11016_vm14, %v4622_v10, %v4624_v60  ;;  %v11017_v12 = vrot.slane %v9936_v58, 1  ;;  %vm11035_vm3 = vmmov %vm11007_vm1 }
 0x34b   : > { %v4823_v36 = vsel %vm11014_vm12, %v11013_v26, %v11011_v44  ;;  %v4395_v3 = vadd.f32 %v4325_v49, %v4161_v41  ;;  %v4761_v57 = vmul.f32 %v9603_v48, %v4725_v16  ;;  %v5074_v25 = vrot.slane %v5072_v40, 3  ;;  %vm11039_vm12 = vmmov %vm11006_vm2 }
 0x34c   : > { %v4627_v7 = vsel %vm11018_vm15, %v4624_v60, %v11017_v12  ;;  %v5077_v8 = vrot.slane %v5075_v38, 4  ;;  %v4856_v44 = vrot.slane %v10005_v14, 2  ;;  %v4499_v21 = vadd.f32 %v4466_v22, %v4396_v51  ;;  %vm11043_vm14 = vmmov %vm11007_vm1  ;;  %v11056_v14 = vld [vmem:[#allocation22_spill] sm:$0xff] }
 0x34d   : > { %v4498_v32 = vadd.f32 %v4465_v4, %v4395_v3  ;;  %v4854_v27 = vrot.slane %v4761_v57, 2  ;;  %v4824_v26 = vrot.slane %v9908_v47, 2  ;;  %v4909_v41 = vadd.f32 %v4823_v36, %v9926_v59  ;;  %vm11046_vm15 = vmmov %vm11006_vm2 }
 0x34e   : > { %v5078_v9 = vor.u32 %v5077_v8, %v5074_v25  ;;  %v3237_v10 = vmul.f32 %v9896_v30, %v9885_v20  ;;  %v3342_v49 = vmul.f32 %v10887_v34, %v9885_v20  ;;  %v4693_v16 = vadd.f32 %v4627_v7, %v4499_v21  ;;  %v11025_v7 = vld [vmem:[#allocation18_spill] sm:$0xff] }
 0x34f   : > { %v4692_v55 = vadd.f32 %v4625_v1, %v4498_v32  ;;  %v4855_v60 = vsel %vm11019_vm6, %v4852_v50, %v4854_v27  ;;  %v4857_v22 = vsel %vm11020_vm5, %v4854_v27, %v4856_v44  ;;  %v11021_v4 = vrot.slane %v9882_v52, 2  ;;  %v11023_v1 = vld [vmem:[#allocation28_spill] sm:$0xff]  ;;  %vm11047_vm6 = vmmov %vm11006_vm2 }
 0x350   : > { %v5079_v36 = vsel %vm4954_vm0, %v9747_v63, %v5078_v9  ;;  %v3274_v54 = vmul.f32 %v7400_v19, %v3237_v10  ;;  %v4926_v50 = vadd.f32 %v4857_v22, %v4693_v16  ;;  %v10046_v3 = vmul.f32 %v10887_v34, %v9911_v31  ;;  %v11028_v10 = vld [vmem:[#allocation54_spill] sm:$0xff]  ;;  %vm11050_vm5 = vmmov %vm11007_vm1 }
 0x351   : > { %v4825_v59 = vsel %vm11022_vm7, %v11021_v4, %v4824_v26  ;;  %v4925_v40 = vadd.f32 %v4855_v60, %v4692_v55  ;;  %5489 = vmatprep.subr.msk.bf16.mxu1 %vm1702_vm9, %v5079_v36  ;;  %v3433_v51 = vrot.slane %v3342_v49, 1  ;;  %v11024_v52 = vrot.slane %v11023_v1, 7  ;;  %vm11051_vm7 = vmmov %vm11007_vm1 }
 0x352   : > { %v4910_v38 = vadd.f32 %v4825_v59, %v4677_v39  ;;  %5435 = vmatpush3.bf16.xpose.msra.mxu1 %v11025_v7  ;;  %v3307_v39 = vadd.f32 %v9876_v15, %v3274_v54  ;;  %v3663_v25 = vmul.f32 %v9865_v62, %v9911_v31  ;;  %v11026_v32 = vrot.slane %v9790_v18, 1 }
 0x353   : > { %v3596_v12 = vsel %vm3535_vm8, %v11024_v52, %v10987_v61  ;;  %v4945_v8 = vpack.c.bf16 %v4926_v50, %v4925_v40  ;;  %v3435_v27 = vrot.slane %v10046_v3, 1  ;;  %v3896_v55 = vmul.f32 %v9484_v56, %v9911_v31 }
 0x354   : > { %v4937_v63 = vpack.c.bf16 %v4910_v38, %v4909_v41  ;;  %v3662_v57 = vmul.f32 %v3596_v12, %v9885_v20  ;;  %v3434_v21 = vsel %vm11027_vm4, %v11026_v32, %v3433_v51  ;;  %v11029_v49 = vand.u32 15, %v11028_v10  ;;  %vm11055_vm4 = vmmov %vm11006_vm2 }
 0x355   : > { %v3500_v60 = vadd.f32 %v3434_v21, %v9879_v13  ;;  %v5081_v18 = vshrl.u32 %v4945_v8, 16  ;;  %v5084_v4 = vshll.u32 %v4945_v8, 16  ;;  %v3436_v59 = vsel %vm11006_vm2, %v3433_v51, %v3435_v27 }
 0x356   : > { %vm10065_vm10 = vcmp.ge.s32.totalorder %v11029_v49, 1  ;;  %v5009_v20 = vshrl.u32 %v4937_v63, 16  ;;  %v5012_v16 = vshll.u32 %v4937_v63, 16  ;;  %v3699_v22 = vmul.f32 %v7443_v17, %v3662_v57 }
 0x357   : > { %v10075_v56 = vmul.f32 %v7443_v17, %v3663_v25  ;;  %v3501_v38 = vadd.f32 %v3436_v59, %v3307_v39  ;;  %v5083_v50 = vrot.slane %v5081_v18, 3  ;;  %v5086_v1 = vrot.slane %v5084_v4, 4 }
 0x358   : > { %v5011_v36 = vrot.slane %v5009_v20, 3  ;;  %v5014_v40 = vrot.slane %v5012_v16, 4  ;;  %v3795_v54 = vrot.slane %v3699_v22, 2  ;;  %v3897_v13 = vmul.f32 %v9896_v30, %v9871_v37 }
 0x359   : > { %v3797_v52 = vrot.slane %v10075_v56, 2  ;;  %v11032_v63 = vrot.slane %v9607_v43, 2  ;;  %v3933_v57 = vmul.f32 %v7533_v28, %v3896_v55  ;;  %v11033_v25 = vrot.slane %v9902_v5, 1  ;;  %v11036_v43 = vld [vmem:[#allocation48_spill] sm:$0xff] }
 0x35a   : > { %v10080_v7 = vor.u32 %v5014_v40, %v5011_v36  ;;  %v10091_v8 = vor.u32 %v5086_v1, %v5083_v50  ;;  %v3934_v10 = vmul.f32 %v7533_v28, %v3897_v13  ;;  %v11037_v20 = vrot.slane %v9922_v35, 1 }
 0x35b   : > { %v3796_v51 = vsel %vm11007_vm1, %v11032_v63, %v3795_v54  ;;  %v4097_v39 = vsel %vm11034_vm11, %v4094_v29, %v11033_v25  ;;  %v3798_v32 = vsel %vm11035_vm3, %v3795_v54, %v3797_v52  ;;  %v11038_v24 = vmov %v11033_v25  ;;  %vm11070_vm11 = vmmov %vm11055_vm4 }
 0x35c   : > { %v3864_v21 = vadd.f32 %v3796_v51, %v3500_v60  ;;  %v5016_v49 = vsel %vm4954_vm0, %v11036_v43, %v10080_v7  ;;  %v3865_v55 = vadd.f32 %v3798_v32, %v3501_v38  ;;  %v4099_v29 = vsel %vm11039_vm12, %v11038_v24, %v11037_v20  ;;  %vm11073_vm3 = vmmov %vm11055_vm4 }
 0x35d   : > { %v4196_v16 = vmul.f32 %v3596_v12, %v9871_v37  ;;  %v4330_v22 = vrot.slane %v9950_v42, 2  ;;  %v5088_v60 = vsel %vm4954_vm0, %v5078_v9, %v10091_v8  ;;  %v4431_v4 = vmul.f32 0.0, %v9896_v30  ;;  %vm11076_vm12 = vmmov %vm11007_vm1 }
 0x35e   : > { %v3966_v18 = vadd.f32 %v3933_v57, %v3864_v21  ;;  %5490 = vmatprep.subr.msk.bf16.mxu1 %vm1702_vm9, %v5088_v60  ;;  %v5126_v59 = vsel %vm1702_vm9, %v5016_v49, 0  ;;  %v3967_v36 = vadd.f32 %v3934_v10, %v3865_v55  ;;  %v4537_v5 = vmul.f32 0.0, %v7652_v11  ;;  %v11044_v21 = vld [vmem:[#allocation41_spill] sm:$0xff] }
 0x35f   : > { %v4233_v40 = vmul.f32 %v7638_v2, %v4196_v16  ;;  %5437 = vmatpush3.bf16.xpose.msra.mxu1 %v5126_v59  ;;  %v4468_v37 = vmul.f32 %v7643_v0, %v4431_v4  ;;  %v4727_v54 = vmul.f32 0.0, %v3596_v12  ;;  %v4728_v50 = vmul.f32 0.0, %v9865_v62  ;;  %v11052_v59 = vld [vmem:[#allocation14_spill] sm:$0xff] }
 0x360   : > { %v4163_v38 = vadd.f32 %v4097_v39, %v3966_v18  ;;  %v4164_v9 = vadd.f32 %v4099_v29, %v3967_v36  ;;  %v10116_v13 = vrot.slane %v4537_v5, 1  ;;  %v11040_v30 = vmov 0.0   ;;  %v11041_v39 = vld [vmem:[#allocation39_spill] sm:$0xff]  ;;  %v11053_v5 = vld [vmem:[#allocation42_spill] sm:$0xff] }
 0x361   : > { %v4328_v1 = vrot.slane %v4233_v40, 2  ;;  %v2985_v63 = vsel %vm10065_vm10, 1.0, %v11040_v30  ;;  %v4763_v51 = vmul.f32 %v9603_v48, %v4727_v54  ;;  %v10123_v57 = vmul.f32 %v9603_v48, %v4728_v50  ;;  %vm11059_vm10 = vmmov %vm11006_vm2 }
 0x362   : > { %v3137_v25 = vrot.slane %v2985_v63, 1  ;;  %v3326_v32 = vmul.f32 %v10887_v34, %v11041_v39  ;;  %v4467_v41 = vmul.f32 %v7643_v0, %v9943_v53  ;;  %v11045_v10 = vrot.slane %v11044_v21, 7 }
 0x363   : > { %v4329_v62 = vsel %vm11042_vm13, %v4326_v46, %v4328_v1  ;;  %v4331_v12 = vsel %vm11043_vm14, %v4328_v1, %v4330_v22  ;;  %v4858_v20 = vrot.slane %v4763_v51, 2  ;;  %v4860_v34 = vrot.slane %v10123_v57, 2  ;;  %vm11079_vm13 = vmmov %vm11007_vm1 }
 0x364   : > { %v3564_v43 = vsel %vm3535_vm8, %v11045_v10, %v10987_v61  ;;  %v4397_v49 = vadd.f32 %v4329_v62, %v4163_v38  ;;  %v4398_v55 = vadd.f32 %v4331_v12, %v4164_v9  ;;  %v3138_v45 = vsel %vm11046_vm15, %v10992_v23, %v3137_v25  ;;  %vm11049_vm8 = vmmov %vm11006_vm2 }
 0x365   : > { %v3140_v46 = vsel %vm11047_vm6, %v3137_v25, %v10992_v23  ;;  %v3401_v24 = vrot.slane %v3326_v32, 1  ;;  %v3646_v29 = vmul.f32 %v3564_v43, %v11041_v39  ;;  %v11048_v60 = vrot.slane %v9936_v58, 1  ;;  %vm11063_vm2 = vmmov %vm11007_vm1 }
 0x366   : > { %v4500_v53 = vadd.f32 %v4467_v41, %v4397_v49  ;;  %v4501_v16 = vadd.f32 %v4468_v37, %v4398_v55  ;;  %v4859_v18 = vsel %vm11050_vm5, %v4856_v44, %v4858_v20  ;;  %v4861_v4 = vsel %vm11051_vm7, %v4858_v20, %v4860_v34  ;;  %v11060_v41 = vld [vmem:[#allocation37_spill] sm:$0xff]  ;;  %vm11080_vm14 = vmmov %vm11007_vm1 }
 0x367   : > { %v4629_v61 = vsel %vm11049_vm8, %v11048_v60, %v10116_v13  ;;  %v3220_v36 = vmul.f32 %v3138_v45, %v11052_v59  ;;  %v3221_v40 = vmul.f32 %v3140_v46, %v11041_v39  ;;  %v11054_v38 = vrot.slane %v11053_v5, 1  ;;  %v11057_v39 = vld [vmem:[#allocation9_spill] sm:$0xff]  ;;  %vm11083_vm15 = vmmov %vm11073_vm3 }
 0x368   : > { %v4694_v54 = vadd.f32 %v4629_v61, %v4500_v53  ;;  %v4695_v58 = vadd.f32 %v10116_v13, %v4501_v16  ;;  %v3683_v50 = vmul.f32 %v7443_v17, %v3646_v29  ;;  %v3880_v9 = vmul.f32 %v3138_v45, %v11056_v14  ;;  %v11061_v20 = vld [vmem:[#allocation49_spill] sm:$0xff]  ;;  %v11064_v53 = vld [vmem:[#allocation24_spill] sm:$0xff]  ;;  %vm11087_vm6 = vmmov %vm11073_vm3 }
 0x369   : > { %v3402_v37 = vsel %vm11055_vm4, %v11054_v38, %v3401_v24  ;;  %v3257_v44 = vmul.f32 %v7400_v19, %v3220_v36  ;;  %v3258_v1 = vmul.f32 %v7400_v19, %v3221_v40  ;;  %v3881_v30 = vmul.f32 %v3140_v46, %v10979_v33  ;;  %v11066_v38 = vld [vmem:[#allocation38_spill] sm:$0xff]  ;;  %v11067_v14 = vld [vmem:[#allocation52_spill] sm:$0xff]  ;;  %vm11089_vm8 = vmmov %vm11007_vm1 }
 0x36a   : > { %v3987_v63 = vmul.f32 %v10648_v6, %v10979_v33  ;;  %v4927_v51 = vadd.f32 %v4859_v18, %v4694_v54  ;;  %v4928_v25 = vadd.f32 %v4861_v4, %v4695_v58  ;;  %v11058_v32 = vrot.slane %v11057_v39, 1  ;;  %vm11092_vm5 = vmmov %vm11007_vm1 }
 0x36b   : > { %v3763_v12 = vrot.slane %v3683_v50, 2  ;;  %v3799_v17 = vrot.slane %v11060_v41, 2  ;;  %v3290_v21 = vadd.f32 %v9876_v15, %v3257_v44  ;;  %v3291_v10 = vadd.f32 %v9876_v15, %v3258_v1  ;;  %vm11094_vm7 = vmmov %vm11007_vm1 }
 0x36c   : > { %v3404_v62 = vsel %vm11059_vm10, %v3401_v24, %v11058_v32  ;;  %v3917_v49 = vmul.f32 %v7533_v28, %v3880_v9  ;;  %v4946_v55 = vpack.c.bf16 %v4928_v25, %v4927_v51  ;;  %v11062_v29 = vrot.slane %v11061_v20, 2  ;;  %v11074_v20 = vld [vmem:[#allocation35_spill] sm:$0xff]  ;;  %vm11095_vm4 = vmmov %vm11007_vm1 }
 0x36d   : > { %v11065_v16 = vrot.slane %v11064_v53, 2  ;;  %v4180_v24 = vmul.f32 %v3564_v43, %v10979_v33  ;;  %v3484_v61 = vadd.f32 %v3402_v37, %v3290_v21  ;;  %v3485_v18 = vadd.f32 %v3404_v62, %v3291_v10  ;;  %v11068_v37 = vld [vmem:[#allocation33_spill] sm:$0xff]  ;;  %v11077_v53 = vld [vmem:[#allocation46_spill] sm:$0xff] }
 0x36e   : > { %v3764_v6 = vsel %vm11063_vm2, %v11062_v29, %v3763_v12  ;;  %v3918_v4 = vmul.f32 %v7533_v28, %v3881_v30  ;;  %v4064_v59 = vrot.slane %v3987_v63, 1  ;;  %v5090_v36 = vshrl.u32 %v4946_v55, 16  ;;  %v11071_v63 = vld [vmem:[#allocation23_spill] sm:$0xff] }
 0x36f   : > { %v3766_v60 = vsel %vm11007_vm1, %v3763_v12, %v11065_v16  ;;  %v5093_v40 = vshll.u32 %v4946_v55, 16  ;;  %v4217_v5 = vmul.f32 %v7638_v2, %v4180_v24  ;;  %v4414_v54 = vmul.f32 %v3138_v45, %v11066_v38 }
 0x370   : > { %v3848_v58 = vadd.f32 %v3764_v6, %v3484_v61  ;;  %v3849_v50 = vadd.f32 %v3766_v60, %v3485_v18  ;;  %v4415_v9 = vmul.f32 %v3140_v46, %v11067_v14  ;;  %v4521_v44 = vmul.f32 %v7652_v11, %v11067_v14 }
 0x371   : > { %v5092_v1 = vrot.slane %v5090_v36, 3  ;;  %v5095_v33 = vrot.slane %v5093_v40, 4  ;;  %v11069_v51 = vrot.slane %v11068_v37, 1  ;;  %v11072_v25 = vrot.slane %v11071_v63, 1 }
 0x372   : > { %v3950_v32 = vadd.f32 %v3917_v49, %v3848_v58  ;;  %v3951_v62 = vadd.f32 %v3918_v4, %v3849_v50  ;;  %v4296_v45 = vrot.slane %v4217_v5, 2  ;;  %v4596_v12 = vrot.slane %v4521_v44, 1  ;;  %v11084_v5 = vld [vmem:[#allocation17_spill] sm:$0xff] }
 0x373   : > { %v4065_v30 = vsel %vm11070_vm11, %v11069_v51, %v4064_v59  ;;  %v4067_v39 = vsel %vm11073_vm3, %v4064_v59, %v11072_v25  ;;  %v10194_v41 = vor.u32 %v5095_v33, %v5092_v1  ;;  %v4451_v46 = vmul.f32 %v7643_v0, %v4414_v54  ;;  %v11081_v59 = vld [vmem:[#allocation13_spill] sm:$0xff]  ;;  %v11085_v54 = vld [vmem:[#allocation11_spill] sm:$0xff] }
 0x374   : > { %v4452_v11 = vmul.f32 %v7643_v0, %v4415_v9  ;;  %v4711_v21 = vmul.f32 %v3564_v43, %v11067_v14  ;;  %v4147_v10 = vadd.f32 %v4065_v30, %v3950_v32  ;;  %v4148_v55 = vadd.f32 %v4067_v39, %v3951_v62  ;;  %v11088_v9 = vld [vmem:[#allocation21_spill] sm:$0xff]  ;;  %v11090_v33 = vld [vmem:[#allocation19_spill] sm:$0xff] }
 0x375   : > { %v11075_v29 = vrot.slane %v11074_v20, 2  ;;  %v11078_v16 = vrot.slane %v11077_v53, 2  ;;  %v5097_v60 = vsel %vm4954_vm0, %v10091_v8, %v10194_v41  ;;  %v3238_v61 = vmul.f32 %v10992_v23, %v9911_v31  ;;  %v4948_v8 = vld [vmem:[%s10315_s6] sm:$0xf] }
 0x376   : > { %v4747_v24 = vmul.f32 %v9603_v48, %v4711_v21  ;;  %v3800_v43 = vsel %vm11080_vm14, %v3797_v52, %v3799_v17  ;;  %5491 = vmatprep.subr.msk.bf16.mxu1 %vm1702_vm9, %v5097_v60  ;;  %v11082_v36 = vrot.slane %v11081_v59, 1  ;;  %v4198_v38 = vmul.f32 0.0, %v11084_v5 }
 0x377   : > { %v4297_v6 = vsel %vm11076_vm12, %v11075_v29, %v4296_v45  ;;  %v4299_v49 = vsel %vm11079_vm13, %v4296_v45, %v11078_v16  ;;  %v11086_v31 = vrot.slane %v11085_v54, 1  ;;  %v3275_v52 = vmul.f32 %v7400_v19, %v3238_v61 }
 0x378   : > { %v4381_v18 = vadd.f32 %v4297_v6, %v4147_v10  ;;  %v4382_v4 = vadd.f32 %v4299_v49, %v4148_v55  ;;  %v4597_v40 = vsel %vm11083_vm15, %v11082_v36, %v4596_v12  ;;  %v4826_v58 = vrot.slane %v4747_v24, 2 }
 0x379   : > { %v4599_v56 = vsel %vm11087_vm6, %v4596_v12, %v11086_v31  ;;  %v5835_v14 = vmov 0   ;;  %v3898_v44 = vmul.f32 %v10992_v23, %v11088_v9  ;;  %v11091_v37 = vrot.slane %v11090_v33, 2 }
 0x37a   : > { %v4484_v17 = vadd.f32 %v4451_v46, %v4381_v18  ;;  %v4485_v50 = vadd.f32 %v4452_v11, %v4382_v4  ;;  %5549 = vset.pattern.permute.xlu0 %v5835_v14  ;;  %v4827_v1 = vsel %vm11089_vm8, %v4824_v26, %v4826_v58  ;;  %v3308_v30 = vadd.f32 %v9876_v15, %v3275_v52  ;;  %v11096_v18 = vld [vmem:[#allocation26_spill] sm:$0xff] }
 0x37b   : > { %v4829_v51 = vsel %vm11092_vm5, %v4826_v58, %v11091_v37  ;;  %4951 = vperm.xlu0 %5549, %v4948_v8   ;;  %v4235_v25 = vmul.f32 %v7638_v2, %v4198_v38  ;;  %v3935_v47 = vmul.f32 %v7533_v28, %v3898_v44  ;;  %v4432_v26 = vmul.f32 0.0, %v10992_v23 }
 0x37c   : > { %v4678_v63 = vadd.f32 %v4597_v40, %v4484_v17  ;;  %v4679_v19 = vadd.f32 %v4599_v56, %v4485_v50  ;;  %v3502_v39 = vadd.f32 %v3435_v27, %v3308_v30  ;;  %v4765_v11 = vmul.f32 %v9603_v48, %v4198_v38 }
 0x37d   : > { %v4332_v46 = vrot.slane %v4235_v25, 2  ;;  %v11093_v55 = vrot.slane %v9922_v35, 1  ;;  %v4469_v3 = vmul.f32 %v7643_v0, %v4432_v26 }
 0x37e   : > { %v4911_v32 = vadd.f32 %v4827_v1, %v4678_v63  ;;  %v4912_v62 = vadd.f32 %v4829_v51, %v4679_v19  ;;  %v3866_v45 = vadd.f32 %v3800_v43, %v3502_v39  ;;  %v4862_v29 = vrot.slane %v4765_v11, 2 }
 0x37f   : > { %v4333_v28 = vsel %vm11094_vm7, %v4330_v22, %v4332_v46 }
 0x380   : > { %v4938_v12 = vpack.c.bf16 %v4912_v62, %v4911_v32  ;;  %v3968_v15 = vadd.f32 %v3935_v47, %v3866_v45  ;;  %v4863_v35 = vsel %vm11095_vm4, %v4860_v34, %v4862_v29 }
 0x382   : > { %v5018_v21 = vshrl.u32 %v4938_v12, 16  ;;  %v5021_v10 = vshll.u32 %v4938_v12, 16  ;;  %v4165_v2 = vadd.f32 %v11093_v55, %v3968_v15 }
 0x384   : > { %v5020_v27 = vrot.slane %v5018_v21, 3  ;;  %v5023_v20 = vrot.slane %v5021_v10, 4  ;;  %v4399_v23 = vadd.f32 %v4333_v28, %v4165_v2 }
 0x386   : > { %v5024_v6 = vor.u32 %v5023_v20, %v5020_v27  ;;  %v4502_v53 = vadd.f32 %v4469_v3, %v4399_v23 }
 0x388   : > { %v5025_v48 = vsel %vm4954_vm0, %v10080_v7, %v5024_v6  ;;  %v4696_v0 = vadd.f32 %v10116_v13, %v4502_v53  ;;  %v5034_v4 = vsel %vm4954_vm0, %v5024_v6, %v11096_v18  ;;  %v11097_v13 = vld [vmem:[#allocation12_spill] sm:$0xff] }
 0x389   : > { %v5129_v16 = vsel %vm1702_vm9, %v5025_v48, 0  ;;  %v5132_v57 = vsel %vm1702_vm9, %v5034_v4, 0 }
 0x38a   : > { %5439 = vmatpush3.bf16.xpose.msra.mxu1 %v5129_v16  ;;  %v4929_v49 = vadd.f32 %v4863_v35, %v4696_v0 }
 0x38c   : > { %v4947_v42 = vpack.c.bf16 %v4929_v49, %v4929_v49 }
 0x38e   : > { %v5099_v60 = vshrl.u32 %v4947_v42, 16  ;;  %v5102_v22 = vshll.u32 %v4947_v42, 16 }
 0x390   : > { %v5101_v24 = vrot.slane %v5099_v60, 3  ;;  %v5104_v61 = vrot.slane %v5102_v22, 4 }
 0x392   : > { %v5105_v43 = vor.u32 %v5104_v61, %v5101_v24 }
 0x394   : > { %v5106_v7 = vsel %vm4954_vm0, %v10194_v41, %v5105_v43 }
 0x395   : > { %5492 = vmatprep.subr.msk.bf16.mxu1 %vm1702_vm9, %v5106_v7 }
 0x396   : > { %5441 = vmatpush3.bf16.xpose.msra.mxu1 %v5132_v57 }
 0x39d   : > { %5443 = vmatmul.mubr.msk.bf16.vlgmr.msra.gmra.mrb[0].mxu1 %vm1702_vm9, %v11097_v13 }
 0x3fa   : > { %v4952_v34 = vpop.permute.xlu0 %4951 }
 0x470   : > { %v5192_v59 = vpop.f32.mrb[0].mxu1 }
 0x471   : > { %v5193_v36 = vadd.f32 %v5192_v59, %v4952_v34  ;;  %v5194_v40 = vpop.f32.mrb[1].mxu1 }
 0x472   : > { %v5195_v5 = vadd.f32 %v5194_v40, %v4952_v34  ;;  %v5196_v38 = vpop.f32.mrb[2].mxu1 }
 0x473   : > { %v5398_v8 = vmul.f32 -1.442695, %v5193_v36  ;;  %v5197_v54 = vpop.f32.mrb[3].mxu1 }
 0x474   : > { %v5399_v31 = vmul.f32 -1.442695, %v5195_v5 }
 0x475   : > { %5726 = vpow2.f32 %v5398_v8 }
 0x476   : > { %5728 = vpow2.f32 %v5399_v31 }
 0x47f   : > { %v5727_v41 = vpop.eup %5726 }
 0x480   : > { %v5729_v56 = vpop.eup %5728  ;;  %v5205_v58 = vadd.f32 1.0, %v5727_v41 }
 0x481   : > { %v5206_v52 = vadd.f32 1.0, %v5729_v56 }
 0x482   : > { %5730 = vrcp.f32 %v5205_v58 }
 0x483   : > { %5732 = vrcp.f32 %v5206_v52 }
 0x48c   : > { %v5731_v17 = vpop.eup %5730 }
 0x48d   : > { %v5733_v50 = vpop.eup %5732  ;;  %v5211_v14 = vmul.f32 %v5731_v17, %v5193_v36 }
 0x48e   : > { %v5212_v9 = vmul.f32 %v5733_v50, %v5195_v5 }
 0x490   : > { %v5215_v44 = vcombine.low %v5211_v14, %v5212_v9 }
 0x492   : > { %5217 = vst [vmem:[%s271_s19] sm:$0xff] %v5215_v44 }
 0x493   : > { %5769 = shalt.err (!%p5766_p3)
}
 0x494   : > { %s5770_s15 = scalar_lea.hbm %s10267_s23, 128  ;;  %s5774_s14 = scalar_lea.hbm %s10316_s7, 256 }
 0x495   : > { %p5771_p4 = scmp.ne.s32.totalorder %s10267_s23, %s5770_s15  ;;  %p5775_p9 = scmp.lt.u32.totalorder %s10267_s23, %s10316_s7 }
 0x496   : > { %p5776_p10 = scmp.lt.u32.totalorder %s5774_s14, %s5770_s15  ;;  %p5778_p12 = scmp.lt.u32.totalorder %s5770_s15, %s10267_s23 }
 0x497   : > { %p5772_p7 = pnand %p5771_p4, %p5915_p5 }
 0x498   : > { %p5777_p11 = por %p5776_p10, %p5775_p9 }
 0x499   : > { %p5773_p8 = pneg %p5772_p7 }
 0x49a   : > { %p5779_p13 = por %p5778_p12, %p5777_p11 }
 0x49c   : > { %p5780_p0 = pnand %p5779_p13, %p5773_p8 }
 0x49e   : > { %5783 = shalt.err (!%p5780_p0)
}
 0x49f   : > { %5494 = dma.vmem_to_hbm [thread:$0]  (%p5915_p5), %s10269_s20, 128, %s10267_s23, %s5219_s29  }
 0x4a0 PF: > { %p5500_p1 = scmp.ge.s32.totalorder %s5818_s27, 2  ;;  %s5245_s21 = sand.u32 1, %s5806_s24  }
 0x4a1   : > { %s5246_s22 = scalar_lea.sflag [#allocation3], %s5245_s21 }
 0x4a2   : > { %p5497_p2 = pnand %p5500_p1, %p5919_p6 }
 0x4a4   : > { %5801 = dma.done.wait (!%p5497_p2), %s5246_s22, 128  }
 0x4a5   : > { %5803 = vsyncadd (!%p5497_p2), %s5246_s22, 4294967168  ;;  %p17_p3 = scmp.ge.s32.totalorder %s5902_s30, 4   ;;  %s11098_s24 = smov %s5810_s25 }
 0x4a6   : > { %s11099_s25 = smov %s5814_s26  ;;  %s11100_s26 = smov %s5913_s10 }
 0x4a7   : > { %s11101_s27 = smov %s5902_s30  ;;  %19 = sbr.rel (!%p17_p3) target bundleno = 3 (0x3), region = 83 }
 0x4ae   :  { %5251 = vsyncpa [#allocation3], 1 }
 0x4af   :  { %5253 = vsyncpa [#allocation3 + $0x1], 1 }

</bundles_post_ra>
